<compile_context>
chip_gen: v7x
topology: tpu7x:2x2x1
jax: 0.10.0
libtpu: 0.0.40
codegen_flags: <defaults>
</compile_context>

<pallas_src>
import functools
import math

import jax
import jax.numpy as jnp
from jax import lax
from jax.experimental import pallas as pl
from jax.experimental.pallas import tpu as pltpu


# --------------------------------------------------------------------------- #
# Pallas kernel: one block of b_blk windows per grid step, processed in
# register-resident sub-chunks of `chunk_windows` windows.
# --------------------------------------------------------------------------- #
def _relpos_attn_kernel(x_ref, wqkv_ref, bqkv_ref, bias_ref, wproj_ref, bproj_ref, o_ref,
                        *, n_tok, num_heads, head_dim, chunk_windows, lane_dense):
    M, C = x_ref.shape                       # (b_blk * n_tok, C)
    mm_dtype = x_ref.dtype                   # matmul input dtype (f32 or bf16)
    chunk_rows = chunk_windows * n_tok
    n_chunks = M // chunk_rows

    # Block-invariant operands: loaded once, live across the chunk loop.
    w_qkv = wqkv_ref[...]                    # (C, 3C)   mm_dtype (Q columns pre-scaled)
    w_proj = wproj_ref[...]                  # (C, C)    mm_dtype
    b_qkv = bqkv_ref[...]                    # (1, 3C)   f32     (Q third pre-scaled)
    b_proj = bproj_ref[...]                  # (1, C)    f32
    bias = bias_ref[...]                     # (H, N, N) f32

    def process_chunk(c):
        r0 = c * chunk_rows
        if not isinstance(c, int):
            r0 = pl.multiple_of(r0, chunk_rows)
        x_c = x_ref[pl.ds(r0, chunk_rows), :]                                  # (rows, C)

        # Fused QKV projection for this chunk (scale already folded into the weights).
        qkv = jnp.dot(x_c, w_qkv, preferred_element_type=jnp.float32) + b_qkv  # (rows, 3C) f32

        ctx_parts = []
        for h in range(num_heads):           # short static unroll; chunk-local qkv is in vregs
            lo = h * head_dim
            q = qkv[:, lo:lo + head_dim].astype(mm_dtype)
            k = qkv[:, C + lo:C + lo + head_dim].astype(mm_dtype)
            v = qkv[:, 2 * C + lo:2 * C + lo + head_dim].astype(mm_dtype)
            q = q.reshape(chunk_windows, n_tok, head_dim)        # leading-dim regroup only
            k = k.reshape(chunk_windows, n_tok, head_dim)
            v = v.reshape(chunk_windows, n_tok, head_dim)

            # window-batched logits, contracting head_dim directly (no k.T materialization)
            s = jnp.einsum('bnd,bmd->bnm', q, k,
                           preferred_element_type=jnp.float32)   # (cw, N, N) f32
            s = s + bias[h]                                      # broadcast over windows

            # numerically stable softmax, strictly f32; reciprocal goes to the EUP slot
            s = s - jnp.max(s, axis=-1, keepdims=True)
            p = jnp.exp(s)
            p = p * pl.reciprocal(jnp.sum(p, axis=-1, keepdims=True), approx=True)

            ctx_h = jnp.einsum('bnm,bmd->bnd', p.astype(mm_dtype), v,
                               preferred_element_type=jnp.float32)             # (cw, N, Dh)
            ctx_parts.append(ctx_h.reshape(chunk_rows, head_dim))

        # Head merge = one lane concat, then a SINGLE (rows, C) @ (C, C) output projection.
        ctx = jnp.concatenate(ctx_parts, axis=-1).astype(mm_dtype)             # (rows, C)
        out_c = jnp.dot(ctx, w_proj, preferred_element_type=jnp.float32) + b_proj
        out_c = out_c.astype(o_ref.dtype)

        if lane_dense:
            # Experimental lane-dense store: pack 4 tokens per 128-lane row.
            ld_rows = chunk_rows * C // 128
            s0 = c * ld_rows
            if not isinstance(c, int):
                s0 = pl.multiple_of(s0, ld_rows)
            o_ref[pl.ds(s0, ld_rows), :] = out_c.reshape(ld_rows, 128)
        else:
            o_ref[pl.ds(r0, chunk_rows), :] = out_c

    if n_chunks <= 4:
        for c in range(n_chunks):            # fully static inner structure for small blocks
            process_chunk(c)
    else:
        def body(c, carry):
            process_chunk(c)
            return carry
        lax.fori_loop(0, n_chunks, body, 0, unroll=2)


# --------------------------------------------------------------------------- #
# Generation-aware sizing helpers.
# --------------------------------------------------------------------------- #
_MIB = 1024 * 1024


def _vmem_limit_bytes():
    """~half of physical VMEM, clamped to [32 MiB, 96 MiB] (32 on v7x, 64 on v5e/v6e)."""
    try:
        cap = int(pltpu.get_tpu_info().vmem_capacity_bytes)
    except Exception:
        cap = 64 * _MIB          # conservative (v7x-sized) fallback
    return max(32 * _MIB, min(96 * _MIB, cap // 2))


def _pick_batch_block(batch, n_tok, channels, mm_bytes, out_bytes, vmem_limit):
    """Largest divisor of `batch` whose double-buffered x/out blocks fit the VMEM budget,
    capped at 1024 windows/step, and keeping >= 4 grid steps when the batch allows
    (>= 2 pipelined steps per TensorCore on v7x)."""
    per_window = n_tok * channels * 2 * (mm_bytes + out_bytes)   # 2x-buffered x + out blocks
    budget = max(per_window, (vmem_limit - 4 * _MIB) // 2)       # leave headroom for scratch
    cap = max(1, min(1024, budget // per_window))
    if batch >= 4:
        cap = min(cap, batch // 4)
    elif batch >= 2:
        cap = min(cap, batch // 2)
    cap = max(1, cap)
    for cand in range(cap, 0, -1):
        if batch % cand == 0:
            return cand
    return 1


def _pick_chunk_windows(b_blk, target=8):
    """Largest divisor of b_blk <= target; keeps per-chunk temporaries register-resident."""
    for cand in range(min(target, b_blk), 0, -1):
        if b_blk % cand == 0:
            return cand
    return 1


# --------------------------------------------------------------------------- #
# Wrapper.
# --------------------------------------------------------------------------- #
def relpos_attention(x, w_qkv, b_qkv, rel_bias, w_proj, b_proj, *,
                     num_heads, mm_dtype=jnp.bfloat16, b_blk=None,
                     chunk_windows=None, lane_dense_out=False):
    """x: (B, N, C); rel_bias: (H, N, N). Returns (B, N, C) in x.dtype."""
    B, N, C = x.shape
    assert C % num_heads == 0
    head_dim = C // num_heads
    scale = head_dim ** (-0.5)
    out_dtype = x.dtype
    mm_bytes = jnp.dtype(mm_dtype).itemsize
    out_bytes = jnp.dtype(out_dtype).itemsize

    vmem_limit = _vmem_limit_bytes()
    if b_blk is None:
        b_blk = _pick_batch_block(B, N, C, mm_bytes, out_bytes, vmem_limit)
    assert B % b_blk == 0
    grid = (B // b_blk,)
    M = b_blk * N

    if chunk_windows is None:
        chunk_windows = _pick_chunk_windows(b_blk)
    assert 1 <= chunk_windows <= b_blk and b_blk % chunk_windows == 0

    # One-time weight fold: scale the Q columns of the QKV projection (weight + bias).
    w_qkv_f = w_qkv.astype(jnp.float32).at[:, :C].multiply(scale)
    b_qkv_f = b_qkv.astype(jnp.float32).at[:, :C].multiply(scale)

    # Wrapper-side (free) reshape to a flat 2-D slab; optional bf16 cast of matmul inputs.
    x2 = x.reshape(B * N, C).astype(mm_dtype)
    wqkv_c = w_qkv_f.astype(mm_dtype)
    wproj_c = w_proj.astype(mm_dtype)
    bproj_f = b_proj.astype(jnp.float32)
    bias_f = rel_bias.astype(jnp.float32)

    kernel = functools.partial(_relpos_attn_kernel,
                               n_tok=N, num_heads=num_heads, head_dim=head_dim,
                               chunk_windows=chunk_windows, lane_dense=lane_dense_out)

    if lane_dense_out:
        # TODO(synk): lane-dense store relies on an in-kernel (rows,C)->(rows*C/128,128)
        # relayout; enable only after a bundle-dump A/B at the production b_blk.
        assert (M * C) % 128 == 0 and (M * C // 128) % 8 == 0
        out_struct = jax.ShapeDtypeStruct((B * N * C // 128, 128), out_dtype)
        out_spec = pl.BlockSpec((M * C // 128, 128), lambda i: (i, 0))
    else:
        out_struct = jax.ShapeDtypeStruct((B * N, C), out_dtype)
        out_spec = pl.BlockSpec((M, C), lambda i: (i, 0))

    # Advisory cost estimate for XLA scheduling around the custom call.
    flops = (2 * B * N * C * 3 * C                        # qkv projection
             + 2 * 2 * B * num_heads * N * N * head_dim   # q@k^T and p@v
             + 2 * B * N * C * C)                         # output projection
    transcendentals = B * num_heads * N * N               # softmax exp
    bytes_accessed = (B * N * C * mm_bytes                # x
                      + B * N * C * out_bytes             # out
                      + (C * 3 * C + C * C) * mm_bytes    # weights
                      + (3 * C + C) * 4                   # biases
                      + num_heads * N * N * 4)            # rel-pos bias
    cost = pl.CostEstimate(flops=flops, transcendentals=transcendentals,
                           bytes_accessed=bytes_accessed)

    out2 = pl.pallas_call(
        kernel,
        out_shape=out_struct,
        grid_spec=pltpu.PrefetchScalarGridSpec(
            num_scalar_prefetch=0,
            grid=grid,
            in_specs=[
                pl.BlockSpec((M, C), lambda i: (i, 0)),                 # x block (b_blk windows)
                pl.BlockSpec((C, 3 * C), lambda i: (0, 0)),             # qkv weight (resident)
                pl.BlockSpec((1, 3 * C), lambda i: (0, 0)),             # qkv bias
                pl.BlockSpec((num_heads, N, N), lambda i: (0, 0, 0)),   # rel-pos bias (H, N, N)
                pl.BlockSpec((C, C), lambda i: (0, 0)),                 # proj weight
                pl.BlockSpec((1, C), lambda i: (0, 0)),                 # proj bias
            ],
            out_specs=out_spec,
        ),
        compiler_params=pltpu.CompilerParams(
            dimension_semantics=("parallel",),
            vmem_limit_bytes=vmem_limit,
        ),
        cost_estimate=cost,
    )(x2, wqkv_c, b_qkv_f, bias_f, wproj_c, bproj_f)

    return out2.reshape(B, N, C)


# --------------------------------------------------------------------------- #
# Glue: relative position index + bias gather (pure indexing, stays in JAX).
# --------------------------------------------------------------------------- #
def make_relative_position_index(input_resolution):
    Wh, Ww = input_resolution
    coords_h = jnp.arange(Wh)
    coords_w = jnp.arange(Ww)
    coords = jnp.stack(jnp.meshgrid(coords_h, coords_w, indexing="ij"))   # (2, Wh, Ww)
    coords_flat = coords.reshape(2, -1)                                   # (2, N)
    rel = coords_flat[:, :, None] - coords_flat[:, None, :]               # (2, N, N)
    rel = rel.transpose(1, 2, 0)                                          # (N, N, 2)
    rel0 = (rel[..., 0] + Wh - 1) * (2 * Ww - 1)
    rel1 = rel[..., 1] + Ww - 1
    return rel0 + rel1                                                    # (N, N) int32


def gather_relative_position_bias(table, rel_index, num_heads):
    N = rel_index.shape[0]
    bias = table[rel_index.reshape(-1)].reshape(N, N, num_heads)          # (N, N, H)
    return jnp.transpose(bias, (2, 0, 1))                                 # (H, N, N)


# --------------------------------------------------------------------------- #
# Pure-JAX reference (mirrors the PyTorch forward) for a correctness check.
# --------------------------------------------------------------------------- #
def reference_forward(x, w_qkv, b_qkv, rel_bias, w_proj, b_proj, num_heads):
    B, N, C = x.shape
    head_dim = C // num_heads
    scale = head_dim ** (-0.5)
    qkv = x @ w_qkv + b_qkv[0]                                            # (B, N, 3C)
    qkv = qkv.reshape(B, N, 3, num_heads, head_dim).transpose(2, 0, 3, 1, 4)
    q, k, v = qkv[0], qkv[1], qkv[2]                                      # (B, H, N, Dh)
    attn = (q * scale) @ jnp.swapaxes(k, -2, -1)                          # (B, H, N, N)
    attn = attn + rel_bias[None]
    attn = jax.nn.softmax(attn, axis=-1)
    out = (attn @ v).transpose(0, 2, 1, 3).reshape(B, N, C)
    return out @ w_proj + b_proj[0]


# --------------------------------------------------------------------------- #
if __name__ == "__main__":
    # Small shapes consistent with the module: dim=32, heads=4, window 4x4 -> N=16.
    B = 32                                  # windows (kept small for the demo)
    input_resolution = (4, 4)
    N = input_resolution[0] * input_resolution[1]
    dim = 32
    num_heads = 4

    key = jax.random.PRNGKey(0)
    kx, kt, kw1, kb1, kw2, kb2 = jax.random.split(key, 6)

    x = jax.random.normal(kx, (B, N, dim), dtype=jnp.float32)

    # Deterministic synthetic parameters (trunc_normal std=0.02 approximated by normal*0.02).
    table_rows = (2 * input_resolution[0] - 1) * (2 * input_resolution[1] - 1)
    rel_table = 0.02 * jax.random.normal(kt, (table_rows, num_heads), dtype=jnp.float32)
    w_qkv = (1.0 / math.sqrt(dim)) * jax.random.normal(kw1, (dim, 3 * dim), dtype=jnp.float32)
    b_qkv = 0.01 * jax.random.normal(kb1, (1, 3 * dim), dtype=jnp.float32)
    w_proj = (1.0 / math.sqrt(dim)) * jax.random.normal(kw2, (dim, dim), dtype=jnp.float32)
    b_proj = 0.01 * jax.random.normal(kb2, (1, dim), dtype=jnp.float32)

    rel_index = make_relative_position_index(input_resolution)
    rel_bias = gather_relative_position_bias(rel_table, rel_index, num_heads)  # (H, N, N)

    ref = reference_forward(x, w_qkv, b_qkv, rel_bias, w_proj, b_proj, num_heads)

    # 1) f32 matmul path, auto config (b_blk=8 -> grid of 4, single inlined chunk per step).
    out_f32 = relpos_attention(x, w_qkv, b_qkv, rel_bias, w_proj, b_proj,
                               num_heads=num_heads, mm_dtype=jnp.float32)
    out_f32 = jax.block_until_ready(out_f32)
    assert out_f32.shape == (B, N, dim)
    assert jnp.allclose(out_f32, ref, atol=5e-3, rtol=5e-3), "f32 Pallas kernel mismatch"

    # 2) bf16 matmul path (default: 2x MXU throughput, half the weight/activation traffic).
    out_bf16 = relpos_attention(x, w_qkv, b_qkv, rel_bias, w_proj, b_proj,
                                num_heads=num_heads, mm_dtype=jnp.bfloat16)
    out_bf16 = jax.block_until_ready(out_bf16)
    assert out_bf16.shape == (B, N, dim)
    assert jnp.allclose(out_bf16, ref, atol=5e-2, rtol=5e-2), "bf16 Pallas kernel mismatch"

    # 3) f32 path exercising the in-kernel chunk loop (lax.fori_loop) and a different grid.
    out_loop = relpos_attention(x, w_qkv, b_qkv, rel_bias, w_proj, b_proj,
                                num_heads=num_heads, mm_dtype=jnp.float32,
                                b_blk=16, chunk_windows=2)
    out_loop = jax.block_until_ready(out_loop)
    assert out_loop.shape == (B, N, dim)
    assert jnp.allclose(out_loop, ref, atol=5e-3, rtol=5e-3), "chunk-loop Pallas kernel mismatch"

    print("KERNEL_OK")
</pallas_src>

<mosaic_0001>
module attributes {stable_mosaic.version = 11 : i64} {
  func.func @_relpos_attn_kernel(%arg0: i32, %arg1: memref<128x32xf32, #tpu.memory_space<vmem>>, %arg2: memref<32x96xf32, #tpu.memory_space<vmem>>, %arg3: memref<1x96xf32, #tpu.memory_space<vmem>>, %arg4: memref<4x16x16xf32, #tpu.memory_space<vmem>>, %arg5: memref<32x32xf32, #tpu.memory_space<vmem>>, %arg6: memref<1x32xf32, #tpu.memory_space<vmem>>, %arg7: memref<128x32xf32, #tpu.memory_space<vmem>>) attributes {dimension_semantics = [#tpu.dimension_semantics<parallel>], iteration_bounds = array<i64: 4>, scalar_prefetch = 0 : i64, scratch_operands = 0 : i64, tpu.core_type = #tpu.core_type<tc>, window_params = [{transform_indices = @transform_0, window_bounds = array<i64: 128, 32>}, {pipeline_mode = #tpu.pipeline_mode<synchronous>, transform_indices = @transform_1, window_bounds = array<i64: 32, 96>}, {pipeline_mode = #tpu.pipeline_mode<synchronous>, transform_indices = @transform_2, window_bounds = array<i64: 1, 96>}, {pipeline_mode = #tpu.pipeline_mode<synchronous>, transform_indices = @transform_3, window_bounds = array<i64: 4, 16, 16>}, {pipeline_mode = #tpu.pipeline_mode<synchronous>, transform_indices = @transform_4, window_bounds = array<i64: 32, 32>}, {pipeline_mode = #tpu.pipeline_mode<synchronous>, transform_indices = @transform_5, window_bounds = array<i64: 1, 32>}, {transform_indices = @transform_6, window_bounds = array<i64: 128, 32>}]} {
    %c0 = arith.constant 0 : index
    %c0_0 = arith.constant 0 : index
    %0 = vector.load %arg2[%c0, %c0_0] : memref<32x96xf32, #tpu.memory_space<vmem>>, vector<32x96xf32>
    %c0_1 = arith.constant 0 : index
    %c0_2 = arith.constant 0 : index
    %1 = vector.load %arg5[%c0_1, %c0_2] : memref<32x32xf32, #tpu.memory_space<vmem>>, vector<32x32xf32>
    %c0_3 = arith.constant 0 : index
    %c0_4 = arith.constant 0 : index
    %2 = vector.load %arg3[%c0_3, %c0_4] : memref<1x96xf32, #tpu.memory_space<vmem>>, vector<1x96xf32>
    %c0_5 = arith.constant 0 : index
    %c0_6 = arith.constant 0 : index
    %3 = vector.load %arg6[%c0_5, %c0_6] : memref<1x32xf32, #tpu.memory_space<vmem>>, vector<1x32xf32>
    %c0_7 = arith.constant 0 : index
    %c0_8 = arith.constant 0 : index
    %c0_9 = arith.constant 0 : index
    %4 = vector.load %arg4[%c0_7, %c0_8, %c0_9] : memref<4x16x16xf32, #tpu.memory_space<vmem>>, vector<4x16x16xf32>
    %c0_10 = arith.constant 0 : index
    %c0_11 = arith.constant 0 : index
    %5 = vector.load %arg1[%c0_10, %c0_11] : memref<128x32xf32, #tpu.memory_space<vmem>>, vector<128x32xf32>
    %cst = arith.constant dense<0.000000e+00> : vector<128x96xf32>
    %6 = tpu.matmul %5, %0, %cst {dimension_numbers = #tpu.dot_dimension_numbers<[1], [0], [0], [1], [0, 0, 1, 1], [], []>} : vector<128x32xf32>, vector<32x96xf32>, vector<128x96xf32> -> vector<128x96xf32>
    %7 = vector.broadcast %2 : vector<1x96xf32> to vector<128x96xf32>
    %8 = arith.addf %6, %7 : vector<128x96xf32>
    %9 = vector.extract_strided_slice %8 {offsets = [0, 0], sizes = [128, 8], strides = [1, 1]} : vector<128x96xf32> to vector<128x8xf32>
    %10 = vector.extract_strided_slice %8 {offsets = [0, 32], sizes = [128, 8], strides = [1, 1]} : vector<128x96xf32> to vector<128x8xf32>
    %11 = vector.extract_strided_slice %8 {offsets = [0, 64], sizes = [128, 8], strides = [1, 1]} : vector<128x96xf32> to vector<128x8xf32>
    %12 = vector.shape_cast %9 : vector<128x8xf32> to vector<8x16x8xf32>
    %13 = vector.shape_cast %10 : vector<128x8xf32> to vector<8x16x8xf32>
    %14 = vector.shape_cast %11 : vector<128x8xf32> to vector<8x16x8xf32>
    "tpu.trace_start"() <{level = 10 : i32, message = "bnd,bmd->bnm"}> : () -> ()
    %cst_12 = arith.constant dense<0.000000e+00> : vector<8x16x16xf32>
    %15 = tpu.matmul %12, %13, %cst_12 {dimension_numbers = #tpu.dot_dimension_numbers<[2], [2], [1], [1], [0, 0, 0, 1, 1, 1], [0], [0]>} : vector<8x16x8xf32>, vector<8x16x8xf32>, vector<8x16x16xf32> -> vector<8x16x16xf32>
    "tpu.trace_stop"() : () -> ()
    %16 = vector.extract_strided_slice %4 {offsets = [0, 0, 0], sizes = [1, 16, 16], strides = [1, 1, 1]} : vector<4x16x16xf32> to vector<1x16x16xf32>
    %17 = vector.shape_cast %16 : vector<1x16x16xf32> to vector<16x16xf32>
    %18 = vector.shape_cast %17 : vector<16x16xf32> to vector<1x16x16xf32>
    %19 = vector.broadcast %18 : vector<1x16x16xf32> to vector<8x16x16xf32>
    %20 = arith.addf %15, %19 : vector<8x16x16xf32>
    %cst_13 = arith.constant dense<0xFF800000> : vector<8x16xf32>
    %21 = vector.multi_reduction <maximumf>, %20, %cst_13 [2] : vector<8x16x16xf32> to vector<8x16xf32>
    %22 = vector.shape_cast %21 : vector<8x16xf32> to vector<8x16x1xf32>
    %23 = vector.broadcast %22 : vector<8x16x1xf32> to vector<8x16x16xf32>
    %24 = arith.subf %20, %23 : vector<8x16x16xf32>
    %25 = math.exp %24 : vector<8x16x16xf32>
    %cst_14 = arith.constant dense<0.000000e+00> : vector<8x16xf32>
    %26 = vector.multi_reduction <add>, %25, %cst_14 [2] : vector<8x16x16xf32> to vector<8x16xf32>
    %27 = vector.shape_cast %26 : vector<8x16xf32> to vector<8x16x1xf32>
    %28 = tpu.reciprocal %27 {approx = true} : vector<8x16x1xf32> -> vector<8x16x1xf32>
    %29 = vector.broadcast %28 : vector<8x16x1xf32> to vector<8x16x16xf32>
    %30 = arith.mulf %25, %29 : vector<8x16x16xf32>
    "tpu.trace_start"() <{level = 10 : i32, message = "bnm,bmd->bnd"}> : () -> ()
    %cst_15 = arith.constant dense<0.000000e+00> : vector<8x16x8xf32>
    %31 = tpu.matmul %30, %14, %cst_15 {dimension_numbers = #tpu.dot_dimension_numbers<[2], [1], [1], [2], [0, 0, 0, 1, 1, 2], [0], [0]>} : vector<8x16x16xf32>, vector<8x16x8xf32>, vector<8x16x8xf32> -> vector<8x16x8xf32>
    "tpu.trace_stop"() : () -> ()
    %32 = vector.shape_cast %31 : vector<8x16x8xf32> to vector<128x8xf32>
    %33 = vector.extract_strided_slice %8 {offsets = [0, 8], sizes = [128, 8], strides = [1, 1]} : vector<128x96xf32> to vector<128x8xf32>
    %34 = vector.extract_strided_slice %8 {offsets = [0, 40], sizes = [128, 8], strides = [1, 1]} : vector<128x96xf32> to vector<128x8xf32>
    %35 = vector.extract_strided_slice %8 {offsets = [0, 72], sizes = [128, 8], strides = [1, 1]} : vector<128x96xf32> to vector<128x8xf32>
    %36 = vector.shape_cast %33 : vector<128x8xf32> to vector<8x16x8xf32>
    %37 = vector.shape_cast %34 : vector<128x8xf32> to vector<8x16x8xf32>
    %38 = vector.shape_cast %35 : vector<128x8xf32> to vector<8x16x8xf32>
    "tpu.trace_start"() <{level = 10 : i32, message = "bnd,bmd->bnm"}> : () -> ()
    %cst_16 = arith.constant dense<0.000000e+00> : vector<8x16x16xf32>
    %39 = tpu.matmul %36, %37, %cst_16 {dimension_numbers = #tpu.dot_dimension_numbers<[2], [2], [1], [1], [0, 0, 0, 1, 1, 1], [0], [0]>} : vector<8x16x8xf32>, vector<8x16x8xf32>, vector<8x16x16xf32> -> vector<8x16x16xf32>
    "tpu.trace_stop"() : () -> ()
    %40 = vector.extract_strided_slice %4 {offsets = [1, 0, 0], sizes = [1, 16, 16], strides = [1, 1, 1]} : vector<4x16x16xf32> to vector<1x16x16xf32>
    %41 = vector.shape_cast %40 : vector<1x16x16xf32> to vector<16x16xf32>
    %42 = vector.shape_cast %41 : vector<16x16xf32> to vector<1x16x16xf32>
    %43 = vector.broadcast %42 : vector<1x16x16xf32> to vector<8x16x16xf32>
    %44 = arith.addf %39, %43 : vector<8x16x16xf32>
    %cst_17 = arith.constant dense<0xFF800000> : vector<8x16xf32>
    %45 = vector.multi_reduction <maximumf>, %44, %cst_17 [2] : vector<8x16x16xf32> to vector<8x16xf32>
    %46 = vector.shape_cast %45 : vector<8x16xf32> to vector<8x16x1xf32>
    %47 = vector.broadcast %46 : vector<8x16x1xf32> to vector<8x16x16xf32>
    %48 = arith.subf %44, %47 : vector<8x16x16xf32>
    %49 = math.exp %48 : vector<8x16x16xf32>
    %cst_18 = arith.constant dense<0.000000e+00> : vector<8x16xf32>
    %50 = vector.multi_reduction <add>, %49, %cst_18 [2] : vector<8x16x16xf32> to vector<8x16xf32>
    %51 = vector.shape_cast %50 : vector<8x16xf32> to vector<8x16x1xf32>
    %52 = tpu.reciprocal %51 {approx = true} : vector<8x16x1xf32> -> vector<8x16x1xf32>
    %53 = vector.broadcast %52 : vector<8x16x1xf32> to vector<8x16x16xf32>
    %54 = arith.mulf %49, %53 : vector<8x16x16xf32>
    "tpu.trace_start"() <{level = 10 : i32, message = "bnm,bmd->bnd"}> : () -> ()
    %cst_19 = arith.constant dense<0.000000e+00> : vector<8x16x8xf32>
    %55 = tpu.matmul %54, %38, %cst_19 {dimension_numbers = #tpu.dot_dimension_numbers<[2], [1], [1], [2], [0, 0, 0, 1, 1, 2], [0], [0]>} : vector<8x16x16xf32>, vector<8x16x8xf32>, vector<8x16x8xf32> -> vector<8x16x8xf32>
    "tpu.trace_stop"() : () -> ()
    %56 = vector.shape_cast %55 : vector<8x16x8xf32> to vector<128x8xf32>
    %57 = vector.extract_strided_slice %8 {offsets = [0, 16], sizes = [128, 8], strides = [1, 1]} : vector<128x96xf32> to vector<128x8xf32>
    %58 = vector.extract_strided_slice %8 {offsets = [0, 48], sizes = [128, 8], strides = [1, 1]} : vector<128x96xf32> to vector<128x8xf32>
    %59 = vector.extract_strided_slice %8 {offsets = [0, 80], sizes = [128, 8], strides = [1, 1]} : vector<128x96xf32> to vector<128x8xf32>
    %60 = vector.shape_cast %57 : vector<128x8xf32> to vector<8x16x8xf32>
    %61 = vector.shape_cast %58 : vector<128x8xf32> to vector<8x16x8xf32>
    %62 = vector.shape_cast %59 : vector<128x8xf32> to vector<8x16x8xf32>
    "tpu.trace_start"() <{level = 10 : i32, message = "bnd,bmd->bnm"}> : () -> ()
    %cst_20 = arith.constant dense<0.000000e+00> : vector<8x16x16xf32>
    %63 = tpu.matmul %60, %61, %cst_20 {dimension_numbers = #tpu.dot_dimension_numbers<[2], [2], [1], [1], [0, 0, 0, 1, 1, 1], [0], [0]>} : vector<8x16x8xf32>, vector<8x16x8xf32>, vector<8x16x16xf32> -> vector<8x16x16xf32>
    "tpu.trace_stop"() : () -> ()
    %64 = vector.extract_strided_slice %4 {offsets = [2, 0, 0], sizes = [1, 16, 16], strides = [1, 1, 1]} : vector<4x16x16xf32> to vector<1x16x16xf32>
    %65 = vector.shape_cast %64 : vector<1x16x16xf32> to vector<16x16xf32>
    %66 = vector.shape_cast %65 : vector<16x16xf32> to vector<1x16x16xf32>
    %67 = vector.broadcast %66 : vector<1x16x16xf32> to vector<8x16x16xf32>
    %68 = arith.addf %63, %67 : vector<8x16x16xf32>
    %cst_21 = arith.constant dense<0xFF800000> : vector<8x16xf32>
    %69 = vector.multi_reduction <maximumf>, %68, %cst_21 [2] : vector<8x16x16xf32> to vector<8x16xf32>
    %70 = vector.shape_cast %69 : vector<8x16xf32> to vector<8x16x1xf32>
    %71 = vector.broadcast %70 : vector<8x16x1xf32> to vector<8x16x16xf32>
    %72 = arith.subf %68, %71 : vector<8x16x16xf32>
    %73 = math.exp %72 : vector<8x16x16xf32>
    %cst_22 = arith.constant dense<0.000000e+00> : vector<8x16xf32>
    %74 = vector.multi_reduction <add>, %73, %cst_22 [2] : vector<8x16x16xf32> to vector<8x16xf32>
    %75 = vector.shape_cast %74 : vector<8x16xf32> to vector<8x16x1xf32>
    %76 = tpu.reciprocal %75 {approx = true} : vector<8x16x1xf32> -> vector<8x16x1xf32>
    %77 = vector.broadcast %76 : vector<8x16x1xf32> to vector<8x16x16xf32>
    %78 = arith.mulf %73, %77 : vector<8x16x16xf32>
    "tpu.trace_start"() <{level = 10 : i32, message = "bnm,bmd->bnd"}> : () -> ()
    %cst_23 = arith.constant dense<0.000000e+00> : vector<8x16x8xf32>
    %79 = tpu.matmul %78, %62, %cst_23 {dimension_numbers = #tpu.dot_dimension_numbers<[2], [1], [1], [2], [0, 0, 0, 1, 1, 2], [0], [0]>} : vector<8x16x16xf32>, vector<8x16x8xf32>, vector<8x16x8xf32> -> vector<8x16x8xf32>
    "tpu.trace_stop"() : () -> ()
    %80 = vector.shape_cast %79 : vector<8x16x8xf32> to vector<128x8xf32>
    %81 = vector.extract_strided_slice %8 {offsets = [0, 24], sizes = [128, 8], strides = [1, 1]} : vector<128x96xf32> to vector<128x8xf32>
    %82 = vector.extract_strided_slice %8 {offsets = [0, 56], sizes = [128, 8], strides = [1, 1]} : vector<128x96xf32> to vector<128x8xf32>
    %83 = vector.extract_strided_slice %8 {offsets = [0, 88], sizes = [128, 8], strides = [1, 1]} : vector<128x96xf32> to vector<128x8xf32>
    %84 = vector.shape_cast %81 : vector<128x8xf32> to vector<8x16x8xf32>
    %85 = vector.shape_cast %82 : vector<128x8xf32> to vector<8x16x8xf32>
    %86 = vector.shape_cast %83 : vector<128x8xf32> to vector<8x16x8xf32>
    "tpu.trace_start"() <{level = 10 : i32, message = "bnd,bmd->bnm"}> : () -> ()
    %cst_24 = arith.constant dense<0.000000e+00> : vector<8x16x16xf32>
    %87 = tpu.matmul %84, %85, %cst_24 {dimension_numbers = #tpu.dot_dimension_numbers<[2], [2], [1], [1], [0, 0, 0, 1, 1, 1], [0], [0]>} : vector<8x16x8xf32>, vector<8x16x8xf32>, vector<8x16x16xf32> -> vector<8x16x16xf32>
    "tpu.trace_stop"() : () -> ()
    %88 = vector.extract_strided_slice %4 {offsets = [3, 0, 0], sizes = [1, 16, 16], strides = [1, 1, 1]} : vector<4x16x16xf32> to vector<1x16x16xf32>
    %89 = vector.shape_cast %88 : vector<1x16x16xf32> to vector<16x16xf32>
    %90 = vector.shape_cast %89 : vector<16x16xf32> to vector<1x16x16xf32>
    %91 = vector.broadcast %90 : vector<1x16x16xf32> to vector<8x16x16xf32>
    %92 = arith.addf %87, %91 : vector<8x16x16xf32>
    %cst_25 = arith.constant dense<0xFF800000> : vector<8x16xf32>
    %93 = vector.multi_reduction <maximumf>, %92, %cst_25 [2] : vector<8x16x16xf32> to vector<8x16xf32>
    %94 = vector.shape_cast %93 : vector<8x16xf32> to vector<8x16x1xf32>
    %95 = vector.broadcast %94 : vector<8x16x1xf32> to vector<8x16x16xf32>
    %96 = arith.subf %92, %95 : vector<8x16x16xf32>
    %97 = math.exp %96 : vector<8x16x16xf32>
    %cst_26 = arith.constant dense<0.000000e+00> : vector<8x16xf32>
    %98 = vector.multi_reduction <add>, %97, %cst_26 [2] : vector<8x16x16xf32> to vector<8x16xf32>
    %99 = vector.shape_cast %98 : vector<8x16xf32> to vector<8x16x1xf32>
    %100 = tpu.reciprocal %99 {approx = true} : vector<8x16x1xf32> -> vector<8x16x1xf32>
    %101 = vector.broadcast %100 : vector<8x16x1xf32> to vector<8x16x16xf32>
    %102 = arith.mulf %97, %101 : vector<8x16x16xf32>
    "tpu.trace_start"() <{level = 10 : i32, message = "bnm,bmd->bnd"}> : () -> ()
    %cst_27 = arith.constant dense<0.000000e+00> : vector<8x16x8xf32>
    %103 = tpu.matmul %102, %86, %cst_27 {dimension_numbers = #tpu.dot_dimension_numbers<[2], [1], [1], [2], [0, 0, 0, 1, 1, 2], [0], [0]>} : vector<8x16x16xf32>, vector<8x16x8xf32>, vector<8x16x8xf32> -> vector<8x16x8xf32>
    "tpu.trace_stop"() : () -> ()
    %104 = vector.shape_cast %103 : vector<8x16x8xf32> to vector<128x8xf32>
    %105 = tpu.concatenate %32, %56, %80, %104 in 1 : vector<128x8xf32>, vector<128x8xf32>, vector<128x8xf32>, vector<128x8xf32> -> vector<128x32xf32>
    %cst_28 = arith.constant dense<0.000000e+00> : vector<128x32xf32>
    %106 = tpu.matmul %105, %1, %cst_28 {dimension_numbers = #tpu.dot_dimension_numbers<[1], [0], [0], [1], [0, 0, 1, 1], [], []>} : vector<128x32xf32>, vector<32x32xf32>, vector<128x32xf32> -> vector<128x32xf32>
    %107 = vector.broadcast %3 : vector<1x32xf32> to vector<128x32xf32>
    %108 = arith.addf %106, %107 : vector<128x32xf32>
    %c0_29 = arith.constant 0 : index
    %c0_30 = arith.constant 0 : index
    %109 = vector.load %arg7[%c0_29, %c0_30] : memref<128x32xf32, #tpu.memory_space<vmem>>, vector<128x32xf32>
    tpu.vector_store %arg7[%c0_29, %c0_30], %108 {strides = array<i32>} : memref<128x32xf32, #tpu.memory_space<vmem>>, vector<128x32xf32>,
    return
  }
  func.func @transform_0(%arg0: i32) -> (i32, i32) {
    %c0_i32 = arith.constant 0 : i32
    %c0_i32_0 = arith.constant 0 : i32
    return %arg0, %c0_i32 : i32, i32
  }
  func.func @transform_1(%arg0: i32) -> (i32, i32) {
    %c0_i32 = arith.constant 0 : i32
    %c0_i32_0 = arith.constant 0 : i32
    %c0_i32_1 = arith.constant 0 : i32
    return %c0_i32, %c0_i32_0 : i32, i32
  }
  func.func @transform_2(%arg0: i32) -> (i32, i32) {
    %c0_i32 = arith.constant 0 : i32
    %c0_i32_0 = arith.constant 0 : i32
    %c0_i32_1 = arith.constant 0 : i32
    return %c0_i32, %c0_i32_0 : i32, i32
  }
  func.func @transform_3(%arg0: i32) -> (i32, i32, i32) {
    %c0_i32 = arith.constant 0 : i32
    %c0_i32_0 = arith.constant 0 : i32
    %c0_i32_1 = arith.constant 0 : i32
    %c0_i32_2 = arith.constant 0 : i32
    return %c0_i32, %c0_i32_0, %c0_i32_1 : i32, i32, i32
  }
  func.func @transform_4(%arg0: i32) -> (i32, i32) {
    %c0_i32 = arith.constant 0 : i32
    %c0_i32_0 = arith.constant 0 : i32
    %c0_i32_1 = arith.constant 0 : i32
    return %c0_i32, %c0_i32_0 : i32, i32
  }
  func.func @transform_5(%arg0: i32) -> (i32, i32) {
    %c0_i32 = arith.constant 0 : i32
    %c0_i32_0 = arith.constant 0 : i32
    %c0_i32_1 = arith.constant 0 : i32
    return %c0_i32, %c0_i32_0 : i32, i32
  }
  func.func @transform_6(%arg0: i32) -> (i32, i32) {
    %c0_i32 = arith.constant 0 : i32
    %c0_i32_0 = arith.constant 0 : i32
    return %arg0, %c0_i32 : i32, i32
  }
}

</mosaic_0001>

<bundles_post_ra>
// kernel: tpu_custom_call.1
= control target key start
LH: loop header
LB: loop body
LE: loop exit
PB: predicated region body
PF: predicated region fallthrough
CT: control target
= control target key end

     0   :  { %s9427_s21 = smov 0   ;;  %s11308_s0 = inlined_call_operand.vmem [shape: f32[512,32], index: 0, kind: input, shape index: {}]   ;;  %s11309_s1 = inlined_call_operand.vmem [shape: f32[32,96], index: 1, kind: input, shape index: {}]   ;;  %s11310_s2 = inlined_call_operand.vmem [shape: f32[1,96], index: 2, kind: input, shape index: {}]   ;;  %s11311_s3 = inlined_call_operand.vmem [shape: f32[4,16,16], index: 3, kind: input, shape index: {}]   ;;  %s11312_s4 = inlined_call_operand.vmem [shape: f32[32,32], index: 4, kind: input, shape index: {}]   ;;  %s11313_s5 = inlined_call_operand.vmem [shape: f32[1,32], index: 5, kind: input, shape index: {}]   ;;  %s11314_s6 = inlined_call_operand.vmem [shape: f32[512,32], index: 6, kind: output, shape index: {}]  }
   0x1 LB: > { %s7387_s22 = sadd.s32 4294967295, %s9376_s21   ;;  %p7391_p0 = scmp.ge.s32.totalorder %s9376_s21, 1  ;;  %s9376_s21 = sphi %s9427_s21, %s16_s21  }
   0x2   : > { %p213_p1 = scmp.lt.s32.totalorder %s9376_s21, 5 }
   0x4   : > { %p214_p2 = pnand %p7391_p0, %p213_p1 }
   0x6   : > { %217 = sbr.rel (%p214_p2) target bundleno = 3540 (0xdd4), region = 44 }
   0xd   : > { %v255_v0 = vld [vmem:[%s11309_s1] sm:$0xff]  ;;  %v256_v1 = vld [vmem:[%s11309_s1 + $0x8] sm:$0xff]  ;;  %v257_v2 = vld [vmem:[%s11309_s1 + $0x10] sm:$0xff]  ;;  %s7392_s29 = sshll.u32 %s7387_s22, 4  ;;  %vm295_vm0 = vcmask 261120   ;;  %vm495_vm1 = vcmask 64512  }
   0xe   : > { %v8432_v3 = vpack.c.bf16 %v256_v1, %v255_v0  ;;  %v258_v4 = vld [vmem:[%s11309_s1 + $0x18] sm:$0xff]  ;;  %p244_p3 = scmp.lt.s32.totalorder %s7392_s29, 63  ;;  %v7396_v22 = vld [vmem:[%s11310_s2] ss:$0 sm:$0xff]  ;;  %s9378_s14 = smov 96   ;;  %vm9586_vm2 = vmpackc.low %vm495_vm1, %vm495_vm1  ;;  %vm1202_vm3 = vcmask 130048  }
   0xf   : > { %v8436_v5 = vpack.c.bf16 %v258_v4, %v257_v2  ;;  %s9379_s15 = smov 64   ;;  %s9380_s20 = smov 88   ;;  %vm7099_vm4 = vcmask 195584  }
  0x10   : > { %8433 = vmatprep.subr.bf16.mxu0 %v8432_v3  ;;  %8768 = vmatprep.subr.bf16.mxu1 %v8432_v3  ;;  %s11372_s29 = smov (!%p244_p3, %s7392_s29), 63  ;;  %s9381_s22 = smov 120  }
  0x11   : > { %8435 = vmatpush3.bf16.msra.mxu0 %v8432_v3  ;;  %8770 = vmatpush3.bf16.msra.mxu1 %v8432_v3  ;;  %s7393_s8 = sshll.u32 %s11372_s29, 3  ;;  %s9382_s23 = smov 56  }
  0x12   : > { %8437 = vmatprep.subr.bf16.mxu0 %v8436_v5  ;;  %8769 = vmatprep.subr.bf16.mxu1 %v8436_v5  ;;  %s9455_s11 = scalar_lea.vmem %s11308_s0, %s7393_s8  ;;  %s9383_s28 = smov 80  }
  0x13   : > { %v273_v6 = vld [vmem:[%s9455_s11] sm:$0xff]  ;;  %v274_v7 = vld [vmem:[%s9455_s11 + $0x8] sm:$0xff]  ;;  %v275_v9 = vld [vmem:[%s9455_s11 + $0x10] sm:$0xff]  ;;  %s9384_s30 = smov 112   ;;  %s9385_s7 = smov 48  }
  0x14   : > { %7928 = vmatprep.mubr.msk.f32.mxu0 %vm295_vm0, %v273_v6  ;;  %v281_v8 = vld [vmem:[%s9455_s11 + $0x40] sm:$0xff]  ;;  %v282_v10 = vld [vmem:[%s9455_s11 + $0x48] sm:$0xff]  ;;  %v283_v11 = vld [vmem:[%s9455_s11 + $0x50] sm:$0xff]  ;;  %s9386_s13 = smov 72   ;;  %s9391_s9 = smov 24  }
  0x15   : > { %8439 = vmatpush3.bf16.msra.mxu0 %v8436_v5  ;;  %8771 = vmatpush3.bf16.msra.mxu1 %v8436_v5  ;;  %v276_v12 = vld [vmem:[%s9455_s11 + $0x18] sm:$0xff]  ;;  %v277_v13 = vld [vmem:[%s9455_s11 + $0x20] sm:$0xff]  ;;  %v278_v16 = vld [vmem:[%s9455_s11 + $0x28] sm:$0xff] }
  0x16   : > { %7940 = vmatprep.mubr.msk.f32.mxu1 %vm295_vm0, %v281_v8  ;;  %v284_v14 = vld [vmem:[%s9455_s11 + $0x58] sm:$0xff]  ;;  %v285_v15 = vld [vmem:[%s9455_s11 + $0x60] sm:$0xff]  ;;  %v279_v17 = vld [vmem:[%s9455_s11 + $0x30] sm:$0xff] }
  0x17   : > { %v286_v18 = vld [vmem:[%s9455_s11 + $0x68] sm:$0xff]  ;;  %v287_v19 = vld [vmem:[%s9455_s11 + $0x70] sm:$0xff]  ;;  %v280_v20 = vld [vmem:[%s9455_s11 + $0x38] sm:$0xff] }
  0x18   : > { %7929 = vmatmul.mubr.msk.f32.vlgmr.msra.gmra.mrb[0].mxu0 %vm295_vm0, %v274_v7  ;;  %7941 = vmatmul.mubr.msk.f32.vlgmr.msra.gmra.mrb[0].mxu1 %vm295_vm0, %v282_v10  ;;  %v288_v21 = vld [vmem:[%s9455_s11 + $0x78] sm:$0xff] }
  0x19   : > { %7931 = vmatprep.mubr.msk.f32.mxu0 %vm295_vm0, %v275_v9  ;;  %7943 = vmatprep.mubr.msk.f32.mxu1 %vm295_vm0, %v283_v11 }
  0x1c   : > { %7932 = vmatmul.mubr.msk.f32.gmra.mrb[2].mxu0 %vm295_vm0, %v276_v12  ;;  %7944 = vmatmul.mubr.msk.f32.gmra.mrb[2].mxu1 %vm295_vm0, %v284_v14 }
  0x1d   : > { %7934 = vmatprep.mubr.msk.f32.mxu0 %vm295_vm0, %v277_v13  ;;  %7946 = vmatprep.mubr.msk.f32.mxu1 %vm295_vm0, %v285_v15 }
  0x20   : > { %7935 = vmatmul.mubr.msk.f32.gmra.mrb[4].mxu0 %vm295_vm0, %v278_v16  ;;  %7947 = vmatmul.mubr.msk.f32.gmra.mrb[4].mxu1 %vm295_vm0, %v286_v18 }
  0x21   : > { %7937 = vmatprep.mubr.msk.f32.mxu0 %vm295_vm0, %v279_v17  ;;  %7949 = vmatprep.mubr.msk.f32.mxu1 %vm295_vm0, %v287_v19 }
  0x24   : > { %7938 = vmatmul.mubr.msk.f32.gmra.mrb[6].mxu0 %vm295_vm0, %v280_v20  ;;  %7950 = vmatmul.mubr.msk.f32.gmra.mrb[6].mxu1 %vm295_vm0, %v288_v21 }
  0xeb   : > { %v7930_v23 = vpop.f32.mrb[0].mxu0  ;;  %v7942_v26 = vpop.f32.mrb[0].mxu1 }
  0xec   : > { %v9492_v24 = vadd.f32 %v7930_v23, %v7396_v22  ;;  %v410_v25 = vpop.f32.mrb[1].mxu0  ;;  %v450_v28 = vpop.f32.mrb[1].mxu1  ;;  %v9512_v36 = vadd.f32 %v7942_v26, %v7396_v22 }
  0xed   : > { %v9494_v27 = vadd.f32 %v7396_v22, %v410_v25  ;;  %v9496_v29 = vadd.f32 %v7396_v22, %v450_v28 }
  0xef   : > { %v7933_v30 = vpop.f32.mrb[2].mxu0  ;;  %7956 = vmatprep.mubr.msk.f32.mxu1 %vm495_vm1, %v9494_v27  ;;  %v9502_v31 = vpack.i.bf16 %v9492_v24, %v9494_v27  ;;  %v7945_v34 = vpop.f32.mrb[2].mxu1  ;;  %7984 = vmatprep.mubr.msk.f32.mxu0 %vm495_vm1, %v9496_v29  ;;  %v9528_v46 = vpack.i.bf16 %v9512_v36, %v9496_v29 }
  0xf0   : > { %v9504_v32 = vadd.f32 %v7933_v30, %v7396_v22  ;;  %v420_v33 = vpop.f32.mrb[3].mxu0  ;;  %v460_v37 = vpop.f32.mrb[3].mxu1  ;;  %v9536_v50 = vadd.f32 %v7945_v34, %v7396_v22 }
  0xf1   : > { %v9508_v35 = vadd.f32 %v7396_v22, %v420_v33  ;;  %8795 = vrot.lane.b32.xlu0 %v9502_v31, %s9378_s14  ;;  %v9540_v54 = vadd.f32 %v7396_v22, %v460_v37 }
  0xf3   : > { %v7936_v38 = vpop.f32.mrb[4].mxu0  ;;  %v9516_v39 = vpack.i.bf16 %v9504_v32, %v9508_v35  ;;  %v7948_v42 = vpop.f32.mrb[4].mxu1  ;;  %v9566_v61 = vpack.i.bf16 %v9536_v50, %v9540_v54 }
  0xf4   : > { %v9518_v40 = vadd.f32 %v7936_v38, %v7396_v22  ;;  %v430_v41 = vpop.f32.mrb[5].mxu0  ;;  %v9524_v44 = vadd.f32 %v7948_v42, %v7396_v22  ;;  %v470_v45 = vpop.f32.mrb[5].mxu1 }
  0xf5   : > { %v9520_v43 = vadd.f32 %v7396_v22, %v430_v41  ;;  %8800 = vrot.lane.b32.xlu0 %v9516_v39, %s9378_s14  ;;  %v9530_v47 = vadd.f32 %v7396_v22, %v470_v45 }
  0xf7   : > { %v7939_v48 = vpop.f32.mrb[6].mxu0  ;;  %v9534_v49 = vpack.i.bf16 %v9518_v40, %v9520_v43  ;;  %v7951_v53 = vpop.f32.mrb[6].mxu1  ;;  %v9550_v56 = vpack.i.bf16 %v9524_v44, %v9530_v47 }
  0xf8   : > { %v9538_v51 = vadd.f32 %v7939_v48, %v7396_v22  ;;  %v440_v52 = vpop.f32.mrb[7].mxu0  ;;  %v480_v57 = vpop.f32.mrb[7].mxu1  ;;  %v9560_v59 = vadd.f32 %v7951_v53, %v7396_v22 }
  0xf9   : > { %v9542_v55 = vadd.f32 %v7396_v22, %v440_v52  ;;  %8805 = vrot.lane.b32.xlu1 %v9534_v49, %s9378_s14  ;;  %8815 = vrot.lane.b32.xlu0 %v9528_v46, %s9378_s14  ;;  %v9562_v60 = vadd.f32 %v7396_v22, %v480_v57 }
  0xfb   : > { %v9554_v58 = vpack.i.bf16 %v9538_v51, %v9542_v55  ;;  %v9573_v62 = vpack.i.bf16 %v9560_v59, %v9562_v60 }
  0xfd   : > { %8810 = vrot.lane.b32.xlu1 %v9554_v58, %s9378_s14  ;;  %8825 = vrot.lane.b32.xlu0 %v9550_v56, %s9378_s14 }
 0x101   : > { %8820 = vrot.lane.b32.xlu1 %v9566_v61, %s9378_s14  ;;  %8835 = vrot.lane.b32.xlu0 %v9502_v31, %s9379_s15 }
 0x105   : > { %8830 = vrot.lane.b32.xlu1 %v9573_v62, %s9378_s14  ;;  %8845 = vrot.lane.b32.xlu0 %v9534_v49, %s9379_s15  ;;  %s9387_s14 = smov 104  }
 0x109   : > { %8840 = vrot.lane.b32.xlu1 %v9516_v39, %s9379_s15  ;;  %8850 = vrot.lane.b32.xlu0 %v9528_v46, %s9379_s15 }
 0x10d   : > { %8855 = vrot.lane.b32.xlu1 %v9566_v61, %s9379_s15  ;;  %8860 = vrot.lane.b32.xlu0 %v9550_v56, %s9379_s15 }
 0x111   : > { %8865 = vrot.lane.b32.xlu1 %v9554_v58, %s9379_s15 }
 0x115   : > { %8870 = vrot.lane.b32.xlu1 %v9573_v62, %s9379_s15  ;;  %s9388_s15 = smov 40  }
 0x163   : > { %v8796_v63 = vpop.permute.xlu0 %8795 }
 0x164   : > { %v8798_v0 = vunpack.i.h.bf16 %v8796_v63  ;;  %v8797_v1 = vunpack.i.l.bf16 %v8796_v63 }
 0x166   : > { %v8440_v3 = vpack.c.bf16 %v8798_v0, %v8797_v1 }
 0x167   : > { %v8801_v4 = vpop.permute.xlu0 %8800 }
 0x168   : > { %v8803_v5 = vunpack.i.h.bf16 %v8801_v4  ;;  %v8802_v6 = vunpack.i.l.bf16 %v8801_v4  ;;  %8442 = vmatprep.subr.msk.bf16.mxu1 %vm9586_vm2, %v8440_v3 }
 0x169   : > { %8445 = vmatpush3.bf16.xpose.msk.msra.mxu1 %vm9586_vm2, %v8440_v3 }
 0x16a   : > { %v8446_v7 = vpack.c.bf16 %v8803_v5, %v8802_v6 }
 0x16b   : > { %v8806_v8 = vpop.permute.xlu1 %8805  ;;  %v8816_v9 = vpop.permute.xlu0 %8815 }
 0x16c   : > { %v8808_v10 = vunpack.i.h.bf16 %v8806_v8  ;;  %v8807_v11 = vunpack.i.l.bf16 %v8806_v8  ;;  %v8818_v12 = vunpack.i.h.bf16 %v8816_v9  ;;  %v8817_v13 = vunpack.i.l.bf16 %v8816_v9  ;;  %8448 = vmatprep.subr.msk.bf16.mxu1 %vm9586_vm2, %v8446_v7 }
 0x16e   : > { %v8452_v14 = vpack.c.bf16 %v8808_v10, %v8807_v11  ;;  %v8464_v15 = vpack.c.bf16 %v8818_v12, %v8817_v13  ;;  %v266_v10 = vld [vmem:[%s11311_s3 + $0x8] sm:$0xff] }
 0x16f   : > { %v8826_v16 = vpop.permute.xlu0 %8825  ;;  %v8811_v20 = vpop.permute.xlu1 %8810 }
 0x170   : > { %v8828_v17 = vunpack.i.h.bf16 %v8826_v16  ;;  %v8827_v18 = vunpack.i.l.bf16 %v8826_v16  ;;  %7957 = vmatmul.mubr.msk.f32.vlgmr.msra.gmra.mrb[8].mxu1 %vm495_vm1, %v9492_v24  ;;  %8466 = vmatprep.subr.msk.bf16.mxu0 %vm9586_vm2, %v8464_v15  ;;  %v8813_v22 = vunpack.i.h.bf16 %v8811_v20  ;;  %v8812_v23 = vunpack.i.l.bf16 %v8811_v20  ;;  %v265_v16 = vld [vmem:[%s11311_s3] sm:$0xff] }
 0x171   : > { %8451 = vmatpush3.bf16.xpose.msk.msra.mxu1 %vm9586_vm2, %v8446_v7  ;;  %7963 = vmatprep.mubr.msk.f32.mxu1 %vm495_vm1, %v9508_v35 }
 0x172   : > { %v8476_v19 = vpack.c.bf16 %v8828_v17, %v8827_v18  ;;  %8469 = vmatpush3.bf16.xpose.msk.msra.mxu0 %vm9586_vm2, %v8464_v15  ;;  %8454 = vmatprep.subr.msk.bf16.mxu1 %vm9586_vm2, %v8452_v14  ;;  %v8458_v28 = vpack.c.bf16 %v8813_v22, %v8812_v23 }
 0x173   : > { %v8836_v21 = vpop.permute.xlu0 %8835  ;;  %v8821_v30 = vpop.permute.xlu1 %8820 }
 0x174   : > { %8478 = vmatprep.subr.msk.bf16.mxu0 %vm9586_vm2, %v8476_v19  ;;  %v8838_v25 = vunpack.i.h.bf16 %v8836_v21  ;;  %v8837_v26 = vunpack.i.l.bf16 %v8836_v21  ;;  %v8823_v41 = vunpack.i.h.bf16 %v8821_v30  ;;  %v8822_v42 = vunpack.i.l.bf16 %v8821_v30 }
 0x176   : > { %v8488_v33 = vpack.c.bf16 %v8838_v25, %v8837_v26  ;;  %v8470_v52 = vpack.c.bf16 %v8823_v41, %v8822_v42 }
 0x177   : > { %v8846_v34 = vpop.permute.xlu0 %8845  ;;  %v8831_v45 = vpop.permute.xlu1 %8830 }
 0x178   : > { %7964 = vmatmul.mubr.msk.f32.vlgmr.msra.gmra.mrb[10].mxu1 %vm495_vm1, %v9504_v32  ;;  %v8848_v37 = vunpack.i.h.bf16 %v8846_v34  ;;  %v8847_v38 = vunpack.i.l.bf16 %v8846_v34  ;;  %v8833_v53 = vunpack.i.h.bf16 %v8831_v45  ;;  %v8832_v57 = vunpack.i.l.bf16 %v8831_v45 }
 0x179   : > { %7985 = vmatmul.mubr.msk.f32.vlgmr.msra.gmra.mrb[8].mxu0 %vm495_vm1, %v9512_v36  ;;  %8457 = vmatpush3.bf16.xpose.msk.msra.mxu1 %vm9586_vm2, %v8452_v14 }
 0x17a   : > { %7970 = vmatprep.mubr.msk.f32.mxu1 %vm495_vm1, %v9520_v43  ;;  %8481 = vmatpush3.bf16.xpose.msk.msra.mxu0 %vm9586_vm2, %v8476_v19  ;;  %v9624_v48 = vpack.c.bf16 %v8848_v37, %v8847_v38  ;;  %v8482_v0 = vpack.c.bf16 %v8833_v53, %v8832_v57 }
 0x17b   : > { %7998 = vmatprep.mubr.msk.f32.mxu0 %vm495_vm1, %v9530_v47  ;;  %8489 = vmatprep.subr.bf16.mxu0 %v8488_v33  ;;  %v8841_v63 = vpop.permute.xlu1 %8840 }
 0x17c   : > { %8460 = vmatprep.subr.msk.bf16.mxu1 %vm9586_vm2, %v8458_v28  ;;  %v8843_v3 = vunpack.i.h.bf16 %v8841_v63  ;;  %v8842_v4 = vunpack.i.l.bf16 %v8841_v63 }
 0x17e   : > { %v8492_v6 = vpack.c.bf16 %v8843_v3, %v8842_v4 }
 0x17f   : > { %v9645_v1 = vpop.permute.xlu1 %8855 }
 0x180   : > { %7971 = vmatmul.mubr.msk.f32.vlgmr.msra.gmra.mrb[12].mxu1 %vm495_vm1, %v9518_v40 }
 0x181   : > { %7999 = vmatmul.mubr.msk.f32.vlgmr.msra.gmra.mrb[10].mxu0 %vm495_vm1, %v9524_v44  ;;  %8463 = vmatpush3.bf16.xpose.msk.msra.mxu1 %vm9586_vm2, %v8458_v28 }
 0x182   : > { %7977 = vmatprep.mubr.msk.f32.mxu1 %vm495_vm1, %v9542_v55  ;;  %8491 = vmatpush3.bf16.msra.mxu0 %v8488_v33 }
 0x183   : > { %8472 = vmatprep.subr.msk.bf16.mxu1 %vm9586_vm2, %v8470_v52  ;;  %8497 = vmatprep.subr.bf16.mxu0 %v9624_v48  ;;  %v8866_v5 = vpop.permute.xlu1 %8865 }
 0x184   : > { %v8868_v7 = vunpack.i.h.bf16 %v8866_v5  ;;  %v8867_v8 = vunpack.i.l.bf16 %v8866_v5 }
 0x186   : > { %v9653_v9 = vpack.c.bf16 %v8868_v7, %v8867_v8 }
 0x188   : > { %7978 = vmatmul.mubr.msk.f32.vlgmr.msra.gmra.mrb[14].mxu1 %vm495_vm1, %v9538_v51 }
 0x189   : > { %8475 = vmatpush3.bf16.xpose.msk.msra.mxu1 %vm9586_vm2, %v8470_v52  ;;  %7991 = vmatprep.mubr.msk.f32.mxu1 %vm495_vm1, %v9540_v54 }
 0x18a   : > { %8484 = vmatprep.subr.msk.bf16.mxu1 %vm9586_vm2, %v8482_v0 }
 0x190   : > { %7992 = vmatmul.mubr.msk.f32.vlgmr.msra.gmra.mrb[16].mxu1 %vm495_vm1, %v9536_v50 }
 0x191   : > { %8487 = vmatpush3.bf16.xpose.msk.msra.mxu1 %vm9586_vm2, %v8482_v0  ;;  %8005 = vmatprep.mubr.msk.f32.mxu1 %vm495_vm1, %v9562_v60 }
 0x192   : > { %8493 = vmatprep.subr.bf16.mxu1 %v8492_v6 }
 0x198   : > { %8006 = vmatmul.mubr.msk.f32.vlgmr.msra.gmra.mrb[18].mxu1 %vm495_vm1, %v9560_v59 }
 0x199   : > { %8495 = vmatpush3.bf16.msra.mxu1 %v8492_v6 }
 0x19a   : > { %8501 = vmatprep.subr.bf16.mxu1 %v9653_v9 }
 0x243   : > { %v7958_v11 = vpop.f32.mrb[8].mxu1 }
 0x244   : > { %v9661_v12 = vadd.f32 %v7958_v11, %v266_v10  ;;  %v570_v13 = vpop.f32.mrb[9].mxu1 }
 0x245   : > { %v9674_v23 = vadd.f32 %v570_v13, %v265_v16 }
 0x246   : > { %v1206_v14 = vsel %vm1202_vm3, %v9661_v12, -inf }
 0x247   : > { %1207 = vmax.xlane.f32.xlu1 %v1206_v14  ;;  %v1203_v30 = vsel %vm1202_vm3, %v9674_v23, -inf }
 0x24b   : > { %v7965_v15 = vpop.f32.mrb[10].mxu1 }
 0x24c   : > { %v9668_v17 = vadd.f32 %v7965_v15, %v266_v10  ;;  %v7986_v18 = vpop.f32.mrb[8].mxu0  ;;  %v659_v19 = vpop.f32.mrb[11].mxu1 }
 0x24d   : > { %v9670_v20 = vadd.f32 %v7986_v18, %v266_v10  ;;  %v926_v21 = vpop.f32.mrb[9].mxu0  ;;  %v9690_v52 = vadd.f32 %v659_v19, %v265_v16 }
 0x24e   : > { %v1212_v22 = vsel %vm1202_vm3, %v9668_v17, -inf  ;;  %v9678_v26 = vadd.f32 %v926_v21, %v265_v16 }
 0x24f   : > { %v1230_v25 = vsel %vm1202_vm3, %v9670_v20, -inf  ;;  %1213 = vmax.xlane.f32.xlu1 %v1212_v22  ;;  %v1209_v6 = vsel %vm1202_vm3, %v9690_v52, -inf }
 0x250   : > { %1231 = vmax.xlane.f32.xlu0 %v1230_v25  ;;  %v1227_v42 = vsel %vm1202_vm3, %v9678_v26, -inf }
 0x253   : > { %v7972_v28 = vpop.f32.mrb[12].mxu1 }
 0x254   : > { %v8000_v33 = vpop.f32.mrb[10].mxu0  ;;  %1204 = vmax.xlane.f32.xlu0 %v1203_v30  ;;  %v748_v34 = vpop.f32.mrb[13].mxu1  ;;  %v9700_v5 = vadd.f32 %v7972_v28, %v266_v10 }
 0x255   : > { %v1104_v37 = vpop.f32.mrb[11].mxu0  ;;  %v9684_v41 = vadd.f32 %v8000_v33, %v266_v10  ;;  %v9706_v8 = vadd.f32 %v748_v34, %v265_v16 }
 0x256   : > { %v9682_v38 = vadd.f32 %v1104_v37, %v265_v16  ;;  %v1218_v13 = vsel %vm1202_vm3, %v9700_v5, -inf }
 0x257   : > { %v1242_v57 = vsel %vm1202_vm3, %v9684_v41, -inf  ;;  %v1215_v19 = vsel %vm1202_vm3, %v9706_v8, -inf }
 0x258   : > { %1228 = vmax.xlane.f32.xlu0 %v1227_v42  ;;  %v1239_v45 = vsel %vm1202_vm3, %v9682_v38, -inf  ;;  %v9734_v42 = vpop.permute.xlu0 %8850 }
 0x259   : > { %1240 = vmax.xlane.f32.xlu1 %v1239_v45 }
 0x25b   : > { %v7979_v53 = vpop.f32.mrb[14].mxu1 }
 0x25c   : > { %v9694_v63 = vadd.f32 %v7979_v53, %v266_v10  ;;  %1243 = vmax.xlane.f32.xlu0 %v1242_v57  ;;  %v837_v0 = vpop.f32.mrb[15].mxu1  ;;  %v9737_v57 = vpop.permute.xlu0 %8860 }
 0x25d   : > { %v9696_v3 = vadd.f32 %v837_v0, %v265_v16 }
 0x25e   : > { %v1224_v4 = vsel %vm1202_vm3, %v9694_v63, -inf }
 0x25f   : > { %1225 = vmax.xlane.f32.xlu1 %v1224_v4  ;;  %v1221_v7 = vsel %vm1202_vm3, %v9696_v3, -inf }
 0x260   : > { %1210 = vmax.xlane.f32.xlu0 %v1209_v6 }
 0x263   : > { %v7993_v11 = vpop.f32.mrb[16].mxu1  ;;  %1222 = vmax.xlane.f32.xlu1 %v1221_v7 }
 0x264   : > { %1219 = vmax.xlane.f32.xlu0 %v1218_v13  ;;  %v1015_v14 = vpop.f32.mrb[17].mxu1  ;;  %v9712_v18 = vadd.f32 %v7993_v11, %v266_v10 }
 0x265   : > { %v9710_v15 = vadd.f32 %v1015_v14, %v265_v16 }
 0x266   : > { %v1236_v25 = vsel %vm1202_vm3, %v9712_v18, -inf }
 0x267   : > { %v1233_v21 = vsel %vm1202_vm3, %v9710_v15, -inf }
 0x268   : > { %1216 = vmax.xlane.f32.xlu0 %v1215_v19  ;;  %1234 = vmax.xlane.f32.xlu1 %v1233_v21 }
 0x26b   : > { %v8007_v22 = vpop.f32.mrb[18].mxu1 }
 0x26c   : > { %v9720_v28 = vadd.f32 %v8007_v22, %v266_v10  ;;  %1237 = vmax.xlane.f32.xlu0 %v1236_v25  ;;  %v1193_v30 = vpop.f32.mrb[19].mxu1  ;;  %v9732_v10 = vpop.permute.xlu1 %8870 }
 0x26d   : > { %v9722_v33 = vadd.f32 %v1193_v30, %v265_v16 }
 0x26e   : > { %v1248_v34 = vsel %vm1202_vm3, %v9720_v28, -inf }
 0x26f   : > { %v1245_v37 = vsel %vm1202_vm3, %v9722_v33, -inf }
 0x270   : > { %1249 = vmax.xlane.f32.xlu0 %v1248_v34 }
 0x279   : > { %8880 = vrot.lane.b32.xlu1 %v9516_v39, %s9380_s20 }
 0x286   : > { %8875 = vrot.lane.b32.xlu0 %v9502_v31, %s9380_s20 }
 0x29d   : > { %1246 = vmax.xlane.f32.xlu1 %v1245_v37 }
 0x2d4   : > { %v1208_v16 = vpop.xlane.xlu1 %1207 }
 0x2d5   : > { %v1252_v45 = vsub.f32 %v9661_v12, %v1208_v16 }
 0x2d7   : > { %v1269_v53 = vmul.f32 1.442695, %v1252_v45 }
 0x2d9   : > { %9114 = vpow2.f32 %v1269_v53 }
 0x2dc   : > { %v1214_v4 = vpop.xlane.xlu1 %1213 }
 0x2dd   : > { %v1232_v0 = vpop.xlane.xlu0 %1231  ;;  %v1254_v11 = vsub.f32 %v9668_v17, %v1214_v4 }
 0x2de   : > { %v1260_v6 = vsub.f32 %v9670_v20, %v1232_v0 }
 0x2df   : > { %v1273_v21 = vmul.f32 1.442695, %v1254_v11 }
 0x2e0   : > { %v1285_v7 = vmul.f32 1.442695, %v1260_v6 }
 0x2e1   : > { %v1205_v13 = vpop.xlane.xlu0 %1204 }
 0x2e2   : > { %9116 = vpow2.f32 %v1285_v7  ;;  %v1251_v14 = vsub.f32 %v9674_v23, %v1205_v13 }
 0x2e3   : > { %v9742_v19 = vpop.eup %9114 }
 0x2e4   : > { %v1267_v22 = vmul.f32 1.442695, %v1251_v14  ;;  %v1302_v12 = vsel %vm1202_vm3, %v9742_v19, 0.0 }
 0x2e5   : > { %v1229_v25 = vpop.xlane.xlu0 %1228  ;;  %1303 = vadd.xlane.f32.xlu0 %v1302_v12 }
 0x2e6   : > { %9118 = vpow2.f32 %v1267_v22  ;;  %v1259_v30 = vsub.f32 %v9678_v26, %v1229_v25  ;;  %v1241_v34 = vpop.xlane.xlu1 %1240 }
 0x2e7   : > { %9120 = vpow2.f32 %v1273_v21  ;;  %v1263_v16 = vsub.f32 %v9682_v38, %v1241_v34 }
 0x2e8   : > { %v1283_v20 = vmul.f32 1.442695, %v1259_v30 }
 0x2e9   : > { %v1244_v17 = vpop.xlane.xlu0 %1243  ;;  %v1291_v6 = vmul.f32 1.442695, %v1263_v16 }
 0x2ea   : > { %9122 = vpow2.f32 %v1283_v20  ;;  %v1264_v37 = vsub.f32 %v9684_v41, %v1244_v17 }
 0x2ec   : > { %v9748_v23 = vpop.eup %9116  ;;  %v1293_v45 = vmul.f32 1.442695, %v1264_v37 }
 0x2ed   : > { %v1211_v53 = vpop.xlane.xlu0 %1210  ;;  %v1326_v0 = vsel %vm1202_vm3, %v9748_v23, 0.0 }
 0x2ee   : > { %9124 = vpow2.f32 %v1293_v45  ;;  %v1253_v4 = vsub.f32 %v9690_v52, %v1211_v53  ;;  %1327 = vadd.xlane.f32.xlu0 %v1326_v0 }
 0x2f0   : > { %v9754_v26 = vpop.eup %9118  ;;  %v1271_v7 = vmul.f32 1.442695, %v1253_v4  ;;  %v1226_v4 = vpop.xlane.xlu1 %1225 }
 0x2f1   : > { %v1220_v11 = vpop.xlane.xlu0 %1219  ;;  %v1299_v41 = vsel %vm1202_vm3, %v9754_v26, 0.0  ;;  %v9758_v13 = vpop.eup %9120 }
 0x2f2   : > { %9126 = vpow2.f32 %v1271_v7  ;;  %v1256_v38 = vsub.f32 %v9700_v5, %v1220_v11  ;;  %1300 = vadd.xlane.f32.xlu1 %v1299_v41  ;;  %v1308_v22 = vsel %vm1202_vm3, %v9758_v13, 0.0 }
 0x2f3   : > { %9128 = vpow2.f32 %v1291_v6  ;;  %v1258_v6 = vsub.f32 %v9694_v63, %v1226_v4 }
 0x2f4   : > { %v9761_v14 = vpop.eup %9122  ;;  %v1277_v21 = vmul.f32 1.442695, %v1256_v38  ;;  %v1223_v7 = vpop.xlane.xlu1 %1222 }
 0x2f5   : > { %v1217_v52 = vpop.xlane.xlu0 %1216  ;;  %v1323_v12 = vsel %vm1202_vm3, %v9761_v14, 0.0  ;;  %v1257_v41 = vsub.f32 %v9696_v3, %v1223_v7  ;;  %v1281_v38 = vmul.f32 1.442695, %v1258_v6 }
 0x2f6   : > { %9130 = vpow2.f32 %v1277_v21  ;;  %v1255_v25 = vsub.f32 %v9706_v8, %v1217_v52  ;;  %1309 = vadd.xlane.f32.xlu1 %v1308_v22  ;;  %1324 = vadd.xlane.f32.xlu0 %v1323_v12 }
 0x2f7   : > { %v1279_v52 = vmul.f32 1.442695, %v1257_v41 }
 0x2f8   : > { %v9768_v30 = vpop.eup %9124  ;;  %v1275_v5 = vmul.f32 1.442695, %v1255_v25 }
 0x2f9   : > { %v1338_v20 = vsel %vm1202_vm3, %v9768_v30, 0.0  ;;  %v1238_v11 = vpop.xlane.xlu0 %1237 }
 0x2fa   : > { %9132 = vpow2.f32 %v1275_v5  ;;  %1339 = vadd.xlane.f32.xlu0 %v1338_v20  ;;  %v1262_v21 = vsub.f32 %v9712_v18, %v1238_v11  ;;  %v1235_v20 = vpop.xlane.xlu1 %1234 }
 0x2fb   : > { %9134 = vpow2.f32 %v1281_v38 }
 0x2fc   : > { %v9772_v34 = vpop.eup %9126  ;;  %v1289_v22 = vmul.f32 1.442695, %v1262_v21  ;;  %9136 = vpow2.f32 %v1279_v52 }
 0x2fd   : > { %v1305_v17 = vsel %vm1202_vm3, %v9772_v34, 0.0  ;;  %v9776_v37 = vpop.eup %9128 }
 0x2fe   : > { %1306 = vadd.xlane.f32.xlu1 %v1305_v17  ;;  %v1335_v8 = vsel %vm1202_vm3, %v9776_v37, 0.0  ;;  %9138 = vpow2.f32 %v1289_v22  ;;  %v1261_v17 = vsub.f32 %v9710_v15, %v1235_v20 }
 0x300   : > { %v9778_v16 = vpop.eup %9130 }
 0x301   : > { %v1314_v45 = vsel %vm1202_vm3, %v9778_v16, 0.0 }
 0x302   : > { %1336 = vadd.xlane.f32.xlu1 %v1335_v8  ;;  %1315 = vadd.xlane.f32.xlu0 %v1314_v45  ;;  %v9824_v8 = vpop.permute.xlu1 %8880  ;;  %v1250_v45 = vpop.xlane.xlu0 %1249 }
 0x303   : > { %v1266_v4 = vsub.f32 %v9720_v28, %v1250_v45 }
 0x304   : > { %v9784_v53 = vpop.eup %9132 }
 0x305   : > { %v1311_v0 = vsel %vm1202_vm3, %v9784_v53, 0.0  ;;  %v9795_v12 = vpop.eup %9134  ;;  %v1297_v7 = vmul.f32 1.442695, %v1266_v4  ;;  %v8853_v4 = vunpack.i.h.bf16 %v9734_v42 }
 0x306   : > { %1312 = vadd.xlane.f32.xlu0 %v1311_v0  ;;  %v9797_v25 = vpop.eup %9136  ;;  %v1320_v5 = vsel %vm1202_vm3, %v9795_v12, 0.0  ;;  %v1287_v0 = vmul.f32 1.442695, %v1261_v17 }
 0x307   : > { %v1317_v3 = vsel %vm1202_vm3, %v9797_v25, 0.0 }
 0x308   : > { %v9801_v63 = vpop.eup %9138  ;;  %9140 = vpow2.f32 %v1287_v0 }
 0x309   : > { %v1332_v18 = vsel %vm1202_vm3, %v9801_v63, 0.0  ;;  %9142 = vpow2.f32 %v1297_v7 }
 0x312   : > { %v9836_v41 = vpop.eup %9140 }
 0x313   : > { %2075 = vrot.lane.b32.xlu1 %v9494_v27, %s9381_s22  ;;  %v1329_v28 = vsel %vm1202_vm3, %v9836_v41, 0.0  ;;  %v9842_v38 = vpop.eup %9142 }
 0x314   : > { %v1344_v21 = vsel %vm1202_vm3, %v9842_v38, 0.0 }
 0x31c   : > { %8885 = vrot.lane.b32.xlu0 %v9534_v49, %s9380_s20 }
 0x32a   : > { %v1247_v6 = vpop.xlane.xlu1 %1246 }
 0x32b   : > { %v1265_v11 = vsub.f32 %v9722_v33, %v1247_v6  ;;  %v9844_v33 = vpop.permute.xlu0 %8875  ;;  %v8852_v6 = vunpack.i.l.bf16 %v9734_v42 }
 0x32d   : > { %v1295_v15 = vmul.f32 1.442695, %v1265_v11 }
 0x32f   : > { %9144 = vpow2.f32 %v1295_v15 }
 0x337   : > { %1321 = vadd.xlane.f32.xlu1 %v1320_v5 }
 0x339   : > { %v9850_v52 = vpop.eup %9144 }
 0x33b   : > { %1318 = vadd.xlane.f32.xlu1 %v1317_v3  ;;  %1333 = vadd.xlane.f32.xlu0 %v1332_v18  ;;  %v1341_v3 = vsel %vm1202_vm3, %v9850_v52, 0.0 }
 0x34c   : > { %8890 = vrot.lane.b32.xlu1 %v9554_v58, %s9380_s20 }
 0x350   : > { %2168 = vrot.lane.b32.xlu1 %v9504_v32, %s9381_s22 }
 0x351   : > { %2077 = vrot.lane.b32.xlu0 %v9492_v24, %s9381_s22 }
 0x354   : > { %2257 = vrot.lane.b32.xlu1 %v9520_v43, %s9381_s22 }
 0x355   : > { %2166 = vrot.lane.b32.xlu0 %v9508_v35, %s9381_s22 }
 0x359   : > { %8895 = vrot.lane.b32.xlu0 %v9528_v46, %s9380_s20 }
 0x35d   : > { %2259 = vrot.lane.b32.xlu0 %v9518_v40, %s9381_s22 }
 0x361   : > { %2348 = vrot.lane.b32.xlu0 %v9542_v55, %s9381_s22 }
 0x365   : > { %2439 = vrot.lane.b32.xlu0 %v9496_v29, %s9381_s22 }
 0x369   : > { %2441 = vrot.lane.b32.xlu0 %v9512_v36, %s9381_s22 }
 0x36d   : > { %8910 = vrot.lane.b32.xlu0 %v9573_v62, %s9380_s20 }
 0x371   : > { %2621 = vrot.lane.b32.xlu0 %v9530_v47, %s9381_s22 }
 0x372   : > { %v1304_v22 = vpop.xlane.xlu0 %1303 }
 0x373   : > { %9146 = vrcp.f32 %v1304_v22 }
 0x375   : > { %2712 = vrot.lane.b32.xlu0 %v9562_v60, %s9381_s22 }
 0x378   : > { %1330 = vadd.xlane.f32.xlu1 %v1329_v28 }
 0x379   : > { %8915 = vrot.lane.b32.xlu0 %v9502_v31, %s9382_s23 }
 0x37b   : > { %v1328_v18 = vpop.xlane.xlu0 %1327 }
 0x37c   : > { %1345 = vadd.xlane.f32.xlu1 %v1344_v21  ;;  %v8504_v21 = vpack.c.bf16 %v8853_v4, %v8852_v6 }
 0x37d   : > { %8925 = vrot.lane.b32.xlu0 %v9534_v49, %s9382_s23  ;;  %v9147_v45 = vpop.eup %9146 }
 0x37e   : > { %v1364_v28 = vmul.f32 %v9147_v45, %v9742_v19 }
 0x37f   : > { %v1301_v5 = vpop.xlane.xlu1 %1300 }
 0x380   : > { %9148 = vrcp.f32 %v1301_v5  ;;  %1342 = vadd.xlane.f32.xlu1 %v1341_v3  ;;  %v8858_v3 = vunpack.i.h.bf16 %v9645_v1 }
 0x381   : > { %8935 = vrot.lane.b32.xlu0 %v9528_v46, %s9382_s23 }
 0x383   : > { %v1325_v20 = vpop.xlane.xlu0 %1324  ;;  %v1310_v17 = vpop.xlane.xlu1 %1309 }
 0x384   : > { %9150 = vrcp.f32 %v1310_v17  ;;  %v8857_v17 = vunpack.i.l.bf16 %v9645_v1 }
 0x387   : > { %v1340_v7 = vpop.xlane.xlu0 %1339 }
 0x38a   : > { %v9149_v0 = vpop.eup %9148 }
 0x38b   : > { %v1307_v11 = vpop.xlane.xlu1 %1306  ;;  %v1363_v15 = vmul.f32 %v9149_v0, %v9754_v26 }
 0x38c   : > { %9152 = vrcp.f32 %v1307_v11 }
 0x38d   : > { %8012 = vmatprep.mubr.msk.f32.mxu0 %vm1202_vm3, %v1363_v15  ;;  %9154 = vrcp.f32 %v1325_v20  ;;  %v9877_v20 = vpack.c.bf16 %v8858_v3, %v8857_v17  ;;  %v8878_v15 = vunpack.i.h.bf16 %v9844_v33 }
 0x38e   : > { %8013 = vmatmul.mubr.msk.f32.vlgmr.msra.gmra.mrb[12].mxu0 %vm1202_vm3, %v1364_v28  ;;  %v9151_v26 = vpop.eup %9150  ;;  %v8877_v28 = vunpack.i.l.bf16 %v9844_v33 }
 0x38f   : > { %8499 = vmatpush3.bf16.msra.mxu0 %v9624_v48  ;;  %v1316_v22 = vpop.xlane.xlu0 %1315  ;;  %v1337_v5 = vpop.xlane.xlu1 %1336  ;;  %v1366_v45 = vmul.f32 %v9151_v26, %v9758_v13 }
 0x390   : > { %8505 = vmatprep.subr.bf16.mxu0 %v8504_v21  ;;  %9156 = vrcp.f32 %v1316_v22  ;;  %v8520_v22 = vpack.c.bf16 %v8878_v15, %v8877_v28 }
 0x391   : > { %8900 = vrot.lane.b32.xlu1 %v9566_v61, %s9380_s20 }
 0x393   : > { %v1313_v42 = vpop.xlane.xlu0 %1312 }
 0x394   : > { %9158 = vrcp.f32 %v1313_v42 }
 0x395   : > { %2350 = vrot.lane.b32.xlu1 %v9538_v51, %s9381_s22  ;;  %9160 = vrcp.f32 %v1328_v18  ;;  %v8862_v18 = vunpack.i.l.bf16 %v9737_v57 }
 0x396   : > { %v9153_v19 = vpop.eup %9152  ;;  %9162 = vrcp.f32 %v1337_v5 }
 0x397   : > { %v1365_v48 = vmul.f32 %v9153_v19, %v9772_v34  ;;  %9164 = vrcp.f32 %v1340_v7  ;;  %v9155_v0 = vpop.eup %9154  ;;  %v8863_v34 = vunpack.i.h.bf16 %v9737_v57  ;;  %v8886_v33 = vpop.permute.xlu0 %8885 }
 0x398   : > { %v8888_v42 = vunpack.i.h.bf16 %v8886_v33 }
 0x399   : > { %8019 = vmatprep.mubr.msk.f32.mxu1 %vm1202_vm3, %v1365_v48  ;;  %8905 = vrot.lane.b32.xlu1 %v9550_v56, %s9380_s20  ;;  %v8512_v57 = vpack.c.bf16 %v8863_v34, %v8862_v18  ;;  %v8872_v34 = vunpack.i.l.bf16 %v9732_v10  ;;  %s9389_s20 = smov 8  }
 0x39a   : > { %8020 = vmatmul.mubr.msk.f32.vlgmr.msra.gmra.mrb[20].mxu1 %vm1202_vm3, %v1366_v45  ;;  %v9157_v1 = vpop.eup %9156 }
 0x39b   : > { %8503 = vmatpush3.bf16.msra.mxu1 %v9653_v9  ;;  %v1368_v6 = vmul.f32 %v9157_v1, %v9778_v16  ;;  %v1371_v9 = vmul.f32 %v9155_v0, %v9761_v14 }
 0x39c   : > { %8509 = vmatprep.subr.bf16.mxu1 %v9877_v20 }
 0x39d   : > { %2530 = vrot.lane.b32.xlu1 %v9540_v54, %s9381_s22 }
 0x39e   : > { %v9159_v13 = vpop.eup %9158 }
 0x39f   : > { %v1367_v4 = vmul.f32 %v9159_v13, %v9784_v53  ;;  %v9161_v11 = vpop.eup %9160  ;;  %v8873_v13 = vunpack.i.h.bf16 %v9732_v10 }
 0x3a0   : > { %v9163_v7 = vpop.eup %9162  ;;  %v1372_v16 = vmul.f32 %v9161_v11, %v9748_v23  ;;  %v2076_v23 = vpop.permute.xlu1 %2075 }
 0x3a1   : > { %2532 = vrot.lane.b32.xlu1 %v9536_v50, %s9381_s22  ;;  %8026 = vmatprep.mubr.msk.f32.mxu0 %vm1202_vm3, %v1367_v4  ;;  %v9165_v53 = vpop.eup %9164  ;;  %v1375_v14 = vmul.f32 %v9163_v7, %v9776_v37  ;;  %v8887_v37 = vunpack.i.l.bf16 %v8886_v33  ;;  %v8516_v28 = vpack.c.bf16 %v8873_v13, %v8872_v34 }
 0x3a2   : > { %8027 = vmatmul.mubr.msk.f32.vlgmr.msra.gmra.mrb[14].mxu0 %vm1202_vm3, %v1368_v6 }
 0x3a3   : > { %8507 = vmatpush3.bf16.msra.mxu0 %v8504_v21  ;;  %8040 = vmatprep.mubr.msk.f32.mxu0 %vm1202_vm3, %v1371_v9  ;;  %v1376_v21 = vmul.f32 %v9165_v53, %v9768_v30  ;;  %v8532_v26 = vpack.c.bf16 %v8888_v42, %v8887_v37  ;;  %v8882_v42 = vunpack.i.l.bf16 %v9824_v8 }
 0x3a4   : > { %8513 = vmatprep.subr.bf16.mxu0 %v8512_v57 }
 0x3a5   : > { %2623 = vrot.lane.b32.xlu1 %v9524_v44, %s9381_s22 }
 0x3a6   : > { %8041 = vmatmul.mubr.msk.f32.vlgmr.msra.gmra.mrb[16].mxu0 %vm1202_vm3, %v1372_v16 }
 0x3a7   : > { %8515 = vmatpush3.bf16.msra.mxu0 %v8512_v57  ;;  %8054 = vmatprep.mubr.msk.f32.mxu0 %vm1202_vm3, %v1375_v14 }
 0x3a8   : > { %8522 = vmatprep.subr.msk.bf16.mxu0 %vm9586_vm2, %v8520_v22 }
 0x3a9   : > { %2714 = vrot.lane.b32.xlu1 %v9560_v59, %s9381_s22  ;;  %s9390_s22 = smov 16  }
 0x3aa   : > { %8055 = vmatmul.mubr.msk.f32.vlgmr.msra.gmra.mrb[18].mxu0 %vm1202_vm3, %v1376_v21 }
 0x3ab   : > { %8068 = vmatprep.mubr.msk.f32.mxu0 %vm495_vm1, %v2076_v23  ;;  %v8883_v23 = vunpack.i.h.bf16 %v9824_v8 }
 0x3ad   : > { %8920 = vrot.lane.b32.xlu1 %v9516_v39, %s9382_s23 }
 0x3b0   : > { %8525 = vmatpush3.bf16.xpose.msk.msra.mxu0 %vm9586_vm2, %v8520_v22 }
 0x3b1   : > { %8534 = vmatprep.subr.msk.bf16.mxu0 %vm9586_vm2, %v8532_v26  ;;  %8930 = vrot.lane.b32.xlu1 %v9554_v58, %s9382_s23 }
 0x3b5   : > { %8940 = vrot.lane.b32.xlu1 %v9566_v61, %s9382_s23 }
 0x3c4   : > { %v1322_v30 = vpop.xlane.xlu1 %1321 }
 0x3c5   : > { %9166 = vrcp.f32 %v1322_v30 }
 0x3c8   : > { %v1319_v5 = vpop.xlane.xlu1 %1318  ;;  %v1334_v19 = vpop.xlane.xlu0 %1333 }
 0x3c9   : > { %9168 = vrcp.f32 %v1319_v5 }
 0x3ca   : > { %9170 = vrcp.f32 %v1334_v19  ;;  %v8526_v19 = vpack.c.bf16 %v8883_v23, %v8882_v42 }
 0x3cc   : > { %v9918_v3 = vpop.permute.xlu1 %8890  ;;  %v2078_v17 = vpop.permute.xlu0 %2077 }
 0x3cd   : > { %8069 = vmatmul.mubr.msk.f32.vlgmr.msra.gmra.mrb[20].mxu0 %vm495_vm1, %v2078_v17  ;;  %v8893_v13 = vunpack.i.h.bf16 %v9918_v3  ;;  %v8892_v34 = vunpack.i.l.bf16 %v9918_v3 }
 0x3ce   : > { %8537 = vmatpush3.bf16.xpose.msk.msra.mxu0 %vm9586_vm2, %v8532_v26 }
 0x3cf   : > { %v9167_v0 = vpop.eup %9166 }
 0x3d0   : > { %v9923_v48 = vpop.permute.xlu1 %2168  ;;  %v9925_v45 = vpop.permute.xlu0 %2166  ;;  %v1370_v7 = vmul.f32 %v9167_v0, %v9795_v12 }
 0x3d3   : > { %v9169_v1 = vpop.eup %9168 }
 0x3d4   : > { %v2258_v18 = vpop.permute.xlu1 %2257  ;;  %v8896_v4 = vpop.permute.xlu0 %8895  ;;  %v1369_v6 = vmul.f32 %v9169_v1, %v9797_v25 }
 0x3d5   : > { %v8898_v11 = vunpack.i.h.bf16 %v8896_v4  ;;  %v8897_v9 = vunpack.i.l.bf16 %v8896_v4  ;;  %8082 = vmatprep.mubr.msk.f32.mxu0 %vm495_vm1, %v2258_v18  ;;  %v9171_v33 = vpop.eup %9170 }
 0x3d6   : > { %8033 = vmatprep.mubr.msk.f32.mxu1 %vm1202_vm3, %v1369_v6  ;;  %v1374_v5 = vmul.f32 %v9171_v33, %v9801_v63 }
 0x3d7   : > { %v8544_v15 = vpack.c.bf16 %v8898_v11, %v8897_v9  ;;  %8034 = vmatmul.mubr.msk.f32.vlgmr.msra.gmra.mrb[22].mxu1 %vm1202_vm3, %v1370_v7 }
 0x3d8   : > { %8511 = vmatpush3.bf16.msra.mxu1 %v9877_v20  ;;  %v2260_v57 = vpop.permute.xlu0 %2259 }
 0x3d9   : > { %8517 = vmatprep.subr.bf16.mxu1 %v8516_v28  ;;  %8083 = vmatmul.mubr.msk.f32.vlgmr.msra.gmra.mrb[22].mxu0 %vm495_vm1, %v2260_v57 }
 0x3da   : > { %8546 = vmatprep.subr.msk.bf16.mxu0 %vm9586_vm2, %v8544_v15 }
 0x3db   : > { %8549 = vmatpush3.bf16.xpose.msk.msra.mxu0 %vm9586_vm2, %v8544_v15  ;;  %v8538_v15 = vpack.c.bf16 %v8893_v13, %v8892_v34 }
 0x3dc   : > { %v9940_v10 = vpop.permute.xlu0 %2348 }
 0x3e0   : > { %v2440_v12 = vpop.permute.xlu0 %2439 }
 0x3e1   : > { %8096 = vmatprep.mubr.msk.f32.mxu0 %vm495_vm1, %v2440_v12 }
 0x3e4   : > { %v2442_v25 = vpop.permute.xlu0 %2441 }
 0x3e5   : > { %8097 = vmatmul.mubr.msk.f32.vlgmr.msra.gmra.mrb[24].mxu0 %vm495_vm1, %v2442_v25 }
 0x3e8   : > { %v9944_v16 = vpop.permute.xlu0 %8910 }
 0x3e9   : > { %v8912_v33 = vunpack.i.l.bf16 %v9944_v16 }
 0x3ec   : > { %v2622_v20 = vpop.permute.xlu0 %2621 }
 0x3ed   : > { %8110 = vmatprep.mubr.msk.f32.mxu0 %vm495_vm1, %v2622_v20 }
 0x3f0   : > { %v9949_v37 = vpop.permute.xlu0 %2712 }
 0x3f4   : > { %v8916_v0 = vpop.permute.xlu0 %8915 }
 0x3f5   : > { %v8917_v4 = vunpack.i.l.bf16 %v8916_v0 }
 0x405   : > { %v1331_v53 = vpop.xlane.xlu1 %1330 }
 0x406   : > { %9172 = vrcp.f32 %v1331_v53 }
 0x409   : > { %v1346_v14 = vpop.xlane.xlu1 %1345 }
 0x40a   : > { %9174 = vrcp.f32 %v1346_v14 }
 0x40d   : > { %v1343_v22 = vpop.xlane.xlu1 %1342 }
 0x40e   : > { %9176 = vrcp.f32 %v1343_v22  ;;  %v8913_v22 = vunpack.i.h.bf16 %v9944_v16 }
 0x410   : > { %v9173_v21 = vpop.eup %9172 }
 0x411   : > { %v8901_v26 = vpop.permute.xlu1 %8900  ;;  %v1373_v30 = vmul.f32 %v9173_v21, %v9836_v41  ;;  %v8918_v41 = vunpack.i.h.bf16 %v8916_v0  ;;  %v8562_v21 = vpack.c.bf16 %v8913_v22, %v8912_v33 }
 0x412   : > { %v8903_v3 = vunpack.i.h.bf16 %v8901_v26  ;;  %v8902_v57 = vunpack.i.l.bf16 %v8901_v26 }
 0x413   : > { %8047 = vmatprep.mubr.msk.f32.mxu1 %vm1202_vm3, %v1373_v30 }
 0x414   : > { %8048 = vmatmul.mubr.msk.f32.vlgmr.msra.gmra.mrb[24].mxu1 %vm1202_vm3, %v1374_v5  ;;  %v9175_v1 = vpop.eup %9174  ;;  %v8550_v20 = vpack.c.bf16 %v8903_v3, %v8902_v57 }
 0x415   : > { %8519 = vmatpush3.bf16.msra.mxu1 %v8516_v28  ;;  %v2351_v17 = vpop.permute.xlu1 %2350  ;;  %v1378_v9 = vmul.f32 %v9175_v1, %v9842_v38  ;;  %v8926_v38 = vpop.permute.xlu0 %8925 }
 0x416   : > { %8528 = vmatprep.subr.msk.bf16.mxu1 %vm9586_vm2, %v8526_v19  ;;  %v8928_v25 = vunpack.i.h.bf16 %v8926_v38 }
 0x418   : > { %v9177_v8 = vpop.eup %9176 }
 0x419   : > { %v8906_v18 = vpop.permute.xlu1 %8905  ;;  %v1377_v63 = vmul.f32 %v9177_v8, %v9850_v52  ;;  %v8568_v52 = vpack.c.bf16 %v8918_v41, %v8917_v4  ;;  %v10025_v4 = vld [vmem:[%s11311_s3 + $0x18] sm:$0xff] }
 0x41a   : > { %v8908_v6 = vunpack.i.h.bf16 %v8906_v18  ;;  %v8907_v11 = vunpack.i.l.bf16 %v8906_v18 }
 0x41b   : > { %8061 = vmatprep.mubr.msk.f32.mxu1 %vm1202_vm3, %v1377_v63 }
 0x41c   : > { %v8556_v7 = vpack.c.bf16 %v8908_v6, %v8907_v11  ;;  %8062 = vmatmul.mubr.msk.f32.vlgmr.msra.gmra.mrb[26].mxu1 %vm1202_vm3, %v1378_v9  ;;  %v10030_v6 = vld [vmem:[%s11311_s3 + $0x10] sm:$0xff] }
 0x41d   : > { %v2531_v28 = vpop.permute.xlu1 %2530  ;;  %8075 = vmatprep.mubr.msk.f32.mxu1 %vm495_vm1, %v9925_v45  ;;  %v8927_v45 = vunpack.i.l.bf16 %v8926_v38 }
 0x41e   : > { %8531 = vmatpush3.bf16.xpose.msk.msra.mxu1 %vm9586_vm2, %v8526_v19  ;;  %8558 = vmatprep.subr.msk.bf16.mxu0 %vm9586_vm2, %v8556_v7 }
 0x41f   : > { %8540 = vmatprep.subr.msk.bf16.mxu1 %vm9586_vm2, %v8538_v15  ;;  %8561 = vmatpush3.bf16.xpose.msk.msra.mxu0 %vm9586_vm2, %v8556_v7  ;;  %v9982_v14 = vpack.c.bf16 %v8928_v25, %v8927_v45 }
 0x420   : > { %8569 = vmatprep.subr.bf16.mxu0 %v8568_v52 }
 0x421   : > { %v2533_v12 = vpop.permute.xlu1 %2532 }
 0x425   : > { %8076 = vmatmul.mubr.msk.f32.vlgmr.msra.gmra.mrb[28].mxu1 %vm495_vm1, %v9923_v48  ;;  %v2624_v53 = vpop.permute.xlu1 %2623 }
 0x426   : > { %8543 = vmatpush3.bf16.xpose.msk.msra.mxu1 %vm9586_vm2, %v8538_v15  ;;  %8089 = vmatprep.mubr.msk.f32.mxu1 %vm495_vm1, %v9940_v10 }
 0x427   : > { %8552 = vmatprep.subr.msk.bf16.mxu1 %vm9586_vm2, %v8550_v20  ;;  %8111 = vmatmul.mubr.msk.f32.vlgmr.msra.gmra.mrb[26].mxu0 %vm495_vm1, %v2624_v53 }
 0x428   : > { %8571 = vmatpush3.bf16.msra.mxu0 %v8568_v52 }
 0x429   : > { %8577 = vmatprep.subr.bf16.mxu0 %v9982_v14  ;;  %v2715_v48 = vpop.permute.xlu1 %2714 }
 0x42d   : > { %8090 = vmatmul.mubr.msk.f32.vlgmr.msra.gmra.mrb[30].mxu1 %vm495_vm1, %v2351_v17  ;;  %v8921_v23 = vpop.permute.xlu1 %8920 }
 0x42e   : > { %8555 = vmatpush3.bf16.xpose.msk.msra.mxu1 %vm9586_vm2, %v8550_v20  ;;  %8103 = vmatprep.mubr.msk.f32.mxu1 %vm495_vm1, %v2531_v28  ;;  %v8923_v10 = vunpack.i.h.bf16 %v8921_v23  ;;  %v8922_v42 = vunpack.i.l.bf16 %v8921_v23 }
 0x42f   : > { %8564 = vmatprep.subr.msk.bf16.mxu1 %vm9586_vm2, %v8562_v21 }
 0x430   : > { %v8572_v16 = vpack.c.bf16 %v8923_v10, %v8922_v42 }
 0x431   : > { %v8931_v26 = vpop.permute.xlu1 %8930 }
 0x432   : > { %v8933_v30 = vunpack.i.h.bf16 %v8931_v26  ;;  %v8932_v5 = vunpack.i.l.bf16 %v8931_v26 }
 0x434   : > { %v9999_v19 = vpack.c.bf16 %v8933_v30, %v8932_v5 }
 0x435   : > { %8104 = vmatmul.mubr.msk.f32.vlgmr.msra.gmra.mrb[32].mxu1 %vm495_vm1, %v2533_v12 }
 0x436   : > { %8567 = vmatpush3.bf16.xpose.msk.msra.mxu1 %vm9586_vm2, %v8562_v21  ;;  %8117 = vmatprep.mubr.msk.f32.mxu1 %vm495_vm1, %v9949_v37 }
 0x437   : > { %8573 = vmatprep.subr.bf16.mxu1 %v8572_v16 }
 0x43d   : > { %8118 = vmatmul.mubr.msk.f32.vlgmr.msra.gmra.mrb[34].mxu1 %vm495_vm1, %v2715_v48 }
 0x43e   : > { %8575 = vmatpush3.bf16.msra.mxu1 %v8572_v16 }
 0x43f   : > { %8581 = vmatprep.subr.bf16.mxu1 %v9999_v19 }
 0x461   : > { %v10002_v17 = vpop.f32.mrb[12].mxu0 }
 0x462   : > { %11317 = vst [vmem:[#allocation2_spill] sm:$0xff] %v10002_v17  ;;  %v10004_v0 = vpop.f32.mrb[13].mxu0 }
 0x463   : > { %11318 = vst [vmem:[#allocation3_spill] sm:$0xff] %v10004_v0 }
 0x46d   : > { %v10006_v1 = vpop.f32.mrb[20].mxu1 }
 0x46e   : > { %11319 = vst [vmem:[#allocation4_spill] sm:$0xff] %v10006_v1  ;;  %v10008_v8 = vpop.f32.mrb[21].mxu1 }
 0x46f   : > { %11320 = vst [vmem:[#allocation5_spill] sm:$0xff] %v10008_v8 }
 0x475   : > { %v10010_v13 = vpop.f32.mrb[14].mxu0 }
 0x476   : > { %11321 = vst [vmem:[#allocation6_spill] sm:$0xff] %v10010_v13  ;;  %v10012_v37 = vpop.f32.mrb[15].mxu0 }
 0x477   : > { %11322 = vst [vmem:[#allocation7_spill] sm:$0xff] %v10012_v37 }
 0x479   : > { %v10014_v34 = vpop.f32.mrb[16].mxu0 }
 0x47a   : > { %11323 = vst [vmem:[#allocation8_spill] sm:$0xff] %v10014_v34  ;;  %v10016_v41 = vpop.f32.mrb[17].mxu0 }
 0x47b   : > { %11324 = vst [vmem:[#allocation9_spill] sm:$0xff] %v10016_v41 }
 0x47d   : > { %v10018_v18 = vpop.f32.mrb[18].mxu0 }
 0x47e   : > { %11325 = vst [vmem:[#allocation10_spill] sm:$0xff] %v10018_v18  ;;  %v10020_v63 = vpop.f32.mrb[19].mxu0 }
 0x47f   : > { %11326 = vst [vmem:[#allocation11_spill] sm:$0xff] %v10020_v63 }
 0x4a0   : > { %v8070_v11 = vpop.f32.mrb[20].mxu0 }
 0x4a1   : > { %v10033_v9 = vadd.f32 %v8070_v11, %v10025_v4  ;;  %v2157_v7 = vpop.f32.mrb[21].mxu0 }
 0x4a2   : > { %v10036_v15 = vadd.f32 %v2157_v7, %v10030_v6 }
 0x4a3   : > { %v2806_v28 = vsel %vm1202_vm3, %v10033_v9, -inf }
 0x4a4   : > { %2807 = vmax.xlane.f32.xlu1 %v2806_v28  ;;  %v2803_v52 = vsel %vm1202_vm3, %v10036_v15, -inf }
 0x4a5   : > { %2804 = vmax.xlane.f32.xlu0 %v2803_v52 }
 0x4aa   : > { %v10042_v38 = vpop.f32.mrb[22].mxu1 }
 0x4ab   : > { %11327 = vst [vmem:[#allocation12_spill] sm:$0xff] %v10042_v38  ;;  %v10044_v3 = vpop.f32.mrb[23].mxu1 }
 0x4ac   : > { %11328 = vst [vmem:[#allocation13_spill] sm:$0xff] %v10044_v3  ;;  %v8084_v57 = vpop.f32.mrb[22].mxu0 }
 0x4ad   : > { %v10047_v12 = vadd.f32 %v8084_v57, %v10025_v4  ;;  %v2339_v25 = vpop.f32.mrb[23].mxu0 }
 0x4ae   : > { %v10050_v45 = vadd.f32 %v2339_v25, %v10030_v6 }
 0x4af   : > { %v2818_v20 = vsel %vm1202_vm3, %v10047_v12, -inf }
 0x4b0   : > { %2819 = vmax.xlane.f32.xlu0 %v2818_v20  ;;  %v2815_v53 = vsel %vm1202_vm3, %v10050_v45, -inf }
 0x4b4   : > { %2816 = vmax.xlane.f32.xlu0 %v2815_v53 }
 0x4b8   : > { %v8098_v22 = vpop.f32.mrb[24].mxu0 }
 0x4b9   : > { %v2521_v33 = vpop.f32.mrb[25].mxu0  ;;  %v10073_v28 = vadd.f32 %v8098_v22, %v10025_v4 }
 0x4ba   : > { %v10078_v57 = vadd.f32 %v2521_v33, %v10030_v6 }
 0x4bb   : > { %v2830_v20 = vsel %vm1202_vm3, %v10073_v28, -inf }
 0x4bc   : > { %v2827_v33 = vsel %vm1202_vm3, %v10078_v57, -inf }
 0x4e7   : > { %v10056_v48 = vpop.f32.mrb[24].mxu1 }
 0x4e8   : > { %11329 = vst [vmem:[#allocation14_spill] sm:$0xff] %v10056_v48  ;;  %v10058_v21 = vpop.f32.mrb[25].mxu1 }
 0x4e9   : > { %11330 = vst [vmem:[#allocation15_spill] sm:$0xff] %v10058_v21 }
 0x4ef   : > { %v10060_v23 = vpop.f32.mrb[26].mxu1 }
 0x4f0   : > { %11331 = vst [vmem:[#allocation16_spill] sm:$0xff] %v10060_v23  ;;  %v10062_v10 = vpop.f32.mrb[27].mxu1 }
 0x4f1   : > { %11332 = vst [vmem:[#allocation17_spill] sm:$0xff] %v10062_v10 }
 0x4f8   : > { %v8077_v42 = vpop.f32.mrb[28].mxu1 }
 0x4f9   : > { %v10065_v16 = vadd.f32 %v8077_v42, %v10025_v4  ;;  %v2248_v26 = vpop.f32.mrb[29].mxu1 }
 0x4fa   : > { %v10068_v30 = vadd.f32 %v2248_v26, %v10030_v6  ;;  %v8112_v5 = vpop.f32.mrb[26].mxu0 }
 0x4fb   : > { %v2703_v11 = vpop.f32.mrb[27].mxu0  ;;  %v2812_v7 = vsel %vm1202_vm3, %v10065_v16, -inf }
 0x4fc   : > { %2813 = vmax.xlane.f32.xlu1 %v2812_v7  ;;  %v2809_v52 = vsel %vm1202_vm3, %v10068_v30, -inf  ;;  %v10091_v7 = vadd.f32 %v8112_v5, %v10025_v4 }
 0x4fd   : > { %2810 = vmax.xlane.f32.xlu0 %v2809_v52  ;;  %v10096_v52 = vadd.f32 %v2703_v11, %v10030_v6 }
 0x500   : > { %v8091_v25 = vpop.f32.mrb[30].mxu1 }
 0x501   : > { %v10083_v53 = vadd.f32 %v8091_v25, %v10025_v4  ;;  %v2430_v42 = vpop.f32.mrb[31].mxu1  ;;  %2831 = vmax.xlane.f32.xlu0 %v2830_v20 }
 0x502   : > { %v10086_v22 = vadd.f32 %v2430_v42, %v10030_v6  ;;  %v2842_v42 = vsel %vm1202_vm3, %v10091_v7, -inf }
 0x503   : > { %v2824_v26 = vsel %vm1202_vm3, %v10083_v53, -inf }
 0x504   : > { %2825 = vmax.xlane.f32.xlu1 %v2824_v26  ;;  %v2821_v25 = vsel %vm1202_vm3, %v10086_v22, -inf  ;;  %v2839_v26 = vsel %vm1202_vm3, %v10096_v52, -inf }
 0x505   : > { %2828 = vmax.xlane.f32.xlu0 %v2827_v33 }
 0x508   : > { %v8105_v20 = vpop.f32.mrb[32].mxu1  ;;  %2822 = vmax.xlane.f32.xlu1 %v2821_v25 }
 0x509   : > { %v10103_v23 = vadd.f32 %v8105_v20, %v10025_v4  ;;  %v2612_v5 = vpop.f32.mrb[33].mxu1  ;;  %2843 = vmax.xlane.f32.xlu0 %v2842_v42 }
 0x50a   : > { %v10114_v25 = vadd.f32 %v2612_v5, %v10030_v6  ;;  %v10133_v5 = vpop.permute.xlu1 %8940 }
 0x50b   : > { %v2836_v11 = vsel %vm1202_vm3, %v10103_v23, -inf }
 0x50c   : > { %2840 = vmax.xlane.f32.xlu1 %v2839_v26  ;;  %v2833_v42 = vsel %vm1202_vm3, %v10114_v25, -inf }
 0x50d   : > { %2837 = vmax.xlane.f32.xlu0 %v2836_v11 }
 0x510   : > { %v8119_v33 = vpop.f32.mrb[34].mxu1 }
 0x511   : > { %v2794_v10 = vpop.f32.mrb[35].mxu1  ;;  %v10117_v20 = vadd.f32 %v8119_v33, %v10025_v4  ;;  %v10129_v4 = vpop.permute.xlu0 %8935 }
 0x512   : > { %v10140_v63 = vadd.f32 %v2794_v10, %v10030_v6  ;;  %v8938_v3 = vunpack.i.h.bf16 %v10129_v4  ;;  %v8937_v37 = vunpack.i.l.bf16 %v10129_v4 }
 0x513   : > { %v2848_v26 = vsel %vm1202_vm3, %v10117_v20, -inf }
 0x51d   : > { %8950 = vrot.lane.b32.xlu1 %v9573_v62, %s9382_s23 }
 0x523   : > { %8945 = vrot.lane.b32.xlu0 %v9550_v56, %s9382_s23 }
 0x531   : > { %v2808_v33 = vpop.xlane.xlu1 %2807 }
 0x532   : > { %v2805_v11 = vpop.xlane.xlu0 %2804 }
 0x533   : > { %v2851_v17 = vsub.f32 %v10036_v15, %v2805_v11 }
 0x535   : > { %v2867_v34 = vmul.f32 1.442695, %v2851_v17 }
 0x541   : > { %2834 = vmax.xlane.f32.xlu1 %v2833_v42  ;;  %v2820_v42 = vpop.xlane.xlu0 %2819 }
 0x542   : > { %2849 = vmax.xlane.f32.xlu0 %v2848_v26  ;;  %v2852_v26 = vsub.f32 %v10033_v9, %v2808_v33  ;;  %v2856_v18 = vsub.f32 %v10047_v12, %v2820_v42  ;;  %v2845_v9 = vsel %vm1202_vm3, %v10140_v63, -inf }
 0x544   : > { %v2869_v0 = vmul.f32 1.442695, %v2852_v26  ;;  %v2877_v38 = vmul.f32 1.442695, %v2856_v18 }
 0x545   : > { %v2817_v48 = vpop.xlane.xlu0 %2816 }
 0x546   : > { %9178 = vpow2.f32 %v2869_v0  ;;  %v2855_v13 = vsub.f32 %v10050_v45, %v2817_v48 }
 0x547   : > { %9180 = vpow2.f32 %v2867_v34 }
 0x548   : > { %9182 = vpow2.f32 %v2877_v38  ;;  %v2875_v1 = vmul.f32 1.442695, %v2855_v13 }
 0x54a   : > { %9184 = vpow2.f32 %v2875_v1 }
 0x550   : > { %v10142_v21 = vpop.eup %9178 }
 0x551   : > { %v10146_v15 = vpop.eup %9180  ;;  %v2902_v17 = vsel %vm1202_vm3, %v10142_v21, 0.0 }
 0x552   : > { %8960 = vrot.lane.b32.xlu1 %v9516_v39, %s9383_s28  ;;  %v10150_v0 = vpop.eup %9182  ;;  %v2899_v13 = vsel %vm1202_vm3, %v10146_v15, 0.0 }
 0x553   : > { %v2914_v1 = vsel %vm1202_vm3, %v10150_v0, 0.0 }
 0x554   : > { %v10156_v34 = vpop.eup %9184 }
 0x555   : > { %v2911_v18 = vsel %vm1202_vm3, %v10156_v34, 0.0 }
 0x556   : > { %3675 = vrot.lane.b32.xlu1 %v9494_v27, %s9384_s30 }
 0x558   : > { %8955 = vrot.lane.b32.xlu0 %v9502_v31, %s9383_s28 }
 0x55c   : > { %8965 = vrot.lane.b32.xlu0 %v9534_v49, %s9383_s28 }
 0x57a   : > { %2846 = vmax.xlane.f32.xlu1 %v2845_v9 }
 0x57b   : > { %2903 = vadd.xlane.f32.xlu0 %v2902_v17 }
 0x57e   : > { %2900 = vadd.xlane.f32.xlu1 %v2899_v13 }
 0x57f   : > { %2915 = vadd.xlane.f32.xlu0 %v2914_v1 }
 0x583   : > { %2912 = vadd.xlane.f32.xlu0 %v2911_v18 }
 0x589   : > { %v2814_v6 = vpop.xlane.xlu1 %2813 }
 0x58a   : > { %v2854_v38 = vsub.f32 %v10065_v16, %v2814_v6  ;;  %v2811_v12 = vpop.xlane.xlu0 %2810 }
 0x58b   : > { %v2853_v45 = vsub.f32 %v10068_v30, %v2811_v12 }
 0x58c   : > { %v2873_v48 = vmul.f32 1.442695, %v2854_v38 }
 0x58d   : > { %v2871_v10 = vmul.f32 1.442695, %v2853_v45 }
 0x58e   : > { %9186 = vpow2.f32 %v2873_v48  ;;  %v2832_v11 = vpop.xlane.xlu0 %2831 }
 0x58f   : > { %v2860_v33 = vsub.f32 %v10073_v28, %v2832_v11  ;;  %9188 = vpow2.f32 %v2871_v10 }
 0x591   : > { %v2885_v42 = vmul.f32 1.442695, %v2860_v33  ;;  %v2826_v26 = vpop.xlane.xlu1 %2825 }
 0x592   : > { %v2858_v9 = vsub.f32 %v10083_v53, %v2826_v26  ;;  %v2829_v17 = vpop.xlane.xlu0 %2828 }
 0x593   : > { %9190 = vpow2.f32 %v2885_v42  ;;  %v2859_v13 = vsub.f32 %v10078_v57, %v2829_v17 }
 0x594   : > { %v2881_v1 = vmul.f32 1.442695, %v2858_v9 }
 0x595   : > { %v2883_v16 = vmul.f32 1.442695, %v2859_v13  ;;  %v2823_v18 = vpop.xlane.xlu1 %2822 }
 0x596   : > { %9192 = vpow2.f32 %v2881_v1  ;;  %v2857_v30 = vsub.f32 %v10086_v22, %v2823_v18  ;;  %v2844_v6 = vpop.xlane.xlu0 %2843 }
 0x597   : > { %9194 = vpow2.f32 %v2883_v16  ;;  %v2864_v38 = vsub.f32 %v10091_v7, %v2844_v6 }
 0x598   : > { %v10167_v28 = vpop.eup %9186  ;;  %v2879_v12 = vmul.f32 1.442695, %v2857_v30 }
 0x599   : > { %v2893_v45 = vmul.f32 1.442695, %v2864_v38  ;;  %v2841_v48 = vpop.xlane.xlu1 %2840  ;;  %v2908_v53 = vsel %vm1202_vm3, %v10167_v28, 0.0  ;;  %v10171_v10 = vpop.eup %9188 }
 0x59a   : > { %9196 = vpow2.f32 %v2879_v12  ;;  %v2863_v57 = vsub.f32 %v10096_v52, %v2841_v48  ;;  %2909 = vadd.xlane.f32.xlu1 %v2908_v53  ;;  %v2838_v11 = vpop.xlane.xlu0 %2837  ;;  %v2905_v26 = vsel %vm1202_vm3, %v10171_v10, 0.0 }
 0x59b   : > { %9198 = vpow2.f32 %v2893_v45  ;;  %v2862_v22 = vsub.f32 %v10103_v23, %v2838_v11 }
 0x59c   : > { %v2891_v33 = vmul.f32 1.442695, %v2863_v57 }
 0x59d   : > { %v10175_v7 = vpop.eup %9190  ;;  %v2889_v42 = vmul.f32 1.442695, %v2862_v22  ;;  %v10217_v48 = vpop.permute.xlu1 %8950 }
 0x59e   : > { %9200 = vpow2.f32 %v2891_v33  ;;  %2906 = vadd.xlane.f32.xlu1 %v2905_v26  ;;  %v2926_v9 = vsel %vm1202_vm3, %v10175_v7, 0.0  ;;  %v10221_v53 = vpop.permute.xlu0 %8945 }
 0x59f   : > { %9202 = vpow2.f32 %v2889_v42  ;;  %2927 = vadd.xlane.f32.xlu0 %v2926_v9 }
 0x5a0   : > { %v10181_v52 = vpop.eup %9192 }
 0x5a1   : > { %v10183_v17 = vpop.eup %9194  ;;  %v2920_v23 = vsel %vm1202_vm3, %v10181_v52, 0.0 }
 0x5a2   : > { %2921 = vadd.xlane.f32.xlu1 %v2920_v23  ;;  %v2923_v13 = vsel %vm1202_vm3, %v10183_v17, 0.0 }
 0x5a3   : > { %2924 = vadd.xlane.f32.xlu0 %v2923_v13 }
 0x5a4   : > { %v10189_v1 = vpop.eup %9196 }
 0x5a5   : > { %v10191_v16 = vpop.eup %9198  ;;  %v2917_v18 = vsel %vm1202_vm3, %v10189_v1, 0.0 }
 0x5a6   : > { %2918 = vadd.xlane.f32.xlu1 %v2917_v18  ;;  %v2938_v30 = vsel %vm1202_vm3, %v10191_v16, 0.0 }
 0x5a7   : > { %2939 = vadd.xlane.f32.xlu0 %v2938_v30 }
 0x5a8   : > { %v10197_v6 = vpop.eup %9200 }
 0x5a9   : > { %v10199_v38 = vpop.eup %9202  ;;  %v2935_v12 = vsel %vm1202_vm3, %v10197_v6, 0.0 }
 0x5aa   : > { %2936 = vadd.xlane.f32.xlu1 %v2935_v12  ;;  %v2932_v45 = vsel %vm1202_vm3, %v10199_v38, 0.0 }
 0x5ab   : > { %2933 = vadd.xlane.f32.xlu0 %v2932_v45 }
 0x5bb   : > { %8970 = vrot.lane.b32.xlu1 %v9554_v58, %s9383_s28 }
 0x5bf   : > { %3768 = vrot.lane.b32.xlu1 %v9504_v32, %s9384_s30 }
 0x5c1   : > { %3677 = vrot.lane.b32.xlu0 %v9492_v24, %s9384_s30 }
 0x5c3   : > { %3857 = vrot.lane.b32.xlu1 %v9520_v43, %s9384_s30 }
 0x5c5   : > { %3766 = vrot.lane.b32.xlu0 %v9508_v35, %s9384_s30 }
 0x5c9   : > { %8975 = vrot.lane.b32.xlu0 %v9528_v46, %s9383_s28 }
 0x5cd   : > { %3859 = vrot.lane.b32.xlu0 %v9518_v40, %s9384_s30 }
 0x5ce   : > { %v2835_v57 = vpop.xlane.xlu1 %2834 }
 0x5cf   : > { %v2861_v11 = vsub.f32 %v10114_v25, %v2835_v57  ;;  %v2850_v22 = vpop.xlane.xlu0 %2849 }
 0x5d0   : > { %v2866_v42 = vsub.f32 %v10117_v20, %v2850_v22 }
 0x5d1   : > { %3948 = vrot.lane.b32.xlu0 %v9542_v55, %s9384_s30  ;;  %v2887_v33 = vmul.f32 1.442695, %v2861_v11 }
 0x5d2   : > { %v2897_v26 = vmul.f32 1.442695, %v2866_v42  ;;  %v10251_v13 = vpop.permute.xlu1 %8960 }
 0x5d3   : > { %9204 = vpow2.f32 %v2887_v33  ;;  %v10253_v18 = vpop.permute.xlu0 %8955 }
 0x5d4   : > { %9206 = vpow2.f32 %v2897_v26 }
 0x5d5   : > { %4039 = vrot.lane.b32.xlu0 %v9496_v29, %s9384_s30 }
 0x5d6   : > { %v10255_v30 = vpop.permute.xlu1 %3675 }
 0x5d7   : > { %v10257_v12 = vpop.permute.xlu0 %8965 }
 0x5d9   : > { %4041 = vrot.lane.b32.xlu0 %v9512_v36, %s9384_s30 }
 0x5dd   : > { %8990 = vrot.lane.b32.xlu0 %v9573_v62, %s9383_s28  ;;  %v10235_v25 = vpop.eup %9204 }
 0x5de   : > { %v2929_v20 = vsel %vm1202_vm3, %v10235_v25, 0.0  ;;  %v10241_v9 = vpop.eup %9206 }
 0x5df   : > { %v2944_v23 = vsel %vm1202_vm3, %v10241_v9, 0.0 }
 0x5e1   : > { %4221 = vrot.lane.b32.xlu0 %v9530_v47, %s9384_s30 }
 0x5e5   : > { %4312 = vrot.lane.b32.xlu0 %v9562_v60, %s9384_s30 }
 0x5e7   : > { %2930 = vadd.xlane.f32.xlu1 %v2929_v20 }
 0x5e9   : > { %8995 = vrot.lane.b32.xlu0 %v9502_v31, %s9385_s7 }
 0x5eb   : > { %2945 = vadd.xlane.f32.xlu1 %v2944_v23 }
 0x5ed   : > { %9005 = vrot.lane.b32.xlu0 %v9534_v49, %s9385_s7 }
 0x5f1   : > { %9015 = vrot.lane.b32.xlu0 %v9528_v46, %s9385_s7 }
 0x607   : > { %v2847_v45 = vpop.xlane.xlu1 %2846 }
 0x608   : > { %v2865_v57 = vsub.f32 %v10140_v63, %v2847_v45  ;;  %v2904_v11 = vpop.xlane.xlu0 %2903 }
 0x609   : > { %9208 = vrcp.f32 %v2904_v11 }
 0x60a   : > { %v2895_v22 = vmul.f32 1.442695, %v2865_v57 }
 0x60b   : > { %v2901_v33 = vpop.xlane.xlu1 %2900 }
 0x60c   : > { %9210 = vpow2.f32 %v2895_v22  ;;  %v2916_v42 = vpop.xlane.xlu0 %2915 }
 0x60d   : > { %9212 = vrcp.f32 %v2901_v33  ;;  %v8948_v33 = vunpack.i.h.bf16 %v10221_v53 }
 0x60e   : > { %9214 = vrcp.f32 %v2916_v42  ;;  %v8947_v42 = vunpack.i.l.bf16 %v10221_v53 }
 0x610   : > { %v2913_v26 = vpop.xlane.xlu0 %2912 }
 0x611   : > { %9216 = vrcp.f32 %v2913_v26  ;;  %v8584_v26 = vpack.c.bf16 %v8938_v3, %v8937_v37 }
 0x613   : > { %v9209_v20 = vpop.eup %9208 }
 0x614   : > { %v2964_v57 = vmul.f32 %v9209_v20, %v10142_v21  ;;  %v8592_v21 = vpack.c.bf16 %v8948_v33, %v8947_v42 }
 0x616   : > { %v10260_v23 = vpop.eup %9210 }
 0x617   : > { %v9213_v41 = vpop.eup %9212  ;;  %v2941_v63 = vsel %vm1202_vm3, %v10260_v23, 0.0 }
 0x618   : > { %2942 = vadd.xlane.f32.xlu1 %v2941_v63  ;;  %v2963_v45 = vmul.f32 %v9213_v41, %v10146_v15  ;;  %v9215_v11 = vpop.eup %9214 }
 0x619   : > { %v2968_v41 = vmul.f32 %v9215_v11, %v10150_v0 }
 0x61a   : > { %8124 = vmatprep.mubr.msk.f32.mxu0 %vm1202_vm3, %v2963_v45  ;;  %v8943_v45 = vunpack.i.h.bf16 %v10133_v5 }
 0x61b   : > { %v9217_v22 = vpop.eup %9216  ;;  %8125 = vmatmul.mubr.msk.f32.vlgmr.msra.gmra.mrb[28].mxu0 %vm1202_vm3, %v2964_v57  ;;  %v8942_v57 = vunpack.i.l.bf16 %v10133_v5  ;;  %v8958_v5 = vunpack.i.h.bf16 %v10253_v18 }
 0x61c   : > { %8579 = vmatpush3.bf16.msra.mxu0 %v9982_v14  ;;  %v2967_v4 = vmul.f32 %v9217_v22, %v10156_v34 }
 0x61d   : > { %8585 = vmatprep.subr.bf16.mxu0 %v8584_v26 }
 0x61e   : > { %8138 = vmatprep.mubr.msk.f32.mxu0 %vm1202_vm3, %v2967_v4  ;;  %v8588_v4 = vpack.c.bf16 %v8943_v45, %v8942_v57 }
 0x61f   : > { %8139 = vmatmul.mubr.msk.f32.vlgmr.msra.gmra.mrb[30].mxu0 %vm1202_vm3, %v2968_v41 }
 0x620   : > { %8587 = vmatpush3.bf16.msra.mxu0 %v8584_v26 }
 0x621   : > { %8593 = vmatprep.subr.bf16.mxu0 %v8592_v21 }
 0x627   : > { %v2910_v15 = vpop.xlane.xlu1 %2909 }
 0x628   : > { %9218 = vrcp.f32 %v2910_v15  ;;  %v8957_v15 = vunpack.i.l.bf16 %v10253_v18 }
 0x629   : > { %8980 = vrot.lane.b32.xlu1 %v9566_v61, %s9383_s28 }
 0x62a   : > { %v8600_v18 = vpack.c.bf16 %v8958_v5, %v8957_v15 }
 0x62b   : > { %v2907_v37 = vpop.xlane.xlu1 %2906 }
 0x62c   : > { %9220 = vrcp.f32 %v2907_v37  ;;  %v2928_v14 = vpop.xlane.xlu0 %2927 }
 0x62d   : > { %3950 = vrot.lane.b32.xlu1 %v9538_v51, %s9384_s30  ;;  %9222 = vrcp.f32 %v2928_v14 }
 0x62f   : > { %v2922_v3 = vpop.xlane.xlu1 %2921 }
 0x630   : > { %v2925_v0 = vpop.xlane.xlu0 %2924 }
 0x631   : > { %9224 = vrcp.f32 %v2925_v0  ;;  %8985 = vrot.lane.b32.xlu1 %v9550_v56, %s9383_s28  ;;  %v8953_v0 = vunpack.i.h.bf16 %v10217_v48 }
 0x632   : > { %9226 = vrcp.f32 %v2922_v3  ;;  %v9219_v20 = vpop.eup %9218 }
 0x633   : > { %v2919_v34 = vpop.xlane.xlu1 %2918  ;;  %v2966_v42 = vmul.f32 %v9219_v20, %v10167_v28 }
 0x634   : > { %9228 = vrcp.f32 %v2919_v34  ;;  %v2940_v53 = vpop.xlane.xlu0 %2939  ;;  %v8952_v34 = vunpack.i.l.bf16 %v10217_v48 }
 0x635   : > { %4130 = vrot.lane.b32.xlu1 %v9540_v54, %s9384_s30  ;;  %9230 = vrcp.f32 %v2940_v53 }
 0x636   : > { %v9221_v63 = vpop.eup %9220  ;;  %v8596_v48 = vpack.c.bf16 %v8953_v0, %v8952_v34 }
 0x637   : > { %v2937_v11 = vpop.xlane.xlu1 %2936  ;;  %v2965_v22 = vmul.f32 %v9221_v63, %v10171_v10  ;;  %v9223_v26 = vpop.eup %9222 }
 0x638   : > { %9232 = vrcp.f32 %v2937_v11  ;;  %v10288_v33 = vpop.xlane.xlu0 %2933  ;;  %v2972_v14 = vmul.f32 %v9223_v26, %v10175_v7 }
 0x639   : > { %8131 = vmatprep.mubr.msk.f32.mxu1 %vm1202_vm3, %v2965_v22  ;;  %4132 = vrot.lane.b32.xlu1 %v9536_v50, %s9384_s30  ;;  %9234 = vrcp.f32 %v10288_v33 }
 0x63a   : > { %8132 = vmatmul.mubr.msk.f32.vlgmr.msra.gmra.mrb[36].mxu1 %vm1202_vm3, %v2966_v42 }
 0x63b   : > { %v9225_v41 = vpop.eup %9224  ;;  %8583 = vmatpush3.bf16.msra.mxu1 %v9999_v19  ;;  %v10319_v63 = vpop.permute.xlu1 %8970 }
 0x63c   : > { %8589 = vmatprep.subr.bf16.mxu1 %v8588_v4  ;;  %v3678_v10 = vpop.permute.xlu0 %3677  ;;  %v2971_v28 = vmul.f32 %v9225_v41, %v10183_v17  ;;  %v9227_v37 = vpop.eup %9226 }
 0x63d   : > { %4223 = vrot.lane.b32.xlu1 %v9524_v44, %s9384_s30  ;;  %v2970_v53 = vmul.f32 %v9227_v37, %v10181_v52  ;;  %v8967_v52 = vunpack.i.l.bf16 %v10257_v12 }
 0x63e   : > { %v9229_v3 = vpop.eup %9228  ;;  %8152 = vmatprep.mubr.msk.f32.mxu0 %vm1202_vm3, %v2971_v28 }
 0x63f   : > { %8153 = vmatmul.mubr.msk.f32.vlgmr.msra.gmra.mrb[32].mxu0 %vm1202_vm3, %v2972_v14  ;;  %v2969_v19 = vmul.f32 %v9229_v3, %v10189_v1  ;;  %v9231_v20 = vpop.eup %9230  ;;  %v8963_v14 = vunpack.i.h.bf16 %v10251_v13  ;;  %v8962_v3 = vunpack.i.l.bf16 %v10251_v13 }
 0x640   : > { %8595 = vmatpush3.bf16.msra.mxu0 %v8592_v21  ;;  %v10307_v17 = vpop.permute.xlu0 %3766  ;;  %v8968_v21 = vunpack.i.h.bf16 %v10257_v12  ;;  %v2976_v57 = vmul.f32 %v9231_v20, %v10191_v16  ;;  %v10330_v12 = vpop.permute.xlu1 %3768 }
 0x641   : > { %8602 = vmatprep.subr.msk.bf16.mxu0 %vm9586_vm2, %v8600_v18  ;;  %8145 = vmatprep.mubr.msk.f32.mxu1 %vm1202_vm3, %v2969_v19 }
 0x642   : > { %v9233_v7 = vpop.eup %9232  ;;  %4314 = vrot.lane.b32.xlu1 %v9560_v59, %s9384_s30  ;;  %8146 = vmatmul.mubr.msk.f32.vlgmr.msra.gmra.mrb[38].mxu1 %vm1202_vm3, %v2970_v53 }
 0x643   : > { %8591 = vmatpush3.bf16.msra.mxu1 %v8588_v4  ;;  %v2975_v1 = vmul.f32 %v9233_v7, %v10197_v6  ;;  %v8612_v6 = vpack.c.bf16 %v8968_v21, %v8967_v52  ;;  %v9235_v28 = vpop.eup %9234  ;;  %v8972_v21 = vunpack.i.l.bf16 %v10319_v63 }
 0x644   : > { %8597 = vmatprep.subr.bf16.mxu1 %v8596_v48  ;;  %v8976_v45 = vpop.permute.xlu0 %8975  ;;  %v2974_v34 = vmul.f32 %v9235_v28, %v10199_v38  ;;  %v8973_v38 = vunpack.i.h.bf16 %v10319_v63 }
 0x645   : > { %8166 = vmatprep.mubr.msk.f32.mxu0 %vm1202_vm3, %v2975_v1  ;;  %v8978_v16 = vunpack.i.h.bf16 %v8976_v45  ;;  %v8977_v22 = vunpack.i.l.bf16 %v8976_v45 }
 0x646   : > { %9000 = vrot.lane.b32.xlu1 %v9516_v39, %s9385_s7  ;;  %8167 = vmatmul.mubr.msk.f32.vlgmr.msra.gmra.mrb[34].mxu0 %vm1202_vm3, %v2976_v57 }
 0x647   : > { %8180 = vmatprep.mubr.msk.f32.mxu0 %vm495_vm1, %v10255_v30  ;;  %v3858_v30 = vpop.permute.xlu1 %3857  ;;  %v8624_v26 = vpack.c.bf16 %v8978_v16, %v8977_v22  ;;  %v8618_v22 = vpack.c.bf16 %v8973_v38, %v8972_v21 }
 0x648   : > { %v3860_v11 = vpop.permute.xlu0 %3859 }
 0x649   : > { %8605 = vmatpush3.bf16.xpose.msk.msra.mxu0 %vm9586_vm2, %v8600_v18  ;;  %v8606_v18 = vpack.c.bf16 %v8963_v14, %v8962_v3 }
 0x64a   : > { %9010 = vrot.lane.b32.xlu1 %v9554_v58, %s9385_s7  ;;  %8614 = vmatprep.subr.msk.bf16.mxu0 %vm9586_vm2, %v8612_v6 }
 0x64c   : > { %v10336_v42 = vpop.permute.xlu0 %3948 }
 0x64e   : > { %9020 = vrot.lane.b32.xlu1 %v9566_v61, %s9385_s7 }
 0x650   : > { %8181 = vmatmul.mubr.msk.f32.vlgmr.msra.gmra.mrb[36].mxu0 %vm495_vm1, %v3678_v10  ;;  %v4040_v4 = vpop.permute.xlu0 %4039 }
 0x651   : > { %8617 = vmatpush3.bf16.xpose.msk.msra.mxu0 %vm9586_vm2, %v8612_v6  ;;  %8194 = vmatprep.mubr.msk.f32.mxu0 %vm495_vm1, %v3858_v30 }
 0x652   : > { %8626 = vmatprep.subr.msk.bf16.mxu0 %vm9586_vm2, %v8624_v26 }
 0x654   : > { %v4042_v41 = vpop.permute.xlu0 %4041 }
 0x658   : > { %8195 = vmatmul.mubr.msk.f32.vlgmr.msra.gmra.mrb[38].mxu0 %vm495_vm1, %v3860_v11  ;;  %v10350_v5 = vpop.permute.xlu0 %8990 }
 0x659   : > { %8629 = vmatpush3.bf16.xpose.msk.msra.mxu0 %vm9586_vm2, %v8624_v26  ;;  %8208 = vmatprep.mubr.msk.f32.mxu0 %vm495_vm1, %v4040_v4  ;;  %v8993_v14 = vunpack.i.h.bf16 %v10350_v5  ;;  %v8992_v3 = vunpack.i.l.bf16 %v10350_v5 }
 0x65c   : > { %v4222_v15 = vpop.permute.xlu0 %4221 }
 0x660   : > { %8209 = vmatmul.mubr.msk.f32.vlgmr.msra.gmra.mrb[40].mxu0 %vm495_vm1, %v4042_v41  ;;  %v4313_v53 = vpop.permute.xlu0 %4312 }
 0x661   : > { %8222 = vmatprep.mubr.msk.f32.mxu0 %vm495_vm1, %v4222_v15 }
 0x664   : > { %v8996_v7 = vpop.permute.xlu0 %8995 }
 0x665   : > { %v8998_v52 = vunpack.i.h.bf16 %v8996_v7  ;;  %v8997_v57 = vunpack.i.l.bf16 %v8996_v7 }
 0x674   : > { %v2931_v10 = vpop.xlane.xlu1 %2930 }
 0x675   : > { %9236 = vrcp.f32 %v2931_v10 }
 0x678   : > { %v2946_v33 = vpop.xlane.xlu1 %2945 }
 0x679   : > { %9238 = vrcp.f32 %v2946_v33 }
 0x67f   : > { %v9237_v37 = vpop.eup %9236 }
 0x680   : > { %v2973_v0 = vmul.f32 %v9237_v37, %v10235_v25 }
 0x682   : > { %8159 = vmatprep.mubr.msk.f32.mxu1 %vm1202_vm3, %v2973_v0  ;;  %v8642_v0 = vpack.c.bf16 %v8993_v14, %v8992_v3 }
 0x683   : > { %8160 = vmatmul.mubr.msk.f32.vlgmr.msra.gmra.mrb[40].mxu1 %vm1202_vm3, %v2974_v34  ;;  %v9239_v25 = vpop.eup %9238 }
 0x684   : > { %8599 = vmatpush3.bf16.msra.mxu1 %v8596_v48  ;;  %v2978_v16 = vmul.f32 %v9239_v25, %v10241_v9  ;;  %v8648_v9 = vpack.c.bf16 %v8998_v52, %v8997_v57 }
 0x685   : > { %8608 = vmatprep.subr.msk.bf16.mxu1 %vm9586_vm2, %v8606_v18 }
 0x6a5   : > { %v2943_v19 = vpop.xlane.xlu1 %2942 }
 0x6a6   : > { %9240 = vrcp.f32 %v2943_v19 }
 0x6a9   : > { %v8981_v20 = vpop.permute.xlu1 %8980 }
 0x6aa   : > { %v8983_v63 = vunpack.i.h.bf16 %v8981_v20  ;;  %v8982_v4 = vunpack.i.l.bf16 %v8981_v20 }
 0x6ac   : > { %v8630_v28 = vpack.c.bf16 %v8983_v63, %v8982_v4 }
 0x6ad   : > { %v3951_v13 = vpop.permute.xlu1 %3950 }
 0x6b0   : > { %v9241_v1 = vpop.eup %9240 }
 0x6b1   : > { %v8986_v45 = vpop.permute.xlu1 %8985  ;;  %v2977_v48 = vmul.f32 %v9241_v1, %v10260_v23  ;;  %v9006_v23 = vpop.permute.xlu0 %9005 }
 0x6b2   : > { %v8988_v6 = vunpack.i.h.bf16 %v8986_v45  ;;  %v8987_v11 = vunpack.i.l.bf16 %v8986_v45  ;;  %v9008_v15 = vunpack.i.h.bf16 %v9006_v23  ;;  %v9007_v10 = vunpack.i.l.bf16 %v9006_v23 }
 0x6b3   : > { %8173 = vmatprep.mubr.msk.f32.mxu1 %vm1202_vm3, %v2977_v48 }
 0x6b4   : > { %v8636_v30 = vpack.c.bf16 %v8988_v6, %v8987_v11  ;;  %8174 = vmatmul.mubr.msk.f32.vlgmr.msra.gmra.mrb[42].mxu1 %vm1202_vm3, %v2978_v16  ;;  %v10388_v37 = vpack.c.bf16 %v9008_v15, %v9007_v10  ;;  %v10434_v16 = vld [vmem:[%s11311_s3 + $0x28] sm:$0xff] }
 0x6b5   : > { %8611 = vmatpush3.bf16.xpose.msk.msra.mxu1 %vm9586_vm2, %v8606_v18  ;;  %v4131_v26 = vpop.permute.xlu1 %4130  ;;  %8187 = vmatprep.mubr.msk.f32.mxu1 %vm495_vm1, %v10307_v17 }
 0x6b6   : > { %8620 = vmatprep.subr.msk.bf16.mxu1 %vm9586_vm2, %v8618_v22  ;;  %8638 = vmatprep.subr.msk.bf16.mxu0 %vm9586_vm2, %v8636_v30 }
 0x6b7   : > { %8641 = vmatpush3.bf16.xpose.msk.msra.mxu0 %vm9586_vm2, %v8636_v30 }
 0x6b8   : > { %8649 = vmatprep.subr.bf16.mxu0 %v8648_v9 }
 0x6b9   : > { %v4133_v41 = vpop.permute.xlu1 %4132 }
 0x6bc   : > { %8188 = vmatmul.mubr.msk.f32.vlgmr.msra.gmra.mrb[44].mxu1 %vm495_vm1, %v10330_v12 }
 0x6bd   : > { %8623 = vmatpush3.bf16.xpose.msk.msra.mxu1 %vm9586_vm2, %v8618_v22  ;;  %8201 = vmatprep.mubr.msk.f32.mxu1 %vm495_vm1, %v10336_v42  ;;  %v4224_v17 = vpop.permute.xlu1 %4223  ;;  %v10439_v22 = vld [vmem:[%s11311_s3 + $0x20] sm:$0xff] }
 0x6be   : > { %8632 = vmatprep.subr.msk.bf16.mxu1 %vm9586_vm2, %v8630_v28  ;;  %8223 = vmatmul.mubr.msk.f32.vlgmr.msra.gmra.mrb[42].mxu0 %vm495_vm1, %v4224_v17 }
 0x6bf   : > { %8651 = vmatpush3.bf16.msra.mxu0 %v8648_v9 }
 0x6c0   : > { %8657 = vmatprep.subr.bf16.mxu0 %v10388_v37 }
 0x6c1   : > { %v4315_v12 = vpop.permute.xlu1 %4314 }
 0x6c4   : > { %8202 = vmatmul.mubr.msk.f32.vlgmr.msra.gmra.mrb[46].mxu1 %vm495_vm1, %v3951_v13 }
 0x6c5   : > { %8635 = vmatpush3.bf16.xpose.msk.msra.mxu1 %vm9586_vm2, %v8630_v28  ;;  %8215 = vmatprep.mubr.msk.f32.mxu1 %vm495_vm1, %v4131_v26  ;;  %v9001_v42 = vpop.permute.xlu1 %9000 }
 0x6c6   : > { %8644 = vmatprep.subr.msk.bf16.mxu1 %vm9586_vm2, %v8642_v0  ;;  %v9003_v34 = vunpack.i.h.bf16 %v9001_v42  ;;  %v9002_v18 = vunpack.i.l.bf16 %v9001_v42 }
 0x6c8   : > { %v8652_v5 = vpack.c.bf16 %v9003_v34, %v9002_v18 }
 0x6c9   : > { %v9011_v33 = vpop.permute.xlu1 %9010 }
 0x6ca   : > { %v9013_v19 = vunpack.i.h.bf16 %v9011_v33  ;;  %v9012_v20 = vunpack.i.l.bf16 %v9011_v33 }
 0x6cc   : > { %8216 = vmatmul.mubr.msk.f32.vlgmr.msra.gmra.mrb[48].mxu1 %vm495_vm1, %v4133_v41  ;;  %v10404_v13 = vpack.c.bf16 %v9013_v19, %v9012_v20 }
 0x6cd   : > { %8647 = vmatpush3.bf16.xpose.msk.msra.mxu1 %vm9586_vm2, %v8642_v0  ;;  %8229 = vmatprep.mubr.msk.f32.mxu1 %vm495_vm1, %v4313_v53 }
 0x6ce   : > { %8653 = vmatprep.subr.bf16.mxu1 %v8652_v5 }
 0x6d4   : > { %8230 = vmatmul.mubr.msk.f32.vlgmr.msra.gmra.mrb[50].mxu1 %vm495_vm1, %v4315_v12 }
 0x6d5   : > { %8655 = vmatpush3.bf16.msra.mxu1 %v8652_v5 }
 0x6d6   : > { %8661 = vmatprep.subr.bf16.mxu1 %v10404_v13 }
 0x6ee   : > { %v10407_v7 = vpop.f32.mrb[28].mxu0 }
 0x6ef   : > { %11333 = vst [vmem:[#allocation18_spill] sm:$0xff] %v10407_v7  ;;  %v10409_v25 = vpop.f32.mrb[29].mxu0 }
 0x6f2   : > { %v10411_v1 = vpop.f32.mrb[30].mxu0 }
 0x6f3   : > { %11334 = vst [vmem:[#allocation19_spill] sm:$0xff] %v10411_v1  ;;  %v10413_v38 = vpop.f32.mrb[31].mxu0 }
 0x70d   : > { %v10415_v21 = vpop.f32.mrb[36].mxu1 }
 0x70e   : > { %11335 = vst [vmem:[#allocation20_spill] sm:$0xff] %v10415_v21  ;;  %v10417_v53 = vpop.f32.mrb[37].mxu1 }
 0x712   : > { %v10419_v52 = vpop.f32.mrb[32].mxu0 }
 0x713   : > { %11336 = vst [vmem:[#allocation21_spill] sm:$0xff] %v10419_v52  ;;  %v10421_v45 = vpop.f32.mrb[33].mxu0 }
 0x715   : > { %v10423_v48 = vpop.f32.mrb[38].mxu1 }
 0x716   : > { %11337 = vst [vmem:[#allocation22_spill] sm:$0xff] %v10423_v48  ;;  %v10425_v57 = vpop.f32.mrb[39].mxu1 }
 0x719   : > { %v10427_v6 = vpop.f32.mrb[34].mxu0 }
 0x71a   : > { %11338 = vst [vmem:[#allocation23_spill] sm:$0xff] %v10427_v6  ;;  %v10429_v11 = vpop.f32.mrb[35].mxu0 }
 0x71b   : > { %11339 = vst [vmem:[#allocation24_spill] sm:$0xff] %v10429_v11 }
 0x723   : > { %v8182_v30 = vpop.f32.mrb[36].mxu0 }
 0x724   : > { %v10442_v26 = vadd.f32 %v8182_v30, %v10434_v16  ;;  %v3757_v9 = vpop.f32.mrb[37].mxu0 }
 0x725   : > { %v10445_v23 = vadd.f32 %v3757_v9, %v10439_v22 }
 0x726   : > { %v4406_v63 = vsel %vm1202_vm3, %v10442_v26, -inf }
 0x727   : > { %4407 = vmax.xlane.f32.xlu1 %v4406_v63  ;;  %v4403_v4 = vsel %vm1202_vm3, %v10445_v23, -inf }
 0x728   : > { %4404 = vmax.xlane.f32.xlu0 %v4403_v4 }
 0x72b   : > { %v8196_v41 = vpop.f32.mrb[38].mxu0 }
 0x72c   : > { %v10452_v15 = vadd.f32 %v8196_v41, %v10434_v16  ;;  %v3939_v10 = vpop.f32.mrb[39].mxu0 }
 0x72d   : > { %v10455_v28 = vadd.f32 %v3939_v10, %v10439_v22 }
 0x72e   : > { %v4418_v17 = vsel %vm1202_vm3, %v10452_v15, -inf }
 0x72f   : > { %4419 = vmax.xlane.f32.xlu0 %v4418_v17  ;;  %v4415_v14 = vsel %vm1202_vm3, %v10455_v28, -inf }
 0x733   : > { %v8210_v3 = vpop.f32.mrb[40].mxu0  ;;  %4416 = vmax.xlane.f32.xlu0 %v4415_v14 }
 0x734   : > { %v4121_v12 = vpop.f32.mrb[41].mxu0  ;;  %v10478_v4 = vadd.f32 %v8210_v3, %v10434_v16 }
 0x735   : > { %v10483_v10 = vadd.f32 %v4121_v12, %v10439_v22 }
 0x736   : > { %v4430_v14 = vsel %vm1202_vm3, %v10478_v4, -inf }
 0x737   : > { %v4427_v12 = vsel %vm1202_vm3, %v10483_v10, -inf }
 0x756   : > { %v10461_v0 = vpop.f32.mrb[40].mxu1 }
 0x757   : > { %11340 = vst [vmem:[#allocation25_spill] sm:$0xff] %v10461_v0  ;;  %v10463_v42 = vpop.f32.mrb[41].mxu1 }
 0x758   : > { %11341 = vst [vmem:[#allocation26_spill] sm:$0xff] %v10463_v42 }
 0x787   : > { %v10465_v34 = vpop.f32.mrb[42].mxu1 }
 0x788   : > { %11342 = vst [vmem:[#allocation27_spill] sm:$0xff] %v10465_v34  ;;  %v10467_v18 = vpop.f32.mrb[43].mxu1 }
 0x789   : > { %11343 = vst [vmem:[#allocation28_spill] sm:$0xff] %v10467_v18 }
 0x78f   : > { %v8189_v5 = vpop.f32.mrb[44].mxu1 }
 0x790   : > { %v10470_v33 = vadd.f32 %v8189_v5, %v10434_v16  ;;  %v3848_v19 = vpop.f32.mrb[45].mxu1 }
 0x791   : > { %v10473_v20 = vadd.f32 %v3848_v19, %v10439_v22  ;;  %v8224_v30 = vpop.f32.mrb[42].mxu0 }
 0x792   : > { %v4412_v9 = vsel %vm1202_vm3, %v10470_v33, -inf  ;;  %v4303_v63 = vpop.f32.mrb[43].mxu0 }
 0x793   : > { %4413 = vmax.xlane.f32.xlu1 %v4412_v9  ;;  %v4409_v41 = vsel %vm1202_vm3, %v10473_v20, -inf  ;;  %v10501_v8 = vadd.f32 %v4303_v63, %v10439_v22 }
 0x794   : > { %4410 = vmax.xlane.f32.xlu0 %v4409_v41  ;;  %v10496_v41 = vadd.f32 %v8224_v30, %v10434_v16 }
 0x797   : > { %v8203_v17 = vpop.f32.mrb[46].mxu1 }
 0x798   : > { %v10488_v5 = vadd.f32 %v8203_v17, %v10434_v16  ;;  %v4030_v19 = vpop.f32.mrb[47].mxu1  ;;  %4431 = vmax.xlane.f32.xlu0 %v4430_v14 }
 0x799   : > { %v10491_v3 = vadd.f32 %v4030_v19, %v10439_v22  ;;  %v4442_v19 = vsel %vm1202_vm3, %v10496_v41, -inf }
 0x79a   : > { %v4424_v9 = vsel %vm1202_vm3, %v10488_v5, -inf }
 0x79b   : > { %4425 = vmax.xlane.f32.xlu1 %v4424_v9  ;;  %v4421_v17 = vsel %vm1202_vm3, %v10491_v3, -inf  ;;  %v4439_v9 = vsel %vm1202_vm3, %v10501_v8, -inf }
 0x79c   : > { %4428 = vmax.xlane.f32.xlu0 %v4427_v12 }
 0x79f   : > { %v8217_v14 = vpop.f32.mrb[48].mxu1  ;;  %4422 = vmax.xlane.f32.xlu1 %v4421_v17 }
 0x7a0   : > { %v10508_v34 = vadd.f32 %v8217_v14, %v10434_v16  ;;  %v4212_v30 = vpop.f32.mrb[49].mxu1  ;;  %4443 = vmax.xlane.f32.xlu0 %v4442_v19 }
 0x7a1   : > { %v10519_v17 = vadd.f32 %v4212_v30, %v10439_v22  ;;  %v10538_v30 = vpop.permute.xlu1 %9020 }
 0x7a2   : > { %v4436_v63 = vsel %vm1202_vm3, %v10508_v34, -inf }
 0x7a3   : > { %4440 = vmax.xlane.f32.xlu1 %v4439_v9  ;;  %v4433_v19 = vsel %vm1202_vm3, %v10519_v17, -inf }
 0x7a4   : > { %4437 = vmax.xlane.f32.xlu0 %v4436_v63 }
 0x7a7   : > { %v8231_v12 = vpop.f32.mrb[50].mxu1 }
 0x7a8   : > { %v4394_v6 = vpop.f32.mrb[51].mxu1  ;;  %v10522_v14 = vadd.f32 %v8231_v12, %v10434_v16  ;;  %v10534_v16 = vpop.permute.xlu0 %9015 }
 0x7a9   : > { %v10545_v7 = vadd.f32 %v4394_v6, %v10439_v22 }
 0x7aa   : > { %v4448_v9 = vsel %vm1202_vm3, %v10522_v14, -inf }
 0x7b4   : > { %9030 = vrot.lane.b32.xlu1 %v9573_v62, %s9385_s7  ;;  %v4408_v12 = vpop.xlane.xlu1 %4407 }
 0x7b5   : > { %v4405_v63 = vpop.xlane.xlu0 %4404 }
 0x7b6   : > { %v4451_v0 = vsub.f32 %v10445_v23, %v4405_v63 }
 0x7b8   : > { %v4467_v1 = vmul.f32 1.442695, %v4451_v0 }
 0x7ba   : > { %9025 = vrot.lane.b32.xlu0 %v9550_v56, %s9385_s7 }
 0x7d8   : > { %4434 = vmax.xlane.f32.xlu1 %v4433_v19  ;;  %v4420_v19 = vpop.xlane.xlu0 %4419 }
 0x7d9   : > { %4449 = vmax.xlane.f32.xlu0 %v4448_v9  ;;  %v4452_v9 = vsub.f32 %v10442_v26, %v4408_v12  ;;  %v4445_v26 = vsel %vm1202_vm3, %v10545_v7, -inf }
 0x7db   : > { %v4469_v52 = vmul.f32 1.442695, %v4452_v9 }
 0x7dc   : > { %v4417_v48 = vpop.xlane.xlu0 %4416 }
 0x7dd   : > { %9242 = vpow2.f32 %v4469_v52  ;;  %v4455_v21 = vsub.f32 %v10455_v28, %v4417_v48 }
 0x7de   : > { %9244 = vpow2.f32 %v4467_v1 }
 0x7df   : > { %v4475_v11 = vmul.f32 1.442695, %v4455_v21 }
 0x7e7   : > { %v10547_v42 = vpop.eup %9242 }
 0x7e8   : > { %v10551_v23 = vpop.eup %9244  ;;  %v4502_v52 = vsel %vm1202_vm3, %v10547_v42, 0.0 }
 0x7e9   : > { %9040 = vrot.lane.b32.xlu1 %v9516_v39, %s9386_s13  ;;  %v4499_v1 = vsel %vm1202_vm3, %v10551_v23, 0.0 }
 0x7ed   : > { %5275 = vrot.lane.b32.xlu1 %v9494_v27, %s9387_s14  ;;  %v4456_v27 = vsub.f32 %v10452_v15, %v4420_v19 }
 0x7ef   : > { %9035 = vrot.lane.b32.xlu0 %v9502_v31, %s9386_s13  ;;  %v4477_v18 = vmul.f32 1.442695, %v4456_v27 }
 0x7f1   : > { %9246 = vpow2.f32 %v4477_v18 }
 0x7f2   : > { %9248 = vpow2.f32 %v4475_v11 }
 0x7f3   : > { %9045 = vrot.lane.b32.xlu0 %v9534_v49, %s9386_s13 }
 0x7fb   : > { %v10555_v15 = vpop.eup %9246 }
 0x7fc   : > { %v4514_v21 = vsel %vm1202_vm3, %v10555_v15, 0.0  ;;  %v10561_v48 = vpop.eup %9248 }
 0x7fd   : > { %v4511_v6 = vsel %vm1202_vm3, %v10561_v48, 0.0 }
 0x811   : > { %4446 = vmax.xlane.f32.xlu1 %v4445_v26 }
 0x812   : > { %4503 = vadd.xlane.f32.xlu0 %v4502_v52 }
 0x815   : > { %4500 = vadd.xlane.f32.xlu1 %v4499_v1 }
 0x816   : > { %4515 = vadd.xlane.f32.xlu0 %v4514_v21 }
 0x81a   : > { %4512 = vadd.xlane.f32.xlu0 %v4511_v6 }
 0x820   : > { %v4414_v11 = vpop.xlane.xlu1 %4413 }
 0x821   : > { %v4454_v22 = vsub.f32 %v10470_v33, %v4414_v11  ;;  %v4411_v28 = vpop.xlane.xlu0 %4410 }
 0x822   : > { %v4453_v0 = vsub.f32 %v10473_v20, %v4411_v28 }
 0x823   : > { %v4473_v18 = vmul.f32 1.442695, %v4454_v22 }
 0x824   : > { %v4471_v63 = vmul.f32 1.442695, %v4453_v0 }
 0x825   : > { %9250 = vpow2.f32 %v4473_v18  ;;  %v4432_v12 = vpop.xlane.xlu0 %4431 }
 0x826   : > { %v4460_v19 = vsub.f32 %v10478_v4, %v4432_v12  ;;  %9252 = vpow2.f32 %v4471_v63 }
 0x828   : > { %v4485_v9 = vmul.f32 1.442695, %v4460_v19  ;;  %v4426_v27 = vpop.xlane.xlu1 %4425 }
 0x829   : > { %v4458_v26 = vsub.f32 %v10488_v5, %v4426_v27  ;;  %v4429_v52 = vpop.xlane.xlu0 %4428 }
 0x82a   : > { %9254 = vpow2.f32 %v4485_v9  ;;  %v4459_v1 = vsub.f32 %v10483_v10, %v4429_v52 }
 0x82b   : > { %v4481_v21 = vmul.f32 1.442695, %v4458_v26 }
 0x82c   : > { %v4483_v33 = vmul.f32 1.442695, %v4459_v1  ;;  %v4423_v6 = vpop.xlane.xlu1 %4422 }
 0x82d   : > { %9256 = vpow2.f32 %v4481_v21  ;;  %v4457_v20 = vsub.f32 %v10491_v3, %v4423_v6  ;;  %v4444_v11 = vpop.xlane.xlu0 %4443 }
 0x82e   : > { %9258 = vpow2.f32 %v4483_v33  ;;  %v4464_v22 = vsub.f32 %v10496_v41, %v4444_v11 }
 0x82f   : > { %v10572_v4 = vpop.eup %9250  ;;  %v4479_v28 = vmul.f32 1.442695, %v4457_v20 }
 0x830   : > { %v4493_v0 = vmul.f32 1.442695, %v4464_v22  ;;  %v4441_v18 = vpop.xlane.xlu1 %4440  ;;  %v4508_v5 = vsel %vm1202_vm3, %v10572_v4, 0.0  ;;  %v10576_v63 = vpop.eup %9252 }
 0x831   : > { %9260 = vpow2.f32 %v4479_v28  ;;  %v4463_v10 = vsub.f32 %v10501_v8, %v4441_v18  ;;  %4509 = vadd.xlane.f32.xlu1 %v4508_v5  ;;  %v4438_v12 = vpop.xlane.xlu0 %4437  ;;  %v4505_v27 = vsel %vm1202_vm3, %v10576_v63, 0.0 }
 0x832   : > { %9262 = vpow2.f32 %v4493_v0  ;;  %v4462_v3 = vsub.f32 %v10508_v34, %v4438_v12 }
 0x833   : > { %v4491_v19 = vmul.f32 1.442695, %v4463_v10 }
 0x834   : > { %v10580_v41 = vpop.eup %9254  ;;  %v4489_v9 = vmul.f32 1.442695, %v4462_v3  ;;  %v10622_v18 = vpop.permute.xlu1 %9030 }
 0x835   : > { %9264 = vpow2.f32 %v4491_v19  ;;  %4506 = vadd.xlane.f32.xlu1 %v4505_v27  ;;  %v4526_v26 = vsel %vm1202_vm3, %v10580_v41, 0.0  ;;  %v9026_v5 = vpop.permute.xlu0 %9025 }
 0x836   : > { %9266 = vpow2.f32 %v4489_v9  ;;  %4527 = vadd.xlane.f32.xlu0 %v4526_v26 }
 0x837   : > { %v10586_v8 = vpop.eup %9256 }
 0x838   : > { %v10588_v52 = vpop.eup %9258  ;;  %v4520_v34 = vsel %vm1202_vm3, %v10586_v8, 0.0 }
 0x839   : > { %4521 = vadd.xlane.f32.xlu1 %v4520_v34  ;;  %v4523_v1 = vsel %vm1202_vm3, %v10588_v52, 0.0 }
 0x83a   : > { %4524 = vadd.xlane.f32.xlu0 %v4523_v1 }
 0x83b   : > { %v10594_v21 = vpop.eup %9260 }
 0x83c   : > { %v10596_v33 = vpop.eup %9262  ;;  %v4517_v6 = vsel %vm1202_vm3, %v10594_v21, 0.0 }
 0x83d   : > { %4518 = vadd.xlane.f32.xlu1 %v4517_v6  ;;  %v4538_v20 = vsel %vm1202_vm3, %v10596_v33, 0.0 }
 0x83e   : > { %4539 = vadd.xlane.f32.xlu0 %v4538_v20 }
 0x83f   : > { %v10602_v11 = vpop.eup %9264 }
 0x840   : > { %v10604_v22 = vpop.eup %9266  ;;  %v4535_v28 = vsel %vm1202_vm3, %v10602_v11, 0.0 }
 0x841   : > { %4536 = vadd.xlane.f32.xlu1 %v4535_v28  ;;  %v4532_v0 = vsel %vm1202_vm3, %v10604_v22, 0.0 }
 0x842   : > { %4533 = vadd.xlane.f32.xlu0 %v4532_v0  ;;  %v9018_v0 = vunpack.i.h.bf16 %v10534_v16 }
 0x852   : > { %9050 = vrot.lane.b32.xlu1 %v9554_v58, %s9386_s13 }
 0x856   : > { %5368 = vrot.lane.b32.xlu1 %v9504_v32, %s9387_s14 }
 0x858   : > { %5277 = vrot.lane.b32.xlu0 %v9492_v24, %s9387_s14 }
 0x85a   : > { %5457 = vrot.lane.b32.xlu1 %v9520_v43, %s9387_s14 }
 0x85c   : > { %5366 = vrot.lane.b32.xlu0 %v9508_v35, %s9387_s14 }
 0x860   : > { %9055 = vrot.lane.b32.xlu0 %v9528_v46, %s9386_s13 }
 0x864   : > { %5459 = vrot.lane.b32.xlu0 %v9518_v40, %s9387_s14 }
 0x865   : > { %v4435_v10 = vpop.xlane.xlu1 %4434 }
 0x866   : > { %v4461_v32 = vsub.f32 %v10519_v17, %v4435_v10  ;;  %v4450_v24 = vpop.xlane.xlu0 %4449  ;;  %v9017_v10 = vunpack.i.l.bf16 %v10534_v16 }
 0x867   : > { %v4466_v12 = vsub.f32 %v10522_v14, %v4450_v24 }
 0x868   : > { %5548 = vrot.lane.b32.xlu0 %v9542_v55, %s9387_s14  ;;  %v4487_v43 = vmul.f32 1.442695, %v4461_v32 }
 0x869   : > { %v4497_v35 = vmul.f32 1.442695, %v4466_v12  ;;  %v10648_v14 = vpop.permute.xlu1 %9040 }
 0x86a   : > { %9268 = vpow2.f32 %v4487_v43 }
 0x86b   : > { %9270 = vpow2.f32 %v4497_v35  ;;  %v9028_v35 = vunpack.i.h.bf16 %v9026_v5 }
 0x86c   : > { %9065 = vrot.lane.b32.xlu0 %v9550_v56, %s9386_s13 }
 0x870   : > { %5641 = vrot.lane.b32.xlu0 %v9512_v36, %s9387_s14 }
 0x874   : > { %5730 = vrot.lane.b32.xlu0 %v9540_v54, %s9387_s14  ;;  %v10638_v40 = vpop.eup %9268  ;;  %v10650_v54 = vpop.permute.xlu0 %9035 }
 0x875   : > { %v4529_v55 = vsel %vm1202_vm3, %v10638_v40, 0.0  ;;  %v10644_v17 = vpop.eup %9270 }
 0x876   : > { %v4544_v36 = vsel %vm1202_vm3, %v10644_v17, 0.0 }
 0x878   : > { %5821 = vrot.lane.b32.xlu0 %v9530_v47, %s9387_s14  ;;  %v10652_v47 = vpop.permute.xlu1 %5275  ;;  %v10654_v3 = vpop.permute.xlu0 %9045 }
 0x87c   : > { %5912 = vrot.lane.b32.xlu0 %v9562_v60, %s9387_s14 }
 0x87e   : > { %4530 = vadd.xlane.f32.xlu1 %v4529_v55  ;;  %v9027_v55 = vunpack.i.l.bf16 %v9026_v5 }
 0x882   : > { %4545 = vadd.xlane.f32.xlu1 %v4544_v36  ;;  %v8664_v36 = vpack.c.bf16 %v9018_v0, %v9017_v10 }
 0x89e   : > { %v4447_v19 = vpop.xlane.xlu1 %4446 }
 0x89f   : > { %v4465_v60 = vsub.f32 %v10545_v7, %v4447_v19  ;;  %v4504_v9 = vpop.xlane.xlu0 %4503 }
 0x8a0   : > { %9272 = vrcp.f32 %v4504_v9 }
 0x8a1   : > { %v4495_v27 = vmul.f32 1.442695, %v4465_v60 }
 0x8a2   : > { %v4501_v26 = vpop.xlane.xlu1 %4500 }
 0x8a3   : > { %9274 = vpow2.f32 %v4495_v27  ;;  %v4516_v34 = vpop.xlane.xlu0 %4515 }
 0x8a4   : > { %9276 = vrcp.f32 %v4501_v26 }
 0x8a5   : > { %9278 = vrcp.f32 %v4516_v34  ;;  %v9023_v34 = vunpack.i.h.bf16 %v10538_v30 }
 0x8a7   : > { %v4513_v1 = vpop.xlane.xlu0 %4512 }
 0x8a8   : > { %9280 = vrcp.f32 %v4513_v1 }
 0x8aa   : > { %v9273_v6 = vpop.eup %9272 }
 0x8ab   : > { %v4564_v24 = vmul.f32 %v9273_v6, %v10547_v42  ;;  %v8672_v42 = vpack.c.bf16 %v9028_v35, %v9027_v55  ;;  %v9032_v35 = vunpack.i.l.bf16 %v10622_v18 }
 0x8ad   : > { %v10657_v20 = vpop.eup %9274 }
 0x8ae   : > { %v9277_v28 = vpop.eup %9276  ;;  %v4541_v7 = vsel %vm1202_vm3, %v10657_v20, 0.0 }
 0x8af   : > { %4542 = vadd.xlane.f32.xlu1 %v4541_v7  ;;  %v4563_v32 = vmul.f32 %v9277_v28, %v10551_v23  ;;  %v9279_v43 = vpop.eup %9278 }
 0x8b0   : > { %v4568_v19 = vmul.f32 %v9279_v43, %v10555_v15 }
 0x8b1   : > { %8236 = vmatprep.mubr.msk.f32.mxu0 %vm1202_vm3, %v4563_v32  ;;  %v9037_v32 = vunpack.i.l.bf16 %v10650_v54 }
 0x8b2   : > { %v9281_v12 = vpop.eup %9280  ;;  %8237 = vmatmul.mubr.msk.f32.vlgmr.msra.gmra.mrb[44].mxu0 %vm1202_vm3, %v4564_v24 }
 0x8b3   : > { %8659 = vmatpush3.bf16.msra.mxu0 %v10388_v37  ;;  %v4567_v16 = vmul.f32 %v9281_v12, %v10561_v48  ;;  %v9033_v12 = vunpack.i.h.bf16 %v10622_v18 }
 0x8b4   : > { %8665 = vmatprep.subr.bf16.mxu0 %v8664_v36 }
 0x8b5   : > { %8250 = vmatprep.mubr.msk.f32.mxu0 %vm1202_vm3, %v4567_v16  ;;  %v8676_v18 = vpack.c.bf16 %v9033_v12, %v9032_v35 }
 0x8b6   : > { %8251 = vmatmul.mubr.msk.f32.vlgmr.msra.gmra.mrb[46].mxu0 %vm1202_vm3, %v4568_v19 }
 0x8b7   : > { %8667 = vmatpush3.bf16.msra.mxu0 %v8664_v36  ;;  %v9048_v36 = vunpack.i.h.bf16 %v10654_v3 }
 0x8b8   : > { %8673 = vmatprep.subr.bf16.mxu0 %v8672_v42 }
 0x8be   : > { %v4510_v23 = vpop.xlane.xlu1 %4509 }
 0x8bf   : > { %9282 = vrcp.f32 %v4510_v23 }
 0x8c0   : > { %9060 = vrot.lane.b32.xlu1 %v9566_v61, %s9386_s13 }
 0x8c2   : > { %v4507_v5 = vpop.xlane.xlu1 %4506 }
 0x8c3   : > { %9284 = vrcp.f32 %v4507_v5  ;;  %v4528_v37 = vpop.xlane.xlu0 %4527 }
 0x8c4   : > { %5550 = vrot.lane.b32.xlu1 %v9538_v51, %s9387_s14  ;;  %9286 = vrcp.f32 %v4528_v37  ;;  %v9022_v51 = vunpack.i.l.bf16 %v10538_v30  ;;  %v9038_v30 = vunpack.i.h.bf16 %v10650_v54 }
 0x8c6   : > { %v4522_v48 = vpop.xlane.xlu1 %4521  ;;  %v8668_v10 = vpack.c.bf16 %v9023_v34, %v9022_v51  ;;  %v8680_v54 = vpack.c.bf16 %v9038_v30, %v9037_v32  ;;  %v9043_v34 = vunpack.i.h.bf16 %v10648_v14  ;;  %v9042_v51 = vunpack.i.l.bf16 %v10648_v14 }
 0x8c7   : > { %v4525_v15 = vpop.xlane.xlu0 %4524 }
 0x8c8   : > { %9288 = vrcp.f32 %v4525_v15  ;;  %5639 = vrot.lane.b32.xlu1 %v9496_v29, %s9387_s14 }
 0x8c9   : > { %9290 = vrcp.f32 %v4522_v48  ;;  %v9283_v27 = vpop.eup %9282 }
 0x8ca   : > { %v4519_v60 = vpop.xlane.xlu1 %4518  ;;  %v4566_v29 = vmul.f32 %v9283_v27, %v10572_v4 }
 0x8cb   : > { %9292 = vrcp.f32 %v4519_v60  ;;  %v4540_v9 = vpop.xlane.xlu0 %4539 }
 0x8cc   : > { %9070 = vrot.lane.b32.xlu1 %v9573_v62, %s9386_s13  ;;  %9294 = vrcp.f32 %v4540_v9 }
 0x8cd   : > { %v9285_v26 = vpop.eup %9284 }
 0x8ce   : > { %v4537_v1 = vpop.xlane.xlu1 %4536  ;;  %v4565_v6 = vmul.f32 %v9285_v26, %v10576_v63  ;;  %v9287_v0 = vpop.eup %9286 }
 0x8cf   : > { %9296 = vrcp.f32 %v4537_v1  ;;  %v10683_v28 = vpop.xlane.xlu0 %4533 }
 0x8d0   : > { %8243 = vmatprep.mubr.msk.f32.mxu1 %vm1202_vm3, %v4565_v6  ;;  %5732 = vrot.lane.b32.xlu1 %v9536_v50, %s9387_s14  ;;  %v4572_v50 = vmul.f32 %v9287_v0, %v10580_v41  ;;  %9298 = vrcp.f32 %v10683_v28 }
 0x8d1   : > { %8244 = vmatmul.mubr.msk.f32.vlgmr.msra.gmra.mrb[52].mxu1 %vm1202_vm3, %v4566_v29  ;;  %v8686_v29 = vpack.c.bf16 %v9043_v34, %v9042_v51 }
 0x8d2   : > { %v9289_v7 = vpop.eup %9288  ;;  %8663 = vmatpush3.bf16.msra.mxu1 %v10404_v13  ;;  %v10714_v16 = vpop.permute.xlu1 %9050 }
 0x8d3   : > { %8669 = vmatprep.subr.bf16.mxu1 %v8668_v10  ;;  %v5278_v63 = vpop.permute.xlu0 %5277  ;;  %v4571_v4 = vmul.f32 %v9289_v7, %v10588_v52  ;;  %v9291_v24 = vpop.eup %9290 }
 0x8d4   : > { %5823 = vrot.lane.b32.xlu1 %v9524_v44, %s9387_s14  ;;  %v4570_v55 = vmul.f32 %v9291_v24, %v10586_v8  ;;  %v9047_v8 = vunpack.i.l.bf16 %v10654_v3 }
 0x8d5   : > { %v9293_v43 = vpop.eup %9292  ;;  %8264 = vmatprep.mubr.msk.f32.mxu0 %vm1202_vm3, %v4571_v4 }
 0x8d6   : > { %8265 = vmatmul.mubr.msk.f32.vlgmr.msra.gmra.mrb[48].mxu0 %vm1202_vm3, %v4572_v50  ;;  %v4569_v13 = vmul.f32 %v9293_v43, %v10594_v21  ;;  %v9295_v44 = vpop.eup %9294  ;;  %v10725_v3 = vpop.permute.xlu1 %5368 }
 0x8d7   : > { %8675 = vmatpush3.bf16.msra.mxu0 %v8672_v42  ;;  %v10702_v52 = vpop.permute.xlu0 %5366  ;;  %v4576_v42 = vmul.f32 %v9295_v44, %v10596_v33 }
 0x8d8   : > { %8682 = vmatprep.subr.msk.bf16.mxu0 %vm9586_vm2, %v8680_v54  ;;  %8257 = vmatprep.mubr.msk.f32.mxu1 %vm1202_vm3, %v4569_v13 }
 0x8d9   : > { %v9297_v41 = vpop.eup %9296  ;;  %5914 = vrot.lane.b32.xlu1 %v9560_v59, %s9387_s14  ;;  %8258 = vmatmul.mubr.msk.f32.vlgmr.msra.gmra.mrb[54].mxu1 %vm1202_vm3, %v4570_v55  ;;  %v8692_v59 = vpack.c.bf16 %v9048_v36, %v9047_v8  ;;  %s11271_s14 = scalar_lea.vmem %s11314_s6, %s7393_s8 }
 0x8da   : > { %8671 = vmatpush3.bf16.msra.mxu1 %v8668_v10  ;;  %v4575_v21 = vmul.f32 %v9297_v41, %v10602_v11  ;;  %v5458_v37 = vpop.permute.xlu1 %5457  ;;  %v9299_v27 = vpop.eup %9298 }
 0x8db   : > { %8677 = vmatprep.subr.bf16.mxu1 %v8676_v18  ;;  %v9056_v19 = vpop.permute.xlu0 %9055  ;;  %v4574_v6 = vmul.f32 %v9299_v27, %v10604_v22  ;;  %v9053_v22 = vunpack.i.h.bf16 %v10714_v16 }
 0x8dc   : > { %8278 = vmatprep.mubr.msk.f32.mxu0 %vm1202_vm3, %v4575_v21  ;;  %v9058_v33 = vunpack.i.h.bf16 %v9056_v19  ;;  %v9057_v23 = vunpack.i.l.bf16 %v9056_v19 }
 0x8dd   : > { %9075 = vrot.lane.b32.xlu1 %v9502_v31, %s9388_s15  ;;  %8279 = vmatmul.mubr.msk.f32.vlgmr.msra.gmra.mrb[50].mxu0 %vm1202_vm3, %v4576_v42 }
 0x8de   : > { %8292 = vmatprep.mubr.msk.f32.mxu0 %vm495_vm1, %v10652_v47  ;;  %v8704_v31 = vpack.c.bf16 %v9058_v33, %v9057_v23 }
 0x8df   : > { %v5460_v11 = vpop.permute.xlu0 %5459 }
 0x8e0   : > { %8685 = vmatpush3.bf16.xpose.msk.msra.mxu0 %vm9586_vm2, %v8680_v54 }
 0x8e1   : > { %8694 = vmatprep.subr.msk.bf16.mxu0 %vm9586_vm2, %v8692_v59 }
 0x8e3   : > { %v5549_v5 = vpop.permute.xlu0 %5548 }
 0x8e7   : > { %8293 = vmatmul.mubr.msk.f32.vlgmr.msra.gmra.mrb[52].mxu0 %vm495_vm1, %v5278_v63  ;;  %v9066_v48 = vpop.permute.xlu0 %9065  ;;  %v9052_v63 = vunpack.i.l.bf16 %v10714_v16 }
 0x8e8   : > { %8697 = vmatpush3.bf16.xpose.msk.msra.mxu0 %vm9586_vm2, %v8692_v59  ;;  %8306 = vmatprep.mubr.msk.f32.mxu0 %vm495_vm1, %v5458_v37  ;;  %v9068_v47 = vunpack.i.h.bf16 %v9066_v48  ;;  %v9067_v15 = vunpack.i.l.bf16 %v9066_v48 }
 0x8e9   : > { %8706 = vmatprep.subr.msk.bf16.mxu0 %vm9586_vm2, %v8704_v31  ;;  %v8698_v43 = vpack.c.bf16 %v9053_v22, %v9052_v63 }
 0x8ea   : > { %v8716_v60 = vpack.c.bf16 %v9068_v47, %v9067_v15  ;;  %v10812_v15 = vld [vmem:[%s11311_s3 + $0x38] sm:$0xff] }
 0x8eb   : > { %v5642_v10 = vpop.permute.xlu0 %5641 }
 0x8ef   : > { %8307 = vmatmul.mubr.msk.f32.vlgmr.msra.gmra.mrb[54].mxu0 %vm495_vm1, %v5460_v11  ;;  %v5731_v30 = vpop.permute.xlu0 %5730 }
 0x8f0   : > { %8709 = vmatpush3.bf16.xpose.msk.msra.mxu0 %vm9586_vm2, %v8704_v31 }
 0x8f1   : > { %8718 = vmatprep.subr.msk.bf16.mxu0 %vm9586_vm2, %v8716_v60 }
 0x8f3   : > { %v5822_v12 = vpop.permute.xlu0 %5821 }
 0x8f7   : > { %v5913_v19 = vpop.permute.xlu0 %5912 }
 0x90b   : > { %v4531_v9 = vpop.xlane.xlu1 %4530 }
 0x90c   : > { %9300 = vrcp.f32 %v4531_v9 }
 0x90f   : > { %v4546_v28 = vpop.xlane.xlu1 %4545 }
 0x910   : > { %9302 = vrcp.f32 %v4546_v28 }
 0x916   : > { %v9301_v26 = vpop.eup %9300 }
 0x917   : > { %v4573_v1 = vmul.f32 %v9301_v26, %v10638_v40 }
 0x919   : > { %8271 = vmatprep.mubr.msk.f32.mxu1 %vm1202_vm3, %v4573_v1 }
 0x91a   : > { %8272 = vmatmul.mubr.msk.f32.vlgmr.msra.gmra.mrb[56].mxu1 %vm1202_vm3, %v4574_v6  ;;  %v9303_v40 = vpop.eup %9302 }
 0x91b   : > { %8679 = vmatpush3.bf16.msra.mxu1 %v8676_v18  ;;  %v4578_v50 = vmul.f32 %v9303_v40, %v10644_v17 }
 0x91c   : > { %8688 = vmatprep.subr.msk.bf16.mxu1 %vm9586_vm2, %v8686_v29 }
 0x93c   : > { %v4543_v0 = vpop.xlane.xlu1 %4542 }
 0x93d   : > { %9304 = vrcp.f32 %v4543_v0 }
 0x940   : > { %v9061_v7 = vpop.permute.xlu1 %9060 }
 0x941   : > { %v9063_v17 = vunpack.i.h.bf16 %v9061_v7  ;;  %v9062_v35 = vunpack.i.l.bf16 %v9061_v7 }
 0x943   : > { %v8710_v13 = vpack.c.bf16 %v9063_v17, %v9062_v35 }
 0x944   : > { %v5551_v14 = vpop.permute.xlu1 %5550 }
 0x947   : > { %v9305_v32 = vpop.eup %9304 }
 0x948   : > { %v5640_v4 = vpop.permute.xlu1 %5639  ;;  %v4577_v24 = vmul.f32 %v9305_v32, %v10657_v20 }
 0x949   : > { %8320 = vmatprep.mubr.msk.f32.mxu0 %vm495_vm1, %v5640_v4 }
 0x94a   : > { %8285 = vmatprep.mubr.msk.f32.mxu1 %vm1202_vm3, %v4577_v24  ;;  %8321 = vmatmul.mubr.msk.f32.vlgmr.msra.gmra.mrb[56].mxu0 %vm495_vm1, %v5642_v10 }
 0x94b   : > { %8721 = vmatpush3.bf16.xpose.msk.msra.mxu0 %vm9586_vm2, %v8716_v60  ;;  %8286 = vmatmul.mubr.msk.f32.vlgmr.msra.gmra.mrb[58].mxu1 %vm1202_vm3, %v4578_v50  ;;  %v10817_v60 = vld [vmem:[%s11311_s3 + $0x30] sm:$0xff] }
 0x94c   : > { %8691 = vmatpush3.bf16.xpose.msk.msra.mxu1 %vm9586_vm2, %v8686_v29  ;;  %8334 = vmatprep.mubr.msk.f32.mxu0 %vm495_vm1, %v5822_v12  ;;  %v9071_v20 = vpop.permute.xlu1 %9070 }
 0x94d   : > { %8299 = vmatprep.mubr.msk.f32.mxu1 %vm495_vm1, %v10702_v52  ;;  %8700 = vmatprep.subr.msk.bf16.mxu1 %vm9586_vm2, %v8698_v43  ;;  %v9073_v52 = vunpack.i.h.bf16 %v9071_v20  ;;  %v9072_v44 = vunpack.i.l.bf16 %v9071_v20 }
 0x94f   : > { %v8722_v18 = vpack.c.bf16 %v9073_v52, %v9072_v44 }
 0x950   : > { %v5733_v54 = vpop.permute.xlu1 %5732 }
 0x953   : > { %8300 = vmatmul.mubr.msk.f32.vlgmr.msra.gmra.mrb[60].mxu1 %vm495_vm1, %v10725_v3 }
 0x954   : > { %8703 = vmatpush3.bf16.xpose.msk.msra.mxu1 %vm9586_vm2, %v8698_v43  ;;  %8313 = vmatprep.mubr.msk.f32.mxu1 %vm495_vm1, %v5549_v5  ;;  %v5824_v55 = vpop.permute.xlu1 %5823 }
 0x955   : > { %8712 = vmatprep.subr.msk.bf16.mxu1 %vm9586_vm2, %v8710_v13  ;;  %8335 = vmatmul.mubr.msk.f32.vlgmr.msra.gmra.mrb[58].mxu0 %vm495_vm1, %v5824_v55 }
 0x958   : > { %v5915_v41 = vpop.permute.xlu1 %5914 }
 0x95b   : > { %8314 = vmatmul.mubr.msk.f32.vlgmr.msra.gmra.mrb[62].mxu1 %vm495_vm1, %v5551_v14 }
 0x95c   : > { %8715 = vmatpush3.bf16.xpose.msk.msra.mxu1 %vm9586_vm2, %v8710_v13  ;;  %8327 = vmatprep.mubr.msk.f32.mxu1 %vm495_vm1, %v5731_v30  ;;  %v9076_v21 = vpop.permute.xlu1 %9075 }
 0x95d   : > { %v9078_v36 = vunpack.i.h.bf16 %v9076_v21  ;;  %v9077_v8 = vunpack.i.l.bf16 %v9076_v21  ;;  %8724 = vmatprep.subr.msk.bf16.mxu1 %vm9586_vm2, %v8722_v18 }
 0x95f   : > { %v8728_v16 = vpack.c.bf16 %v9078_v36, %v9077_v8 }
 0x961   : > { %8729 = vmatprep.subr.bf16.mxu0 %v8728_v16 }
 0x962   : > { %8731 = vmatpush3.bf16.msra.mxu0 %v8728_v16 }
 0x963   : > { %8328 = vmatmul.mubr.msk.f32.vlgmr.msra.gmra.mrb[64].mxu1 %vm495_vm1, %v5733_v54 }
 0x964   : > { %8727 = vmatpush3.bf16.xpose.msk.msra.mxu1 %vm9586_vm2, %v8722_v18  ;;  %8341 = vmatprep.mubr.msk.f32.mxu1 %vm495_vm1, %v5913_v19 }
 0x96b   : > { %8342 = vmatmul.mubr.msk.f32.vlgmr.msra.gmra.mrb[66].mxu1 %vm495_vm1, %v5915_v41 }
 0x985   : > { %v10785_v42 = vpop.f32.mrb[44].mxu0 }
 0x986   : > { %v10787_v59 = vpop.f32.mrb[45].mxu0 }
 0x989   : > { %v10789_v11 = vpop.f32.mrb[46].mxu0 }
 0x98a   : > { %v10791_v3 = vpop.f32.mrb[47].mxu0 }
 0x9a4   : > { %v10793_v33 = vpop.f32.mrb[52].mxu1 }
 0x9a5   : > { %v10795_v23 = vpop.f32.mrb[53].mxu1 }
 0x9a9   : > { %v10797_v5 = vpop.f32.mrb[48].mxu0 }
 0x9aa   : > { %v10799_v2 = vpop.f32.mrb[49].mxu0 }
 0x9ac   : > { %v10801_v37 = vpop.f32.mrb[54].mxu1 }
 0x9ad   : > { %v10803_v31 = vpop.f32.mrb[55].mxu1 }
 0x9b0   : > { %v10805_v48 = vpop.f32.mrb[50].mxu0 }
 0x9b1   : > { %v10807_v47 = vpop.f32.mrb[51].mxu0 }
 0x9ba   : > { %v8294_v9 = vpop.f32.mrb[52].mxu0 }
 0x9bb   : > { %v10820_v27 = vadd.f32 %v8294_v9, %v10812_v15  ;;  %v5357_v26 = vpop.f32.mrb[53].mxu0 }
 0x9bc   : > { %v10823_v34 = vadd.f32 %v5357_v26, %v10817_v60 }
 0x9bd   : > { %v6006_v51 = vsel %vm1202_vm3, %v10820_v27, -inf }
 0x9be   : > { %6007 = vmax.xlane.f32.xlu1 %v6006_v51  ;;  %v6003_v1 = vsel %vm1202_vm3, %v10823_v34, -inf }
 0x9bf   : > { %6004 = vmax.xlane.f32.xlu0 %v6003_v1 }
 0x9c2   : > { %v8308_v6 = vpop.f32.mrb[54].mxu0 }
 0x9c3   : > { %v10830_v29 = vadd.f32 %v8308_v6, %v10812_v15  ;;  %v5539_v28 = vpop.f32.mrb[55].mxu0 }
 0x9c4   : > { %v10833_v0 = vadd.f32 %v5539_v28, %v10817_v60 }
 0x9c5   : > { %v6018_v10 = vsel %vm1202_vm3, %v10830_v29, -inf }
 0x9c6   : > { %6019 = vmax.xlane.f32.xlu0 %v6018_v10  ;;  %v6015_v7 = vsel %vm1202_vm3, %v10833_v0, -inf }
 0x9c7   : > { %6016 = vmax.xlane.f32.xlu1 %v6015_v7 }
 0x9ed   : > { %v10839_v14 = vpop.f32.mrb[56].mxu1 }
 0x9ee   : > { %v10841_v30 = vpop.f32.mrb[57].mxu1 }
 0xa1d   : > { %v8322_v40 = vpop.f32.mrb[56].mxu0 }
 0xa1e   : > { %v10843_v32 = vpop.f32.mrb[58].mxu1  ;;  %v5721_v22 = vpop.f32.mrb[57].mxu0  ;;  %v10861_v13 = vadd.f32 %v8322_v40, %v10812_v15 }
 0xa1f   : > { %v10846_v63 = vadd.f32 %v5721_v22, %v10817_v60  ;;  %v10848_v4 = vpop.f32.mrb[59].mxu1 }
 0xa20   : > { %v6030_v21 = vsel %vm1202_vm3, %v10861_v13, -inf }
 0xa21   : > { %v6027_v24 = vsel %vm1202_vm3, %v10846_v63, -inf }
 0xa22   : > { %6028 = vmax.xlane.f32.xlu1 %v6027_v24 }
 0xa26   : > { %v8301_v50 = vpop.f32.mrb[60].mxu1 }
 0xa27   : > { %v10853_v43 = vadd.f32 %v8301_v50, %v10812_v15  ;;  %v5448_v12 = vpop.f32.mrb[61].mxu1 }
 0xa28   : > { %v8336_v20 = vpop.f32.mrb[58].mxu0  ;;  %v10856_v17 = vadd.f32 %v5448_v12, %v10817_v60 }
 0xa29   : > { %v5903_v35 = vpop.f32.mrb[59].mxu0  ;;  %v6012_v54 = vsel %vm1202_vm3, %v10853_v43, -inf  ;;  %v10879_v16 = vadd.f32 %v8336_v20, %v10812_v15 }
 0xa2a   : > { %6013 = vmax.xlane.f32.xlu0 %v6012_v54  ;;  %v6009_v55 = vsel %vm1202_vm3, %v10856_v17, -inf  ;;  %v10874_v36 = vadd.f32 %v5903_v35, %v10817_v60 }
 0xa2b   : > { %v6042_v28 = vsel %vm1202_vm3, %v10879_v16, -inf }
 0xa2c   : > { %v6039_v26 = vsel %vm1202_vm3, %v10874_v36, -inf }
 0xa2e   : > { %v8315_v52 = vpop.f32.mrb[62].mxu1  ;;  %6010 = vmax.xlane.f32.xlu0 %v6009_v55 }
 0xa2f   : > { %v5630_v44 = vpop.f32.mrb[63].mxu1  ;;  %v10869_v18 = vadd.f32 %v8315_v52, %v10812_v15 }
 0xa30   : > { %v10866_v41 = vadd.f32 %v5630_v44, %v10817_v60 }
 0xa31   : > { %v6024_v19 = vsel %vm1202_vm3, %v10869_v18, -inf }
 0xa32   : > { %6031 = vmax.xlane.f32.xlu0 %v6030_v21  ;;  %v6021_v8 = vsel %vm1202_vm3, %v10866_v41, -inf }
 0xa33   : > { %6022 = vmax.xlane.f32.xlu1 %v6021_v8 }
 0xa36   : > { %v8329_v9 = vpop.f32.mrb[64].mxu1  ;;  %6025 = vmax.xlane.f32.xlu0 %v6024_v19 }
 0xa37   : > { %v5812_v51 = vpop.f32.mrb[65].mxu1  ;;  %6040 = vmax.xlane.f32.xlu1 %v6039_v26  ;;  %v10889_v6 = vadd.f32 %v8329_v9, %v10812_v15 }
 0xa38   : > { %v10886_v1 = vadd.f32 %v5812_v51, %v10817_v60 }
 0xa39   : > { %v6036_v7 = vsel %vm1202_vm3, %v10889_v6, -inf }
 0xa3a   : > { %6043 = vmax.xlane.f32.xlu0 %v6042_v28  ;;  %v6033_v10 = vsel %vm1202_vm3, %v10886_v1, -inf }
 0xa3b   : > { %6034 = vmax.xlane.f32.xlu1 %v6033_v10 }
 0xa3e   : > { %v8343_v40 = vpop.f32.mrb[66].mxu1  ;;  %6037 = vmax.xlane.f32.xlu0 %v6036_v7 }
 0xa3f   : > { %v10898_v22 = vadd.f32 %v8343_v40, %v10812_v15  ;;  %v5994_v24 = vpop.f32.mrb[67].mxu1 }
 0xa41   : > { %v6048_v50 = vsel %vm1202_vm3, %v10898_v22, -inf }
 0xa42   : > { %6049 = vmax.xlane.f32.xlu0 %v6048_v50 }
 0xa4b   : > { %v6008_v12 = vpop.xlane.xlu1 %6007 }
 0xa4c   : > { %9085 = vrot.lane.b32.xlu1 %v9534_v49, %s9388_s15  ;;  %v6005_v20 = vpop.xlane.xlu0 %6004  ;;  %v6052_v55 = vsub.f32 %v10820_v27, %v6008_v12 }
 0xa4d   : > { %v6051_v35 = vsub.f32 %v10823_v34, %v6005_v20 }
 0xa4e   : > { %v6069_v21 = vmul.f32 1.442695, %v6052_v55 }
 0xa4f   : > { %v6067_v15 = vmul.f32 1.442695, %v6051_v35 }
 0xa51   : > { %9306 = vpow2.f32 %v6067_v15 }
 0xa52   : > { %9308 = vpow2.f32 %v6069_v21 }
 0xa53   : > { %v6020_v52 = vpop.xlane.xlu0 %6019 }
 0xa54   : > { %v6017_v54 = vpop.xlane.xlu1 %6016  ;;  %v6056_v8 = vsub.f32 %v10830_v29, %v6020_v52 }
 0xa55   : > { %v6055_v44 = vsub.f32 %v10833_v0, %v6017_v54 }
 0xa56   : > { %v6077_v49 = vmul.f32 1.442695, %v6056_v8 }
 0xa57   : > { %v6075_v19 = vmul.f32 1.442695, %v6055_v44 }
 0xa58   : > { %9080 = vrot.lane.b32.xlu0 %v9516_v39, %s9388_s15  ;;  %v10911_v39 = vadd.f32 %v5994_v24, %v10817_v60 }
 0xa59   : > { %9310 = vpow2.f32 %v6075_v19 }
 0xa5a   : > { %9312 = vpow2.f32 %v6077_v49  ;;  %v6045_v34 = vsel %vm1202_vm3, %v10911_v39, -inf }
 0xa5b   : > { %v10915_v27 = vpop.eup %9306 }
 0xa5c   : > { %v10917_v9 = vpop.eup %9308  ;;  %v6099_v29 = vsel %vm1202_vm3, %v10915_v27, 0.0 }
 0xa5d   : > { %v6102_v26 = vsel %vm1202_vm3, %v10917_v9, 0.0 }
 0xa63   : > { %v10921_v0 = vpop.eup %9310 }
 0xa64   : > { %v10925_v60 = vpop.eup %9312  ;;  %v6111_v51 = vsel %vm1202_vm3, %v10921_v0, 0.0 }
 0xa65   : > { %v6114_v28 = vsel %vm1202_vm3, %v10925_v60, 0.0 }
 0xa70   : > { %6046 = vmax.xlane.f32.xlu1 %v6045_v34 }
 0xa74   : > { %6100 = vadd.xlane.f32.xlu1 %v6099_v29 }
 0xa77   : > { %6103 = vadd.xlane.f32.xlu0 %v6102_v26 }
 0xa78   : > { %6112 = vadd.xlane.f32.xlu1 %v6111_v51 }
 0xa7b   : > { %6115 = vadd.xlane.f32.xlu0 %v6114_v28 }
 0xaaf   : > { %v6029_v10 = vpop.xlane.xlu1 %6028 }
 0xab0   : > { %v6059_v24 = vsub.f32 %v10846_v63, %v6029_v10 }
 0xab2   : > { %v6083_v35 = vmul.f32 1.442695, %v6059_v24 }
 0xab7   : > { %v6014_v7 = vpop.xlane.xlu0 %6013 }
 0xab8   : > { %v6054_v40 = vsub.f32 %v10853_v43, %v6014_v7 }
 0xaba   : > { %v6073_v50 = vmul.f32 1.442695, %v6054_v40 }
 0xabb   : > { %v6011_v12 = vpop.xlane.xlu0 %6010 }
 0xabc   : > { %9314 = vpow2.f32 %v6073_v50  ;;  %v6053_v20 = vsub.f32 %v10856_v17, %v6011_v12 }
 0xabe   : > { %v6071_v54 = vmul.f32 1.442695, %v6053_v20 }
 0xabf   : > { %v6032_v55 = vpop.xlane.xlu0 %6031 }
 0xac0   : > { %9316 = vpow2.f32 %v6071_v54  ;;  %v6060_v15 = vsub.f32 %v10861_v13, %v6032_v55  ;;  %v6023_v52 = vpop.xlane.xlu1 %6022 }
 0xac1   : > { %v6057_v44 = vsub.f32 %v10866_v41, %v6023_v52  ;;  %9318 = vpow2.f32 %v6083_v35 }
 0xac2   : > { %v6085_v21 = vmul.f32 1.442695, %v6060_v15 }
 0xac3   : > { %v6079_v8 = vmul.f32 1.442695, %v6057_v44  ;;  %v6026_v43 = vpop.xlane.xlu0 %6025 }
 0xac4   : > { %9320 = vpow2.f32 %v6085_v21  ;;  %v6058_v63 = vsub.f32 %v10869_v18, %v6026_v43  ;;  %v6041_v19 = vpop.xlane.xlu1 %6040 }
 0xac5   : > { %9322 = vpow2.f32 %v6079_v8  ;;  %v6063_v34 = vsub.f32 %v10874_v36, %v6041_v19 }
 0xac6   : > { %v10937_v49 = vpop.eup %9314  ;;  %v6081_v17 = vmul.f32 1.442695, %v6058_v63 }
 0xac7   : > { %v6044_v29 = vpop.xlane.xlu0 %6043  ;;  %v6108_v13 = vsel %vm1202_vm3, %v10937_v49, 0.0  ;;  %v6091_v18 = vmul.f32 1.442695, %v6063_v34 }
 0xac8   : > { %9324 = vpow2.f32 %v6081_v17  ;;  %v6064_v41 = vsub.f32 %v10879_v16, %v6044_v29  ;;  %v6035_v26 = vpop.xlane.xlu1 %6034  ;;  %6109 = vadd.xlane.f32.xlu0 %v6108_v13 }
 0xac9   : > { %v6061_v51 = vsub.f32 %v10886_v1, %v6035_v26 }
 0xaca   : > { %v10944_v28 = vpop.eup %9316  ;;  %v6093_v10 = vmul.f32 1.442695, %v6064_v41 }
 0xacb   : > { %v6087_v7 = vmul.f32 1.442695, %v6061_v51  ;;  %v6038_v40 = vpop.xlane.xlu0 %6037  ;;  %v6105_v36 = vsel %vm1202_vm3, %v10944_v28, 0.0  ;;  %v10948_v24 = vpop.eup %9318 }
 0xacc   : > { %9326 = vpow2.f32 %v6093_v10  ;;  %v6062_v50 = vsub.f32 %v10889_v6, %v6038_v40  ;;  %v9086_v12 = vpop.permute.xlu1 %9085  ;;  %6106 = vadd.xlane.f32.xlu1 %v6105_v36  ;;  %v6123_v15 = vsel %vm1202_vm3, %v10948_v24, 0.0 }
 0xacd   : > { %9328 = vpow2.f32 %v6087_v7  ;;  %v9088_v16 = vunpack.i.h.bf16 %v9086_v12  ;;  %v9087_v20 = vunpack.i.l.bf16 %v9086_v12 }
 0xace   : > { %v10951_v1 = vpop.eup %9320  ;;  %9330 = vpow2.f32 %v6091_v18  ;;  %v6089_v35 = vmul.f32 1.442695, %v6062_v50 }
 0xacf   : > { %v10953_v54 = vpack.c.bf16 %v9088_v16, %v9087_v20  ;;  %v6050_v55 = vpop.xlane.xlu0 %6049  ;;  %v6126_v52 = vsel %vm1202_vm3, %v10951_v1, 0.0  ;;  %v10959_v44 = vpop.eup %9322 }
 0xad0   : > { %v6066_v6 = vsub.f32 %v10898_v22, %v6050_v55  ;;  %6124 = vadd.xlane.f32.xlu1 %v6123_v15  ;;  %6127 = vadd.xlane.f32.xlu0 %v6126_v52  ;;  %9332 = vpow2.f32 %v6089_v35  ;;  %v6117_v63 = vsel %vm1202_vm3, %v10959_v44, 0.0  ;;  %v11354_v15 = vld [vmem:[#allocation27_spill] sm:$0xff] }
 0xad1   : > { %8737 = vmatprep.subr.bf16.mxu0 %v10953_v54 }
 0xad2   : > { %v10963_v21 = vpop.eup %9324  ;;  %v6097_v8 = vmul.f32 1.442695, %v6066_v6 }
 0xad3   : > { %v9081_v43 = vpop.permute.xlu0 %9080  ;;  %v6120_v19 = vsel %vm1202_vm3, %v10963_v21, 0.0 }
 0xad4   : > { %v9083_v17 = vunpack.i.h.bf16 %v9081_v43  ;;  %v9082_v34 = vunpack.i.l.bf16 %v9081_v43  ;;  %6118 = vadd.xlane.f32.xlu1 %v6117_v63  ;;  %6121 = vadd.xlane.f32.xlu0 %v6120_v19  ;;  %9334 = vpow2.f32 %v6097_v8 }
 0xad6   : > { %v10969_v22 = vpop.eup %9326  ;;  %v8732_v29 = vpack.c.bf16 %v9083_v17, %v9082_v34 }
 0xad7   : > { %v10971_v13 = vpop.eup %9328  ;;  %v6138_v41 = vsel %vm1202_vm3, %v10969_v22, 0.0 }
 0xad8   : > { %v10975_v26 = vpop.eup %9330  ;;  %6139 = vadd.xlane.f32.xlu0 %v6138_v41  ;;  %8733 = vmatprep.subr.bf16.mxu1 %v8732_v29  ;;  %v6129_v51 = vsel %vm1202_vm3, %v10971_v13, 0.0 }
 0xad9   : > { %6130 = vadd.xlane.f32.xlu1 %v6129_v51  ;;  %8735 = vmatpush3.bf16.msra.mxu1 %v8732_v29  ;;  %v6135_v18 = vsel %vm1202_vm3, %v10975_v26, 0.0 }
 0xada   : > { %v10981_v10 = vpop.eup %9332 }
 0xadb   : > { %v6132_v7 = vsel %vm1202_vm3, %v10981_v10, 0.0 }
 0xadc   : > { %6136 = vadd.xlane.f32.xlu0 %v6135_v18 }
 0xade   : > { %v10985_v40 = vpop.eup %9334 }
 0xadf   : > { %v6144_v36 = vsel %vm1202_vm3, %v10985_v40, 0.0 }
 0xae0   : > { %6133 = vadd.xlane.f32.xlu0 %v6132_v7 }
 0xae4   : > { %6145 = vadd.xlane.f32.xlu0 %v6144_v36 }
 0xaea   : > { %9095 = vrot.lane.b32.xlu1 %v9528_v46, %s9388_s15 }
 0xaee   : > { %9100 = vrot.lane.b32.xlu1 %v9566_v61, %s9388_s15 }
 0xaf2   : > { %9105 = vrot.lane.b32.xlu1 %v9550_v56, %s9388_s15 }
 0xafa   : > { %9090 = vrot.lane.b32.xlu0 %v9554_v58, %s9388_s15 }
 0xafd   : > { %v6047_v50 = vpop.xlane.xlu1 %6046 }
 0xafe   : > { %6891 = vrot.lane.b32.xlu0 %v10409_v25, %s9389_s20  ;;  %v6065_v12 = vsub.f32 %v10911_v39, %v6047_v50 }
 0xb00   : > { %v6095_v46 = vmul.f32 1.442695, %v6065_v12 }
 0xb01   : > { %v6101_v16 = vpop.xlane.xlu1 %6100 }
 0xb02   : > { %6955 = vrot.lane.b32.xlu0 %v10787_v59, %s9390_s22  ;;  %9336 = vrcp.f32 %v6101_v16 }
 0xb04   : > { %v6104_v61 = vpop.xlane.xlu0 %6103 }
 0xb05   : > { %9338 = vrcp.f32 %v6104_v61  ;;  %v6113_v56 = vpop.xlane.xlu1 %6112 }
 0xb06   : > { %9340 = vrcp.f32 %v6113_v56  ;;  %6895 = vrot.lane.b32.xlu0 %v10417_v53, %s9389_s20 }
 0xb07   : > { %9342 = vpow2.f32 %v6095_v46 }
 0xb08   : > { %v6116_v58 = vpop.xlane.xlu0 %6115 }
 0xb09   : > { %9344 = vrcp.f32 %v6116_v58 }
 0xb0a   : > { %6959 = vrot.lane.b32.xlu0 %v10795_v23, %s9390_s22 }
 0xb0c   : > { %v9337_v25 = vpop.eup %9336 }
 0xb0d   : > { %v6163_v59 = vmul.f32 %v9337_v25, %v10915_v27 }
 0xb0e   : > { %6899 = vrot.lane.b32.xlu0 %v10413_v38, %s9389_s20 }
 0xb0f   : > { %v9339_v39 = vpop.eup %9338  ;;  %8348 = vmatprep.mubr.msk.f32.mxu0 %vm1202_vm3, %v6163_v59 }
 0xb10   : > { %v9341_v20 = vpop.eup %9340  ;;  %v6164_v35 = vmul.f32 %v9339_v39, %v10917_v9  ;;  %v11353_v9 = vld [vmem:[#allocation23_spill] sm:$0xff] }
 0xb11   : > { %v6167_v53 = vmul.f32 %v9341_v20, %v10921_v0  ;;  %v11012_v55 = vpop.eup %9342 }
 0xb12   : > { %6963 = vrot.lane.b32.xlu0 %v10791_v3, %s9390_s22  ;;  %8349 = vmatmul.mubr.msk.f32.vlgmr.msra.gmra.mrb[60].mxu0 %vm1202_vm3, %v6164_v35  ;;  %v6141_v27 = vsel %vm1202_vm3, %v11012_v55, 0.0  ;;  %v11344_v3 = vld [vmem:[#allocation26_spill] sm:$0xff] }
 0xb13   : > { %v9345_v23 = vpop.eup %9344  ;;  %8739 = vmatpush3.bf16.msra.mxu0 %v10953_v54  ;;  %8362 = vmatprep.mubr.msk.f32.mxu0 %vm1202_vm3, %v6167_v53 }
 0xb14   : > { %v6168_v38 = vmul.f32 %v9345_v23, %v10925_v60 }
 0xb16   : > { %6142 = vadd.xlane.f32.xlu1 %v6141_v27  ;;  %6903 = vrot.lane.b32.xlu0 %v10425_v57, %s9389_s20  ;;  %v11345_v57 = vld [vmem:[#allocation18_spill] sm:$0xff] }
 0xb17   : > { %8363 = vmatmul.mubr.msk.f32.vlgmr.msra.gmra.mrb[62].mxu0 %vm1202_vm3, %v6168_v38 }
 0xb1a   : > { %6967 = vrot.lane.b32.xlu0 %v10803_v31, %s9390_s22  ;;  %v11346_v31 = vld [vmem:[#allocation24_spill] sm:$0xff] }
 0xb1e   : > { %6907 = vrot.lane.b32.xlu0 %v10421_v45, %s9389_s20  ;;  %v11347_v45 = vld [vmem:[#allocation20_spill] sm:$0xff] }
 0xb22   : > { %6971 = vrot.lane.b32.xlu0 %v10799_v2, %s9390_s22  ;;  %v11349_v2 = vld [vmem:[#allocation19_spill] sm:$0xff] }
 0xb26   : > { %6911 = vrot.lane.b32.xlu0 %v11344_v3, %s9389_s20 }
 0xb27   : > { %9110 = vrot.lane.b32.xlu1 %v9573_v62, %s9388_s15  ;;  %v11348_v62 = vld [vmem:[#allocation28_spill] sm:$0xff] }
 0xb2a   : > { %6975 = vrot.lane.b32.xlu0 %v10841_v30, %s9390_s22 }
 0xb2b   : > { %6893 = vrot.lane.b32.xlu1 %v11345_v57, %s9389_s20 }
 0xb2e   : > { %6915 = vrot.lane.b32.xlu0 %v11346_v31, %s9389_s20 }
 0xb2f   : > { %6957 = vrot.lane.b32.xlu1 %v10785_v42, %s9390_s22  ;;  %v11350_v42 = vld [vmem:[#allocation22_spill] sm:$0xff] }
 0xb32   : > { %6979 = vrot.lane.b32.xlu0 %v10807_v47, %s9390_s22  ;;  %v11351_v47 = vld [vmem:[#allocation21_spill] sm:$0xff] }
 0xb33   : > { %6897 = vrot.lane.b32.xlu1 %v11347_v45, %s9389_s20 }
 0xb36   : > { %6919 = vrot.lane.b32.xlu0 %v11348_v62, %s9389_s20  ;;  %v11355_v62 = vld [vmem:[#allocation5_spill] sm:$0xff] }
 0xb37   : > { %6961 = vrot.lane.b32.xlu1 %v10793_v33, %s9390_s22  ;;  %v11352_v33 = vld [vmem:[#allocation25_spill] sm:$0xff] }
 0xb3b   : > { %6901 = vrot.lane.b32.xlu1 %v11349_v2, %s9389_s20 }
 0xb3f   : > { %6965 = vrot.lane.b32.xlu1 %v10789_v11, %s9390_s22 }
 0xb43   : > { %6905 = vrot.lane.b32.xlu1 %v11350_v42, %s9389_s20 }
 0xb47   : > { %6969 = vrot.lane.b32.xlu1 %v10801_v37, %s9390_s22 }
 0xb4b   : > { %6909 = vrot.lane.b32.xlu1 %v11351_v47, %s9389_s20 }
 0xb4f   : > { %6973 = vrot.lane.b32.xlu1 %v10797_v5, %s9390_s22 }
 0xb53   : > { %6913 = vrot.lane.b32.xlu1 %v11352_v33, %s9389_s20  ;;  %v11356_v33 = vld [vmem:[#allocation7_spill] sm:$0xff] }
 0xb55   : > { %v6110_v30 = vpop.xlane.xlu0 %6109 }
 0xb56   : > { %9346 = vrcp.f32 %v6110_v30 }
 0xb57   : > { %6977 = vrot.lane.b32.xlu1 %v10839_v14, %s9390_s22 }
 0xb59   : > { %v6107_v11 = vpop.xlane.xlu1 %6106 }
 0xb5a   : > { %9348 = vrcp.f32 %v6107_v11 }
 0xb5b   : > { %6917 = vrot.lane.b32.xlu1 %v11353_v9, %s9389_s20 }
 0xb5d   : > { %v6125_v37 = vpop.xlane.xlu1 %6124  ;;  %v6128_v0 = vpop.xlane.xlu0 %6127 }
 0xb5e   : > { %9350 = vrcp.f32 %v6125_v37 }
 0xb5f   : > { %6981 = vrot.lane.b32.xlu1 %v10805_v48, %s9390_s22 }
 0xb60   : > { %v9347_v54 = vpop.eup %9346 }
 0xb61   : > { %v6119_v5 = vpop.xlane.xlu1 %6118  ;;  %v6122_v60 = vpop.xlane.xlu0 %6121  ;;  %v6166_v8 = vmul.f32 %v9347_v54, %v10937_v49  ;;  %v11358_v54 = vld [vmem:[#allocation9_spill] sm:$0xff] }
 0xb62   : > { %9352 = vrcp.f32 %v6119_v5 }
 0xb63   : > { %6921 = vrot.lane.b32.xlu1 %v11354_v15, %s9389_s20  ;;  %9354 = vrcp.f32 %v6128_v0 }
 0xb64   : > { %v9349_v14 = vpop.eup %9348 }
 0xb65   : > { %v6140_v52 = vpop.xlane.xlu0 %6139  ;;  %v6165_v6 = vmul.f32 %v9349_v14, %v10944_v28 }
 0xb66   : > { %v6131_v43 = vpop.xlane.xlu1 %6130 }
 0xb67   : > { %8355 = vmatprep.mubr.msk.f32.mxu1 %vm1202_vm3, %v6165_v6 }
 0xb68   : > { %v9351_v63 = vpop.eup %9350  ;;  %8356 = vmatmul.mubr.msk.f32.vlgmr.msra.gmra.mrb[68].mxu1 %vm1202_vm3, %v6166_v8  ;;  %v11359_v8 = vld [vmem:[#allocation15_spill] sm:$0xff] }
 0xb69   : > { %v6137_v48 = vpop.xlane.xlu0 %6136  ;;  %v6171_v19 = vmul.f32 %v9351_v63, %v10948_v24 }
 0xb6a   : > { %9356 = vrcp.f32 %v6137_v48  ;;  %v9096_v17 = vpop.permute.xlu1 %9095 }
 0xb6b   : > { %v9098_v34 = vunpack.i.h.bf16 %v9096_v17  ;;  %v9097_v29 = vunpack.i.l.bf16 %v9096_v17  ;;  %8376 = vmatprep.mubr.msk.f32.mxu0 %vm1202_vm3, %v6171_v19  ;;  %9358 = vrcp.f32 %v6140_v52 }
 0xb6c   : > { %v9353_v41 = vpop.eup %9352  ;;  %9360 = vrcp.f32 %v6122_v60 }
 0xb6d   : > { %v8744_v28 = vpack.c.bf16 %v9098_v34, %v9097_v29  ;;  %v6134_v51 = vpop.xlane.xlu0 %6133  ;;  %v6169_v49 = vmul.f32 %v9353_v41, %v10959_v44  ;;  %v9355_v18 = vpop.eup %9354  ;;  %9362 = vrcp.f32 %v6131_v43 }
 0xb6e   : > { %v9101_v7 = vpop.permute.xlu1 %9100  ;;  %v6172_v24 = vmul.f32 %v9355_v18, %v10951_v1  ;;  %9364 = vrcp.f32 %v6134_v51  ;;  %v11360_v51 = vld [vmem:[#allocation11_spill] sm:$0xff] }
 0xb6f   : > { %8369 = vmatprep.mubr.msk.f32.mxu1 %vm1202_vm3, %v6169_v49  ;;  %8745 = vmatprep.subr.bf16.mxu0 %v8744_v28  ;;  %v9103_v25 = vunpack.i.h.bf16 %v9101_v7  ;;  %v9102_v59 = vunpack.i.l.bf16 %v9101_v7 }
 0xb70   : > { %8747 = vmatpush3.bf16.msra.mxu0 %v8744_v28 }
 0xb71   : > { %v6146_v36 = vpop.xlane.xlu0 %6145  ;;  %v8748_v27 = vpack.c.bf16 %v9103_v25, %v9102_v59 }
 0xb72   : > { %v9106_v50 = vpop.permute.xlu1 %9105  ;;  %9366 = vrcp.f32 %v6146_v36 }
 0xb73   : > { %v9108_v12 = vunpack.i.h.bf16 %v9106_v50  ;;  %v9107_v16 = vunpack.i.l.bf16 %v9106_v50  ;;  %8377 = vmatmul.mubr.msk.f32.vlgmr.msra.gmra.mrb[64].mxu0 %vm1202_vm3, %v6172_v24 }
 0xb74   : > { %v9357_v46 = vpop.eup %9356 }
 0xb75   : > { %v8752_v61 = vpack.c.bf16 %v9108_v12, %v9107_v16  ;;  %v9091_v44 = vpop.permute.xlu0 %9090  ;;  %v6175_v56 = vmul.f32 %v9357_v46, %v10975_v26  ;;  %v9359_v58 = vpop.eup %9358 }
 0xb76   : > { %v9093_v39 = vunpack.i.h.bf16 %v9091_v44  ;;  %v9092_v20 = vunpack.i.l.bf16 %v9091_v44  ;;  %v9361_v35 = vpop.eup %9360  ;;  %v6176_v53 = vmul.f32 %v9359_v58, %v10969_v22  ;;  %v11361_v44 = vld [vmem:[#allocation4_spill] sm:$0xff] }
 0xb77   : > { %8753 = vmatprep.subr.bf16.mxu0 %v8752_v61  ;;  %8390 = vmatprep.mubr.msk.f32.mxu0 %vm1202_vm3, %v6175_v56  ;;  %v9363_v38 = vpop.eup %9362  ;;  %v6170_v26 = vmul.f32 %v9361_v35, %v10963_v21  ;;  %v11363_v35 = vld [vmem:[#allocation12_spill] sm:$0xff] }
 0xb78   : > { %v8740_v1 = vpack.c.bf16 %v9093_v39, %v9092_v20  ;;  %8755 = vmatpush3.bf16.msra.mxu0 %v8752_v61  ;;  %v9365_v3 = vpop.eup %9364  ;;  %v6173_v31 = vmul.f32 %v9363_v38, %v10971_v13  ;;  %v11362_v39 = vld [vmem:[#allocation6_spill] sm:$0xff] }
 0xb79   : > { %v11086_v23 = vpop.permute.xlu0 %6891  ;;  %v6174_v22 = vmul.f32 %v9365_v3, %v10981_v10  ;;  %v11357_v10 = vld [vmem:[#allocation13_spill] sm:$0xff]  ;;  %v11364_v3 = vld [vmem:[#allocation8_spill] sm:$0xff] }
 0xb7a   : > { %8741 = vmatprep.subr.bf16.mxu1 %v8740_v1 }
 0xb7b   : > { %8743 = vmatpush3.bf16.msra.mxu1 %v8740_v1  ;;  %8391 = vmatmul.mubr.msk.f32.vlgmr.msra.gmra.mrb[66].mxu0 %vm1202_vm3, %v6176_v53 }
 0xb7c   : > { %8749 = vmatprep.subr.bf16.mxu1 %v8748_v27  ;;  %v9367_v7 = vpop.eup %9366 }
 0xb7d   : > { %v11090_v57 = vpop.permute.xlu0 %6955  ;;  %v6178_v46 = vmul.f32 %v9367_v7, %v10985_v40 }
 0xb7e   : > { %8370 = vmatmul.mubr.msk.f32.vlgmr.msra.gmra.mrb[70].mxu1 %vm1202_vm3, %v6170_v26 }
 0xb7f   : > { %8751 = vmatpush3.bf16.msra.mxu1 %v8748_v27  ;;  %8383 = vmatprep.mubr.msk.f32.mxu1 %vm1202_vm3, %v6173_v31 }
 0xb81   : > { %v6896_v45 = vpop.permute.xlu0 %6895 }
 0xb82   : > { %v7069_v2 = vsel %vm495_vm1, %v11355_v62, %v6896_v45  ;;  %8384 = vmatmul.mubr.msk.f32.vlgmr.msra.gmra.mrb[72].mxu1 %vm1202_vm3, %v6174_v22 }
 0xb85   : > { %v6960_v21 = vpop.permute.xlu0 %6959 }
 0xb86   : > { %v11100_v42 = vsel %vm1202_vm3, %v7069_v2, %v6960_v21  ;;  %v259_v2 = vld [vmem:[%s11312_s4] sm:$0xff]  ;;  %v260_v21 = vld [vmem:[%s11312_s4 + $0x8] sm:$0xff] }
 0xb89   : > { %v6900_v47 = vpop.permute.xlu0 %6899 }
 0xb8a   : > { %v7071_v13 = vsel %vm495_vm1, %v11356_v33, %v6900_v47  ;;  %v11365_v47 = vld [vmem:[#allocation14_spill] sm:$0xff] }
 0xb8d   : > { %v6964_v30 = vpop.permute.xlu0 %6963 }
 0xb8e   : > { %v11105_v11 = vsel %vm1202_vm3, %v7071_v13, %v6964_v30  ;;  %v8760_v13 = vpack.c.bf16 %v260_v21, %v259_v2 }
 0xb90   : > { %8761 = vmatprep.subr.bf16.mxu0 %v8760_v13 }
 0xb91   : > { %v6904_v9 = vpop.permute.xlu0 %6903  ;;  %8763 = vmatpush3.bf16.msra.mxu0 %v8760_v13 }
 0xb92   : > { %v7073_v37 = vsel %vm495_vm1, %v11357_v10, %v6904_v9  ;;  %v261_v10 = vld [vmem:[%s11312_s4 + $0x10] sm:$0xff] }
 0xb95   : > { %v6968_v0 = vpop.permute.xlu0 %6967 }
 0xb96   : > { %v11110_v5 = vsel %vm1202_vm3, %v7073_v37, %v6968_v0  ;;  %v262_v37 = vld [vmem:[%s11312_s4 + $0x18] sm:$0xff] }
 0xb97   : > { %v8764_v0 = vpack.c.bf16 %v262_v37, %v261_v10  ;;  %v11369_v10 = vld [vmem:[#allocation17_spill] sm:$0xff] }
 0xb99   : > { %v6908_v60 = vpop.permute.xlu0 %6907  ;;  %8765 = vmatprep.subr.bf16.mxu0 %v8764_v0 }
 0xb9a   : > { %v7075_v15 = vsel %vm495_vm1, %v11358_v54, %v6908_v60  ;;  %v11366_v54 = vld [vmem:[#allocation10_spill] sm:$0xff]  ;;  %8767 = vmatpush3.bf16.msra.mxu0 %v8764_v0  ;;  %v11370_v0 = vld [vmem:[#allocation16_spill] sm:$0xff] }
 0xb9d   : > { %v6972_v14 = vpop.permute.xlu0 %6971 }
 0xb9e   : > { %v11115_v52 = vsel %vm1202_vm3, %v7075_v15, %v6972_v14 }
 0xba1   : > { %v6912_v6 = vpop.permute.xlu0 %6911 }
 0xba2   : > { %v7077_v43 = vsel %vm495_vm1, %v11359_v8, %v6912_v6 }
 0xba3   : > { %v6143_v63 = vpop.xlane.xlu1 %6142 }
 0xba4   : > { %9368 = vrcp.f32 %v6143_v63 }
 0xba5   : > { %v6976_v48 = vpop.permute.xlu0 %6975 }
 0xba6   : > { %v11120_v19 = vsel %vm1202_vm3, %v7077_v43, %v6976_v48 }
 0xba7   : > { %v9111_v17 = vpop.permute.xlu1 %9110 }
 0xba8   : > { %v9113_v34 = vunpack.i.h.bf16 %v9111_v17  ;;  %v9112_v29 = vunpack.i.l.bf16 %v9111_v17 }
 0xba9   : > { %v6916_v41 = vpop.permute.xlu0 %6915 }
 0xbaa   : > { %v8756_v28 = vpack.c.bf16 %v9113_v34, %v9112_v29  ;;  %v7079_v49 = vsel %vm495_vm1, %v11360_v51, %v6916_v41 }
 0xbab   : > { %v11124_v18 = vpop.permute.xlu1 %6893 }
 0xbac   : > { %8757 = vmatprep.subr.bf16.mxu1 %v8756_v28 }
 0xbad   : > { %v6980_v24 = vpop.permute.xlu0 %6979  ;;  %8759 = vmatpush3.bf16.msra.mxu1 %v8756_v28 }
 0xbae   : > { %v9369_v36 = vpop.eup %9368  ;;  %v11127_v50 = vsel %vm1202_vm3, %v7079_v49, %v6980_v24 }
 0xbaf   : > { %v11129_v12 = vpop.permute.xlu1 %6957  ;;  %v6177_v16 = vmul.f32 %v9369_v36, %v11012_v55 }
 0xbb1   : > { %8397 = vmatprep.mubr.msk.f32.mxu1 %vm1202_vm3, %v6177_v16  ;;  %v11189_v36 = vpop.permute.xlu0 %6919 }
 0xbb2   : > { %8398 = vmatmul.mubr.msk.f32.vlgmr.msra.gmra.mrb[74].mxu1 %vm1202_vm3, %v6178_v46 }
 0xbb3   : > { %v6898_v61 = vpop.permute.xlu1 %6897 }
 0xbb4   : > { %v7070_v56 = vsel %vm495_vm1, %v11361_v44, %v6898_v61  ;;  %v11367_v61 = vld [vmem:[#allocation3_spill] sm:$0xff] }
 0xbb5   : > { %v7067_v44 = vsel %vm495_vm1, %v11367_v61, %v11086_v23 }
 0xbb7   : > { %v6962_v58 = vpop.permute.xlu1 %6961 }
 0xbb8   : > { %v11138_v25 = vsel %vm1202_vm3, %v7070_v56, %v6962_v58  ;;  %v7083_v58 = vsel %vm1202_vm3, %v7067_v44, %v11090_v57 }
 0xbbb   : > { %v6902_v59 = vpop.permute.xlu1 %6901 }
 0xbbc   : > { %v7072_v20 = vsel %vm495_vm1, %v11362_v39, %v6902_v59  ;;  %v11368_v59 = vld [vmem:[#allocation2_spill] sm:$0xff] }
 0xbbd   : > { %v7068_v39 = vsel %vm495_vm1, %v11368_v59, %v11124_v18 }
 0xbbf   : > { %v6966_v1 = vpop.permute.xlu1 %6965 }
 0xbc0   : > { %v11143_v55 = vsel %vm1202_vm3, %v7072_v20, %v6966_v1  ;;  %v7084_v1 = vsel %vm1202_vm3, %v7068_v39, %v11129_v12 }
 0xbc3   : > { %v6906_v40 = vpop.permute.xlu1 %6905 }
 0xbc4   : > { %v7074_v53 = vsel %vm495_vm1, %v11363_v35, %v6906_v40 }
 0xbc7   : > { %v6970_v38 = vpop.permute.xlu1 %6969 }
 0xbc8   : > { %v11148_v27 = vsel %vm1202_vm3, %v7074_v53, %v6970_v38 }
 0xbcb   : > { %v6910_v26 = vpop.permute.xlu1 %6909 }
 0xbcc   : > { %v7076_v31 = vsel %vm495_vm1, %v11364_v3, %v6910_v26 }
 0xbcf   : > { %v6974_v22 = vpop.permute.xlu1 %6973 }
 0xbd0   : > { %v11153_v45 = vsel %vm1202_vm3, %v7076_v31, %v6974_v22 }
 0xbd3   : > { %v6914_v62 = vpop.permute.xlu1 %6913 }
 0xbd4   : > { %v7078_v33 = vsel %vm495_vm1, %v11365_v47, %v6914_v62 }
 0xbd7   : > { %v6978_v30 = vpop.permute.xlu1 %6977 }
 0xbd8   : > { %v11164_v9 = vsel %vm1202_vm3, %v7078_v33, %v6978_v30 }
 0xbdb   : > { %v6918_v60 = vpop.permute.xlu1 %6917 }
 0xbdc   : > { %v7080_v15 = vsel %vm495_vm1, %v11366_v54, %v6918_v60 }
 0xbdf   : > { %v6982_v14 = vpop.permute.xlu1 %6981 }
 0xbe0   : > { %v11175_v6 = vsel %vm1202_vm3, %v7080_v15, %v6982_v14 }
 0xbe3   : > { %v11187_v24 = vpop.permute.xlu1 %6921 }
 0xbe5   : > { %v8350_v8 = vpop.f32.mrb[60].mxu0 }
 0xbe6   : > { %7021 = vrot.lane.b32.xlu1 %v8350_v8, %s9391_s9  ;;  %v6257_v43 = vpop.f32.mrb[61].mxu0  ;;  %v7605_v8 = vld [vmem:[%s11313_s5] ss:$0 sm:$0xff] }
 0xbe7   : > { %7019 = vrot.lane.b32.xlu0 %v6257_v43, %s9391_s9 }
 0xbea   : > { %v8364_v63 = vpop.f32.mrb[62].mxu0 }
 0xbeb   : > { %7029 = vrot.lane.b32.xlu1 %v8364_v63, %s9391_s9  ;;  %v6431_v48 = vpop.f32.mrb[63].mxu0 }
 0xbec   : > { %7027 = vrot.lane.b32.xlu0 %v6431_v48, %s9391_s9 }
 0xc3b   : > { %v8357_v17 = vpop.f32.mrb[68].mxu1 }
 0xc3c   : > { %7025 = vrot.lane.b32.xlu1 %v8357_v17, %s9391_s9  ;;  %v6344_v34 = vpop.f32.mrb[69].mxu1 }
 0xc3d   : > { %7023 = vrot.lane.b32.xlu0 %v6344_v34, %s9391_s9 }
 0xc46   : > { %v8378_v29 = vpop.f32.mrb[64].mxu0 }
 0xc47   : > { %v6605_v41 = vpop.f32.mrb[65].mxu0  ;;  %7037 = vrot.lane.b32.xlu1 %v8378_v29, %s9391_s9 }
 0xc48   : > { %7035 = vrot.lane.b32.xlu0 %v6605_v41, %s9391_s9 }
 0xc4e   : > { %v8392_v28 = vpop.f32.mrb[66].mxu0 }
 0xc4f   : > { %v6779_v51 = vpop.f32.mrb[67].mxu0 }
 0xc51   : > { %v8371_v49 = vpop.f32.mrb[70].mxu1 }
 0xc52   : > { %7033 = vrot.lane.b32.xlu1 %v8371_v49, %s9391_s9  ;;  %v6518_v7 = vpop.f32.mrb[71].mxu1 }
 0xc53   : > { %7031 = vrot.lane.b32.xlu0 %v6518_v7, %s9391_s9 }
 0xc55   : > { %v8385_v16 = vpop.f32.mrb[72].mxu1 }
 0xc56   : > { %7045 = vrot.lane.b32.xlu1 %v8392_v28, %s9391_s9  ;;  %v6692_v46 = vpop.f32.mrb[73].mxu1 }
 0xc57   : > { %7043 = vrot.lane.b32.xlu0 %v6779_v51, %s9391_s9 }
 0xc58   : > { %v7022_v56 = vpop.permute.xlu1 %7021 }
 0xc59   : > { %v7020_v20 = vpop.permute.xlu0 %7019  ;;  %v7101_v35 = vsel %vm7099_vm4, %v7084_v1, %v7022_v56 }
 0xc5a   : > { %v7100_v40 = vsel %vm7099_vm4, %v7083_v58, %v7020_v20  ;;  %7041 = vrot.lane.b32.xlu1 %v8385_v16, %s9391_s9 }
 0xc5b   : > { %8408 = vmatprep.mubr.msk.f32.mxu0 %vm295_vm0, %v7100_v40  ;;  %7039 = vrot.lane.b32.xlu0 %v6692_v46, %s9391_s9 }
 0xc5c   : > { %8409 = vmatmul.mubr.msk.f32.vlgmr.msra.gmra.mrb[68].mxu0 %vm295_vm0, %v7101_v35 }
 0xc5d   : > { %v7030_v18 = vpop.permute.xlu1 %7029 }
 0xc5e   : > { %6985 = vrot.lane.b32.xlu1 %v10843_v32, %s9390_s22  ;;  %v7028_v12 = vpop.permute.xlu0 %7027 }
 0xc5f   : > { %6983 = vrot.lane.b32.xlu0 %v10848_v4, %s9390_s22  ;;  %v7104_v32 = vsel %vm7099_vm4, %v11105_v11, %v7028_v12  ;;  %v7105_v4 = vsel %vm7099_vm4, %v11143_v55, %v7030_v18 }
 0xc85   : > { %v8399_v23 = vpop.f32.mrb[74].mxu1 }
 0xc86   : > { %7049 = vrot.lane.b32.xlu1 %v8399_v23, %s9391_s9  ;;  %v6866_v57 = vpop.f32.mrb[75].mxu1 }
 0xc87   : > { %7047 = vrot.lane.b32.xlu0 %v6866_v57, %s9391_s9 }
 0xcae   : > { %v7026_v53 = vpop.permute.xlu1 %7025 }
 0xcaf   : > { %v7024_v38 = vpop.permute.xlu0 %7023  ;;  %v7103_v3 = vsel %vm7099_vm4, %v11138_v25, %v7026_v53 }
 0xcb0   : > { %v7102_v26 = vsel %vm7099_vm4, %v11100_v42, %v7024_v38 }
 0xcb1   : > { %8411 = vmatprep.mubr.msk.f32.mxu0 %vm295_vm0, %v7102_v26 }
 0xcb2   : > { %8412 = vmatmul.mubr.msk.f32.gmra.mrb[70].mxu0 %vm295_vm0, %v7103_v3 }
 0xcb3   : > { %8414 = vmatprep.mubr.msk.f32.mxu0 %vm295_vm0, %v7104_v32 }
 0xcb6   : > { %8415 = vmatmul.mubr.msk.f32.gmra.mrb[72].mxu0 %vm295_vm0, %v7105_v4 }
 0xcb9   : > { %v7038_v31 = vpop.permute.xlu1 %7037 }
 0xcba   : > { %v7036_v22 = vpop.permute.xlu0 %7035  ;;  %v7109_v47 = vsel %vm7099_vm4, %v11153_v45, %v7038_v31 }
 0xcbb   : > { %v7108_v11 = vsel %vm7099_vm4, %v11115_v52, %v7036_v22 }
 0xcc4   : > { %v7034_v42 = vpop.permute.xlu1 %7033 }
 0xcc5   : > { %v7032_v62 = vpop.permute.xlu0 %7031  ;;  %v7107_v2 = vsel %vm7099_vm4, %v11148_v27, %v7034_v42 }
 0xcc6   : > { %v7106_v25 = vsel %vm7099_vm4, %v11110_v5, %v7032_v62 }
 0xcc7   : > { %8417 = vmatprep.mubr.msk.f32.mxu0 %vm295_vm0, %v7106_v25 }
 0xcc8   : > { %v7046_v21 = vpop.permute.xlu1 %7045  ;;  %8418 = vmatmul.mubr.msk.f32.gmra.mrb[74].mxu0 %vm295_vm0, %v7107_v2 }
 0xcc9   : > { %8420 = vmatprep.mubr.msk.f32.mxu0 %vm295_vm0, %v7108_v11  ;;  %v7044_v55 = vpop.permute.xlu0 %7043  ;;  %v7113_v45 = vsel %vm7099_vm4, %v11175_v6, %v7046_v21 }
 0xcca   : > { %v7112_v52 = vsel %vm7099_vm4, %v11127_v50, %v7044_v55  ;;  %v7082_v50 = vsel %vm495_vm1, %v11370_v0, %v11187_v24 }
 0xccc   : > { %8421 = vmatmul.mubr.msk.f32.gmra.mrb[76].mxu0 %vm295_vm0, %v7109_v47  ;;  %v7042_v5 = vpop.permute.xlu1 %7041 }
 0xccd   : > { %v7040_v33 = vpop.permute.xlu0 %7039  ;;  %v7111_v13 = vsel %vm7099_vm4, %v11164_v9, %v7042_v5  ;;  %v7081_v9 = vsel %vm495_vm1, %v11369_v10, %v11189_v36 }
 0xcce   : > { %v7110_v27 = vsel %vm7099_vm4, %v11120_v19, %v7040_v33 }
 0xccf   : > { %8423 = vmatprep.mubr.msk.f32.mxu0 %vm295_vm0, %v7110_v27 }
 0xcd0   : > { %8424 = vmatmul.mubr.msk.f32.gmra.mrb[78].mxu0 %vm295_vm0, %v7111_v13  ;;  %v6986_v30 = vpop.permute.xlu1 %6985 }
 0xcd1   : > { %8426 = vmatprep.mubr.msk.f32.mxu0 %vm295_vm0, %v7112_v52  ;;  %v6984_v19 = vpop.permute.xlu0 %6983  ;;  %v7098_v15 = vsel %vm1202_vm3, %v7082_v50, %v6986_v30 }
 0xcd2   : > { %v7097_v60 = vsel %vm1202_vm3, %v7081_v9, %v6984_v19 }
 0xcd4   : > { %8427 = vmatmul.mubr.msk.f32.gmra.mrb[80].mxu0 %vm295_vm0, %v7113_v45 }
 0xcf8   : > { %v7050_v37 = vpop.permute.xlu1 %7049 }
 0xcf9   : > { %v7048_v54 = vpop.permute.xlu0 %7047  ;;  %v7115_v6 = vsel %vm7099_vm4, %v7098_v15, %v7050_v37 }
 0xcfa   : > { %v7114_v14 = vsel %vm7099_vm4, %v7097_v60, %v7048_v54 }
 0xcfb   : > { %8429 = vmatprep.mubr.msk.f32.mxu0 %vm295_vm0, %v7114_v14 }
 0xcfc   : > { %8430 = vmatmul.mubr.msk.f32.gmra.mrb[82].mxu0 %vm295_vm0, %v7115_v6 }
 0xd2f   : > { %v8410_v43 = vpop.f32.mrb[68].mxu0 }
 0xd30   : > { %v7242_v63 = vadd.f32 %v8410_v43, %v7605_v8  ;;  %v7236_v48 = vpop.f32.mrb[69].mxu0 }
 0xd31   : > { %v7237_v17 = vadd.f32 %v7605_v8, %v7236_v48 }
 0xd32   : > { %7316 = vst.msk [vmem:[%s11271_s14 + $0x8] sm:$0xff] %vm295_vm0, %v7242_v63 }
 0xd33   : > { %7315 = vst.msk [vmem:[%s11271_s14] sm:$0xff] %vm295_vm0, %v7237_v17 }
 0xd85   : > { %v8413_v34 = vpop.f32.mrb[70].mxu0 }
 0xd86   : > { %v7252_v29 = vadd.f32 %v8413_v34, %v7605_v8  ;;  %v7246_v41 = vpop.f32.mrb[71].mxu0 }
 0xd87   : > { %v7247_v28 = vadd.f32 %v7605_v8, %v7246_v41 }
 0xd88   : > { %7318 = vst.msk [vmem:[%s11271_s14 + $0x18] sm:$0xff] %vm295_vm0, %v7252_v29 }
 0xd89   : > { %7317 = vst.msk [vmem:[%s11271_s14 + $0x10] sm:$0xff] %vm295_vm0, %v7247_v28  ;;  %v8416_v51 = vpop.f32.mrb[72].mxu0 }
 0xd8a   : > { %v7262_v49 = vadd.f32 %v8416_v51, %v7605_v8  ;;  %v7256_v7 = vpop.f32.mrb[73].mxu0 }
 0xd8b   : > { %v7257_v24 = vadd.f32 %v7605_v8, %v7256_v7 }
 0xd8c   : > { %7320 = vst.msk [vmem:[%s11271_s14 + $0x28] sm:$0xff] %vm295_vm0, %v7262_v49 }
 0xd8d   : > { %7319 = vst.msk [vmem:[%s11271_s14 + $0x20] sm:$0xff] %vm295_vm0, %v7257_v24 }
 0xd9b   : > { %v8419_v36 = vpop.f32.mrb[74].mxu0 }
 0xd9c   : > { %v7272_v16 = vadd.f32 %v8419_v36, %v7605_v8  ;;  %v7266_v46 = vpop.f32.mrb[75].mxu0 }
 0xd9d   : > { %v7267_v61 = vadd.f32 %v7605_v8, %v7266_v46 }
 0xd9e   : > { %7322 = vst.msk [vmem:[%s11271_s14 + $0x38] sm:$0xff] %vm295_vm0, %v7272_v16 }
 0xd9f   : > { %7321 = vst.msk [vmem:[%s11271_s14 + $0x30] sm:$0xff] %vm295_vm0, %v7267_v61  ;;  %v8422_v44 = vpop.f32.mrb[76].mxu0 }
 0xda0   : > { %v7282_v56 = vadd.f32 %v8422_v44, %v7605_v8  ;;  %v7276_v58 = vpop.f32.mrb[77].mxu0 }
 0xda1   : > { %v7277_v59 = vadd.f32 %v7605_v8, %v7276_v58 }
 0xda2   : > { %7324 = vst.msk [vmem:[%s11271_s14 + $0x48] sm:$0xff] %vm295_vm0, %v7282_v56 }
 0xda3   : > { %7323 = vst.msk [vmem:[%s11271_s14 + $0x40] sm:$0xff] %vm295_vm0, %v7277_v59  ;;  %v8425_v39 = vpop.f32.mrb[78].mxu0 }
 0xda4   : > { %v7292_v20 = vadd.f32 %v8425_v39, %v7605_v8  ;;  %v7286_v1 = vpop.f32.mrb[79].mxu0 }
 0xda5   : > { %v7287_v40 = vadd.f32 %v7605_v8, %v7286_v1 }
 0xda6   : > { %7326 = vst.msk [vmem:[%s11271_s14 + $0x58] sm:$0xff] %vm295_vm0, %v7292_v20 }
 0xda7   : > { %7325 = vst.msk [vmem:[%s11271_s14 + $0x50] sm:$0xff] %vm295_vm0, %v7287_v40  ;;  %v8428_v35 = vpop.f32.mrb[80].mxu0 }
 0xda8   : > { %v7302_v23 = vadd.f32 %v8428_v35, %v7605_v8  ;;  %v7296_v57 = vpop.f32.mrb[81].mxu0 }
 0xda9   : > { %v7297_v18 = vadd.f32 %v7605_v8, %v7296_v57 }
 0xdaa   : > { %7328 = vst.msk [vmem:[%s11271_s14 + $0x68] sm:$0xff] %vm295_vm0, %v7302_v23 }
 0xdab   : > { %7327 = vst.msk [vmem:[%s11271_s14 + $0x60] sm:$0xff] %vm295_vm0, %v7297_v18 }
 0xdcf   : > { %v8431_v12 = vpop.f32.mrb[82].mxu0 }
 0xdd0   : > { %v7312_v53 = vadd.f32 %v8431_v12, %v7605_v8  ;;  %v7306_v38 = vpop.f32.mrb[83].mxu0 }
 0xdd1   : > { %v7307_v26 = vadd.f32 %v7605_v8, %v7306_v38 }
 0xdd2   : > { %7330 = vst.msk [vmem:[%s11271_s14 + $0x78] sm:$0xff] %vm295_vm0, %v7312_v53 }
 0xdd3   : > { %7329 = vst.msk [vmem:[%s11271_s14 + $0x70] sm:$0xff] %vm295_vm0, %v7307_v26 }
 0xdd4 PF: > { %s16_s21 = sadd.s32 1, %s9376_s21  }
 0xdd5   : > { %p13_p4 = scmp.ge.s32.totalorder %s16_s21, 6  }
 0xdd7   :  { %15 = sbr.rel (!%p13_p4) target bundleno = 1 (0x1), region = 74 }

</bundles_post_ra>
